<compile_context>
chip_gen: v7x
topology: tpu7x:2x2x1
jax: 0.10.0
libtpu: 0.0.40
codegen_flags: <defaults>
</compile_context>

<pallas_src>
import functools

import jax
import jax.numpy as jnp
from jax.experimental import pallas as pl
from jax.experimental.pallas import tpu as pltpu

# Synthetic stand-ins for MAX_DEPTH / MAX_HEIGHT / MAX_WIDTH (small, TPU-friendly).
MAX_DEPTH, MAX_HEIGHT, MAX_WIDTH = 4, 8, 8
INPUT_SIZE = MAX_DEPTH * MAX_HEIGHT * MAX_WIDTH  # 256

LATENT = 64

# (in_features, out_features) of the 8 Linear layers, encoder then decoder (PyTorch shapes).
LAYER_DIMS = [
    (INPUT_SIZE, 512), (512, 256), (256, 128), (128, LATENT),   # encoder
    (LATENT, 128), (128, 256), (256, 512), (512, INPUT_SIZE),   # decoder
]
N_LAYERS = len(LAYER_DIMS)
N_FUSED = N_LAYERS - 1  # layers 3 & 4 fused into one 128x128 layer


def _round_up(n, m):
    return ((n + m - 1) // m) * m


# --------------------------------------------------------------------------------------
# Kernel: whole (fused) 7-layer MLP; one grid step == one batch tile. Weights stay in VMEM.
# --------------------------------------------------------------------------------------
def _ae_kernel(x_ref, *refs):
    # refs = (w1, b1, ..., w7, b7, out_ref); weights bf16, biases f32 (1, out).
    out_ref = refs[-1]
    param_refs = refs[:-1]

    h = x_ref[...]                                    # (TILE_B, 256) bf16
    for li in range(N_FUSED):
        w = param_refs[2 * li][...]                   # bf16 (in, out)
        b = param_refs[2 * li + 1][...]               # f32  (1, out) -> broadcasts over batch
        z = jnp.dot(h, w, preferred_element_type=jnp.float32) + b   # f32 MXU accumulate
        if li == N_FUSED - 1:
            a = 1.0 / (1.0 + jnp.exp(-z))             # exact sigmoid (exp on EUP), f32
        else:
            a = jnp.maximum(z, 0.0)                   # ReLU on the f32 accumulator (v5e-safe)
        h = a.astype(jnp.bfloat16)                    # bf16 inter-layer activations
    out_ref[...] = h                                  # bf16 output tile


# --------------------------------------------------------------------------------------
# Parameter packing: fuse the activation-free latent pair (Linear(128,64) ; Linear(64,128))
# into one 128x128 layer, then cast weights to bf16 / biases to f32.
# --------------------------------------------------------------------------------------
def pack_params(params):
    ws = [params[2 * i] for i in range(N_LAYERS)]
    bs = [params[2 * i + 1] for i in range(N_LAYERS)]

    w34 = jnp.dot(ws[3], ws[4])              # (128, 128) f32, exact fold (no activation between)
    b34 = jnp.dot(bs[3], ws[4]) + bs[4]      # (1, 128)  f32

    fused_ws = [ws[0], ws[1], ws[2], w34, ws[5], ws[6], ws[7]]
    fused_bs = [bs[0], bs[1], bs[2], b34, bs[5], bs[6], bs[7]]

    packed = []
    for w, b in zip(fused_ws, fused_bs):
        packed += [w.astype(jnp.bfloat16), b.astype(jnp.float32)]
    return packed


# --------------------------------------------------------------------------------------
# Wrapper: batch-tiled pallas_call. Weights/biases use a constant index_map so they are
# DMA'd once and stay VMEM-resident while bf16 x/out tiles are double-buffered.
# --------------------------------------------------------------------------------------
@functools.partial(jax.jit, static_argnames=("tile_b",))
def ae_forward(x, packed_params, *, tile_b=512):
    """x: (B, INPUT_SIZE) float; packed_params: flat [w1,b1,...,w7,b7] from pack_params().

    Returns (B, INPUT_SIZE) bf16 (sigmoid outputs in [0, 1])."""
    B = x.shape[0]

    # Tile choice: multiple of 128 when B >= 128 (full MXU passes, unmasked stores);
    # clamp so the grid has >= 2 steps whenever the batch allows (keeps both v7x TCs busy
    # and the x/out DMA double-buffered).
    align = 128 if B >= 128 else 16
    if B >= 2 * align:
        cap = _round_up(B // 2, align)
    else:
        cap = _round_up(B, align)
    tb = min(_round_up(max(1, min(tile_b, cap)), align), cap)

    Bp = _round_up(B, tb)
    x = x.astype(jnp.bfloat16)
    if Bp != B:
        x = jnp.pad(x, ((0, Bp - B), (0, 0)))

    grid = (Bp // tb,)

    def resident_spec(p):                      # full array, same block every grid step
        return pl.BlockSpec(p.shape, lambda i: (0, 0))

    in_specs = [pl.BlockSpec((tb, INPUT_SIZE), lambda i: (i, 0))]
    in_specs += [resident_spec(p) for p in packed_params]
    out_spec = pl.BlockSpec((tb, INPUT_SIZE), lambda i: (i, 0))

    out = pl.pallas_call(
        _ae_kernel,
        out_shape=jax.ShapeDtypeStruct((Bp, INPUT_SIZE), jnp.bfloat16),
        grid=grid,
        in_specs=in_specs,
        out_specs=out_spec,
        compiler_params=pltpu.CompilerParams(
            dimension_semantics=("parallel",),     # shard batch tiles across TCs (v7x)
            vmem_limit_bytes=32 << 20,             # ~2.5 MB weights + tiles; room for tile_b~1024
        ),
    )(x, *packed_params)
    return out[:B]


# --------------------------------------------------------------------------------------
# Init + references
# --------------------------------------------------------------------------------------
def init_params(key):
    """Deterministic Kaiming-uniform-ish init matching PyTorch Linear shapes (w: (in,out))."""
    params = []
    for (fan_in, fan_out) in LAYER_DIMS:
        key, kw, kb = jax.random.split(key, 3)
        bound = 1.0 / jnp.sqrt(fan_in)
        w = jax.random.uniform(kw, (fan_in, fan_out), jnp.float32, -bound, bound)
        b = jax.random.uniform(kb, (1, fan_out), jnp.float32, -bound, bound)
        params += [w, b]
    return params


def _ae_reference_f32(x, params):
    """Full-f32, unfused 8-layer reference (matches the PyTorch module's math)."""
    h = x
    for li in range(N_LAYERS):
        w, b = params[2 * li], params[2 * li + 1]
        z = jnp.dot(h, w, preferred_element_type=jnp.float32) + b
        if li == N_LAYERS - 1:
            h = jax.nn.sigmoid(z)
        elif li == 3:
            h = z
        else:
            h = jnp.maximum(z, 0.0)
    return h


def _ae_reference_packed(x, packed):
    """Precision-matched reference: bf16 weights/activations, f32 accumulate, fused latent pair."""
    h = x.astype(jnp.bfloat16)
    for li in range(N_FUSED):
        w, b = packed[2 * li], packed[2 * li + 1]
        z = jnp.dot(h, w, preferred_element_type=jnp.float32) + b
        a = 1.0 / (1.0 + jnp.exp(-z)) if li == N_FUSED - 1 else jnp.maximum(z, 0.0)
        h = a.astype(jnp.bfloat16)
    return h.astype(jnp.float32)


if __name__ == "__main__":
    key = jax.random.PRNGKey(0)
    key, kx = jax.random.split(key)

    B = 512                                                     # -> tb=256, grid=(2,)
    x = jax.random.uniform(kx, (B, INPUT_SIZE), jnp.float32)    # AE inputs are [0,1] voxels
    params = init_params(key)
    packed = pack_params(params)

    out = ae_forward(x, packed)                                 # default tile_b=512, clamped
    out = jax.block_until_ready(out)
    assert out.shape == (B, INPUT_SIZE)
    out_f32 = out.astype(jnp.float32)

    # Precision-matched (bf16 matmul/activations, fused latent) reference: should agree tightly.
    ref_packed = _ae_reference_packed(x, packed)
    assert jnp.allclose(out_f32, ref_packed, atol=1e-2, rtol=1e-2), (
        "Pallas output mismatch vs precision-matched JAX reference")

    # Full-f32 reference: semantics sanity check (sigmoid output in [0,1]).
    ref_f32 = _ae_reference_f32(x, params)
    assert jnp.allclose(out_f32, ref_f32, atol=5e-2, rtol=0.0), (
        "Pallas output drifted from f32 JAX reference beyond bf16 tolerance")

    print("KERNEL_OK")
</pallas_src>

<mosaic_0001>
module attributes {stable_mosaic.version = 11 : i64} {
  func.func @_ae_kernel(%arg0: i32, %arg1: memref<256x256xbf16, #tpu.memory_space<vmem>>, %arg2: memref<256x512xbf16, #tpu.memory_space<vmem>>, %arg3: memref<1x512xf32, #tpu.memory_space<vmem>>, %arg4: memref<512x256xbf16, #tpu.memory_space<vmem>>, %arg5: memref<1x256xf32, #tpu.memory_space<vmem>>, %arg6: memref<256x128xbf16, #tpu.memory_space<vmem>>, %arg7: memref<1x128xf32, #tpu.memory_space<vmem>>, %arg8: memref<128x128xbf16, #tpu.memory_space<vmem>>, %arg9: memref<1x128xf32, #tpu.memory_space<vmem>>, %arg10: memref<128x256xbf16, #tpu.memory_space<vmem>>, %arg11: memref<1x256xf32, #tpu.memory_space<vmem>>, %arg12: memref<256x512xbf16, #tpu.memory_space<vmem>>, %arg13: memref<1x512xf32, #tpu.memory_space<vmem>>, %arg14: memref<512x256xbf16, #tpu.memory_space<vmem>>, %arg15: memref<1x256xf32, #tpu.memory_space<vmem>>, %arg16: memref<256x256xbf16, #tpu.memory_space<vmem>>) attributes {dimension_semantics = [#tpu.dimension_semantics<parallel>], iteration_bounds = array<i64: 2>, scalar_prefetch = 0 : i64, scratch_operands = 0 : i64, tpu.core_type = #tpu.core_type<tc>, window_params = [{transform_indices = @transform_0, window_bounds = array<i64: 256, 256>}, {pipeline_mode = #tpu.pipeline_mode<synchronous>, transform_indices = @transform_1, window_bounds = array<i64: 256, 512>}, {pipeline_mode = #tpu.pipeline_mode<synchronous>, transform_indices = @transform_2, window_bounds = array<i64: 1, 512>}, {pipeline_mode = #tpu.pipeline_mode<synchronous>, transform_indices = @transform_3, window_bounds = array<i64: 512, 256>}, {pipeline_mode = #tpu.pipeline_mode<synchronous>, transform_indices = @transform_4, window_bounds = array<i64: 1, 256>}, {pipeline_mode = #tpu.pipeline_mode<synchronous>, transform_indices = @transform_5, window_bounds = array<i64: 256, 128>}, {pipeline_mode = #tpu.pipeline_mode<synchronous>, transform_indices = @transform_6, window_bounds = array<i64: 1, 128>}, {pipeline_mode = #tpu.pipeline_mode<synchronous>, transform_indices = @transform_7, window_bounds = array<i64: 128, 128>}, {pipeline_mode = #tpu.pipeline_mode<synchronous>, transform_indices = @transform_8, window_bounds = array<i64: 1, 128>}, {pipeline_mode = #tpu.pipeline_mode<synchronous>, transform_indices = @transform_9, window_bounds = array<i64: 128, 256>}, {pipeline_mode = #tpu.pipeline_mode<synchronous>, transform_indices = @transform_10, window_bounds = array<i64: 1, 256>}, {pipeline_mode = #tpu.pipeline_mode<synchronous>, transform_indices = @transform_11, window_bounds = array<i64: 256, 512>}, {pipeline_mode = #tpu.pipeline_mode<synchronous>, transform_indices = @transform_12, window_bounds = array<i64: 1, 512>}, {pipeline_mode = #tpu.pipeline_mode<synchronous>, transform_indices = @transform_13, window_bounds = array<i64: 512, 256>}, {pipeline_mode = #tpu.pipeline_mode<synchronous>, transform_indices = @transform_14, window_bounds = array<i64: 1, 256>}, {transform_indices = @transform_15, window_bounds = array<i64: 256, 256>}]} {
    %c0 = arith.constant 0 : index
    %c0_0 = arith.constant 0 : index
    %0 = vector.load %arg1[%c0, %c0_0] : memref<256x256xbf16, #tpu.memory_space<vmem>>, vector<256x256xbf16>
    %c0_1 = arith.constant 0 : index
    %c0_2 = arith.constant 0 : index
    %1 = vector.load %arg2[%c0_1, %c0_2] : memref<256x512xbf16, #tpu.memory_space<vmem>>, vector<256x512xbf16>
    %c0_3 = arith.constant 0 : index
    %c0_4 = arith.constant 0 : index
    %2 = vector.load %arg3[%c0_3, %c0_4] : memref<1x512xf32, #tpu.memory_space<vmem>>, vector<1x512xf32>
    %cst = arith.constant dense<0.000000e+00> : vector<256x512xf32>
    %3 = tpu.matmul %0, %1, %cst {dimension_numbers = #tpu.dot_dimension_numbers<[1], [0], [0], [1], [0, 0, 1, 1], [], []>} : vector<256x256xbf16>, vector<256x512xbf16>, vector<256x512xf32> -> vector<256x512xf32>
    %4 = vector.broadcast %2 : vector<1x512xf32> to vector<256x512xf32>
    %5 = arith.addf %3, %4 : vector<256x512xf32>
    %cst_5 = arith.constant 0.000000e+00 : f32
    %6 = vector.broadcast %cst_5 : f32 to vector<256x512xf32>
    %7 = arith.maximumf %5, %6 : vector<256x512xf32>
    %8 = arith.truncf %7 : vector<256x512xf32> to vector<256x512xbf16>
    %c0_6 = arith.constant 0 : index
    %c0_7 = arith.constant 0 : index
    %9 = vector.load %arg4[%c0_6, %c0_7] : memref<512x256xbf16, #tpu.memory_space<vmem>>, vector<512x256xbf16>
    %c0_8 = arith.constant 0 : index
    %c0_9 = arith.constant 0 : index
    %10 = vector.load %arg5[%c0_8, %c0_9] : memref<1x256xf32, #tpu.memory_space<vmem>>, vector<1x256xf32>
    %cst_10 = arith.constant dense<0.000000e+00> : vector<256x256xf32>
    %11 = tpu.matmul %8, %9, %cst_10 {dimension_numbers = #tpu.dot_dimension_numbers<[1], [0], [0], [1], [0, 0, 1, 1], [], []>} : vector<256x512xbf16>, vector<512x256xbf16>, vector<256x256xf32> -> vector<256x256xf32>
    %12 = vector.broadcast %10 : vector<1x256xf32> to vector<256x256xf32>
    %13 = arith.addf %11, %12 : vector<256x256xf32>
    %cst_11 = arith.constant 0.000000e+00 : f32
    %14 = vector.broadcast %cst_11 : f32 to vector<256x256xf32>
    %15 = arith.maximumf %13, %14 : vector<256x256xf32>
    %16 = arith.truncf %15 : vector<256x256xf32> to vector<256x256xbf16>
    %c0_12 = arith.constant 0 : index
    %c0_13 = arith.constant 0 : index
    %17 = vector.load %arg6[%c0_12, %c0_13] : memref<256x128xbf16, #tpu.memory_space<vmem>>, vector<256x128xbf16>
    %c0_14 = arith.constant 0 : index
    %c0_15 = arith.constant 0 : index
    %18 = vector.load %arg7[%c0_14, %c0_15] : memref<1x128xf32, #tpu.memory_space<vmem>>, vector<1x128xf32>
    %cst_16 = arith.constant dense<0.000000e+00> : vector<256x128xf32>
    %19 = tpu.matmul %16, %17, %cst_16 {dimension_numbers = #tpu.dot_dimension_numbers<[1], [0], [0], [1], [0, 0, 1, 1], [], []>} : vector<256x256xbf16>, vector<256x128xbf16>, vector<256x128xf32> -> vector<256x128xf32>
    %20 = vector.broadcast %18 : vector<1x128xf32> to vector<256x128xf32>
    %21 = arith.addf %19, %20 : vector<256x128xf32>
    %cst_17 = arith.constant 0.000000e+00 : f32
    %22 = vector.broadcast %cst_17 : f32 to vector<256x128xf32>
    %23 = arith.maximumf %21, %22 : vector<256x128xf32>
    %24 = arith.truncf %23 : vector<256x128xf32> to vector<256x128xbf16>
    %c0_18 = arith.constant 0 : index
    %c0_19 = arith.constant 0 : index
    %25 = vector.load %arg8[%c0_18, %c0_19] : memref<128x128xbf16, #tpu.memory_space<vmem>>, vector<128x128xbf16>
    %c0_20 = arith.constant 0 : index
    %c0_21 = arith.constant 0 : index
    %26 = vector.load %arg9[%c0_20, %c0_21] : memref<1x128xf32, #tpu.memory_space<vmem>>, vector<1x128xf32>
    %cst_22 = arith.constant dense<0.000000e+00> : vector<256x128xf32>
    %27 = tpu.matmul %24, %25, %cst_22 {dimension_numbers = #tpu.dot_dimension_numbers<[1], [0], [0], [1], [0, 0, 1, 1], [], []>} : vector<256x128xbf16>, vector<128x128xbf16>, vector<256x128xf32> -> vector<256x128xf32>
    %28 = vector.broadcast %26 : vector<1x128xf32> to vector<256x128xf32>
    %29 = arith.addf %27, %28 : vector<256x128xf32>
    %cst_23 = arith.constant 0.000000e+00 : f32
    %30 = vector.broadcast %cst_23 : f32 to vector<256x128xf32>
    %31 = arith.maximumf %29, %30 : vector<256x128xf32>
    %32 = arith.truncf %31 : vector<256x128xf32> to vector<256x128xbf16>
    %c0_24 = arith.constant 0 : index
    %c0_25 = arith.constant 0 : index
    %33 = vector.load %arg10[%c0_24, %c0_25] : memref<128x256xbf16, #tpu.memory_space<vmem>>, vector<128x256xbf16>
    %c0_26 = arith.constant 0 : index
    %c0_27 = arith.constant 0 : index
    %34 = vector.load %arg11[%c0_26, %c0_27] : memref<1x256xf32, #tpu.memory_space<vmem>>, vector<1x256xf32>
    %cst_28 = arith.constant dense<0.000000e+00> : vector<256x256xf32>
    %35 = tpu.matmul %32, %33, %cst_28 {dimension_numbers = #tpu.dot_dimension_numbers<[1], [0], [0], [1], [0, 0, 1, 1], [], []>} : vector<256x128xbf16>, vector<128x256xbf16>, vector<256x256xf32> -> vector<256x256xf32>
    %36 = vector.broadcast %34 : vector<1x256xf32> to vector<256x256xf32>
    %37 = arith.addf %35, %36 : vector<256x256xf32>
    %cst_29 = arith.constant 0.000000e+00 : f32
    %38 = vector.broadcast %cst_29 : f32 to vector<256x256xf32>
    %39 = arith.maximumf %37, %38 : vector<256x256xf32>
    %40 = arith.truncf %39 : vector<256x256xf32> to vector<256x256xbf16>
    %c0_30 = arith.constant 0 : index
    %c0_31 = arith.constant 0 : index
    %41 = vector.load %arg12[%c0_30, %c0_31] : memref<256x512xbf16, #tpu.memory_space<vmem>>, vector<256x512xbf16>
    %c0_32 = arith.constant 0 : index
    %c0_33 = arith.constant 0 : index
    %42 = vector.load %arg13[%c0_32, %c0_33] : memref<1x512xf32, #tpu.memory_space<vmem>>, vector<1x512xf32>
    %cst_34 = arith.constant dense<0.000000e+00> : vector<256x512xf32>
    %43 = tpu.matmul %40, %41, %cst_34 {dimension_numbers = #tpu.dot_dimension_numbers<[1], [0], [0], [1], [0, 0, 1, 1], [], []>} : vector<256x256xbf16>, vector<256x512xbf16>, vector<256x512xf32> -> vector<256x512xf32>
    %44 = vector.broadcast %42 : vector<1x512xf32> to vector<256x512xf32>
    %45 = arith.addf %43, %44 : vector<256x512xf32>
    %cst_35 = arith.constant 0.000000e+00 : f32
    %46 = vector.broadcast %cst_35 : f32 to vector<256x512xf32>
    %47 = arith.maximumf %45, %46 : vector<256x512xf32>
    %48 = arith.truncf %47 : vector<256x512xf32> to vector<256x512xbf16>
    %c0_36 = arith.constant 0 : index
    %c0_37 = arith.constant 0 : index
    %49 = vector.load %arg14[%c0_36, %c0_37] : memref<512x256xbf16, #tpu.memory_space<vmem>>, vector<512x256xbf16>
    %c0_38 = arith.constant 0 : index
    %c0_39 = arith.constant 0 : index
    %50 = vector.load %arg15[%c0_38, %c0_39] : memref<1x256xf32, #tpu.memory_space<vmem>>, vector<1x256xf32>
    %cst_40 = arith.constant dense<0.000000e+00> : vector<256x256xf32>
    %51 = tpu.matmul %48, %49, %cst_40 {dimension_numbers = #tpu.dot_dimension_numbers<[1], [0], [0], [1], [0, 0, 1, 1], [], []>} : vector<256x512xbf16>, vector<512x256xbf16>, vector<256x256xf32> -> vector<256x256xf32>
    %52 = vector.broadcast %50 : vector<1x256xf32> to vector<256x256xf32>
    %53 = arith.addf %51, %52 : vector<256x256xf32>
    %cst_41 = arith.constant 0.000000e+00 : f32
    %54 = vector.broadcast %cst_41 : f32 to vector<256x256xf32>
    %55 = arith.subf %54, %53 : vector<256x256xf32>
    %56 = math.exp %55 : vector<256x256xf32>
    %cst_42 = arith.constant 1.000000e+00 : f32
    %57 = vector.broadcast %cst_42 : f32 to vector<256x256xf32>
    %58 = arith.addf %57, %56 : vector<256x256xf32>
    %cst_43 = arith.constant 1.000000e+00 : f32
    %59 = vector.broadcast %cst_43 : f32 to vector<256x256xf32>
    %60 = arith.divf %59, %58 : vector<256x256xf32>
    %61 = arith.truncf %60 : vector<256x256xf32> to vector<256x256xbf16>
    %c0_44 = arith.constant 0 : index
    %c0_45 = arith.constant 0 : index
    %62 = vector.load %arg16[%c0_44, %c0_45] : memref<256x256xbf16, #tpu.memory_space<vmem>>, vector<256x256xbf16>
    tpu.vector_store %arg16[%c0_44, %c0_45], %61 {strides = array<i32>} : memref<256x256xbf16, #tpu.memory_space<vmem>>, vector<256x256xbf16>,
    return
  }
  func.func @transform_0(%arg0: i32) -> (i32, i32) {
    %c0_i32 = arith.constant 0 : i32
    %c0_i32_0 = arith.constant 0 : i32
    return %arg0, %c0_i32 : i32, i32
  }
  func.func @transform_1(%arg0: i32) -> (i32, i32) {
    %c0_i32 = arith.constant 0 : i32
    %c0_i32_0 = arith.constant 0 : i32
    %c0_i32_1 = arith.constant 0 : i32
    return %c0_i32, %c0_i32_0 : i32, i32
  }
  func.func @transform_2(%arg0: i32) -> (i32, i32) {
    %c0_i32 = arith.constant 0 : i32
    %c0_i32_0 = arith.constant 0 : i32
    %c0_i32_1 = arith.constant 0 : i32
    return %c0_i32, %c0_i32_0 : i32, i32
  }
  func.func @transform_3(%arg0: i32) -> (i32, i32) {
    %c0_i32 = arith.constant 0 : i32
    %c0_i32_0 = arith.constant 0 : i32
    %c0_i32_1 = arith.constant 0 : i32
    return %c0_i32, %c0_i32_0 : i32, i32
  }
  func.func @transform_4(%arg0: i32) -> (i32, i32) {
    %c0_i32 = arith.constant 0 : i32
    %c0_i32_0 = arith.constant 0 : i32
    %c0_i32_1 = arith.constant 0 : i32
    return %c0_i32, %c0_i32_0 : i32, i32
  }
  func.func @transform_5(%arg0: i32) -> (i32, i32) {
    %c0_i32 = arith.constant 0 : i32
    %c0_i32_0 = arith.constant 0 : i32
    %c0_i32_1 = arith.constant 0 : i32
    return %c0_i32, %c0_i32_0 : i32, i32
  }
  func.func @transform_6(%arg0: i32) -> (i32, i32) {
    %c0_i32 = arith.constant 0 : i32
    %c0_i32_0 = arith.constant 0 : i32
    %c0_i32_1 = arith.constant 0 : i32
    return %c0_i32, %c0_i32_0 : i32, i32
  }
  func.func @transform_7(%arg0: i32) -> (i32, i32) {
    %c0_i32 = arith.constant 0 : i32
    %c0_i32_0 = arith.constant 0 : i32
    %c0_i32_1 = arith.constant 0 : i32
    return %c0_i32, %c0_i32_0 : i32, i32
  }
  func.func @transform_8(%arg0: i32) -> (i32, i32) {
    %c0_i32 = arith.constant 0 : i32
    %c0_i32_0 = arith.constant 0 : i32
    %c0_i32_1 = arith.constant 0 : i32
    return %c0_i32, %c0_i32_0 : i32, i32
  }
  func.func @transform_9(%arg0: i32) -> (i32, i32) {
    %c0_i32 = arith.constant 0 : i32
    %c0_i32_0 = arith.constant 0 : i32
    %c0_i32_1 = arith.constant 0 : i32
    return %c0_i32, %c0_i32_0 : i32, i32
  }
  func.func @transform_10(%arg0: i32) -> (i32, i32) {
    %c0_i32 = arith.constant 0 : i32
    %c0_i32_0 = arith.constant 0 : i32
    %c0_i32_1 = arith.constant 0 : i32
    return %c0_i32, %c0_i32_0 : i32, i32
  }
  func.func @transform_11(%arg0: i32) -> (i32, i32) {
    %c0_i32 = arith.constant 0 : i32
    %c0_i32_0 = arith.constant 0 : i32
    %c0_i32_1 = arith.constant 0 : i32
    return %c0_i32, %c0_i32_0 : i32, i32
  }
  func.func @transform_12(%arg0: i32) -> (i32, i32) {
    %c0_i32 = arith.constant 0 : i32
    %c0_i32_0 = arith.constant 0 : i32
    %c0_i32_1 = arith.constant 0 : i32
    return %c0_i32, %c0_i32_0 : i32, i32
  }
  func.func @transform_13(%arg0: i32) -> (i32, i32) {
    %c0_i32 = arith.constant 0 : i32
    %c0_i32_0 = arith.constant 0 : i32
    %c0_i32_1 = arith.constant 0 : i32
    return %c0_i32, %c0_i32_0 : i32, i32
  }
  func.func @transform_14(%arg0: i32) -> (i32, i32) {
    %c0_i32 = arith.constant 0 : i32
    %c0_i32_0 = arith.constant 0 : i32
    %c0_i32_1 = arith.constant 0 : i32
    return %c0_i32, %c0_i32_0 : i32, i32
  }
  func.func @transform_15(%arg0: i32) -> (i32, i32) {
    %c0_i32 = arith.constant 0 : i32
    %c0_i32_0 = arith.constant 0 : i32
    return %arg0, %c0_i32 : i32, i32
  }
}

</mosaic_0001>

<bundles_post_ra>
// kernel: ae_forward.1
= control target key start
LH: loop header
LB: loop body
LE: loop exit
PB: predicated region body
PF: predicated region fallthrough
CT: control target
= control target key end

     0   :  { %s10039_s0 = inlined_call_operand.vmem [shape: bf16[512,256], index: 0, kind: input, shape index: {}]   ;;  %s10040_s1 = inlined_call_operand.vmem [shape: bf16[256,512], index: 1, kind: input, shape index: {}]   ;;  %s10041_s2 = inlined_call_operand.hbm [shape: f32[1,512], index: 2, kind: input, shape index: {}]   ;;  %s10042_s3 = inlined_call_operand.vmem [shape: bf16[512,256], index: 3, kind: input, shape index: {}]   ;;  %s10043_s4 = inlined_call_operand.hbm [shape: f32[1,256], index: 4, kind: input, shape index: {}]   ;;  %s10044_s5 = inlined_call_operand.hbm [shape: bf16[256,128], index: 5, kind: input, shape index: {}]   ;;  %s10045_s6 = inlined_call_operand.vmem [shape: f32[1,128], index: 6, kind: input, shape index: {}]   ;;  %s10046_s7 = inlined_call_operand.hbm [shape: bf16[128,128], index: 7, kind: input, shape index: {}]   ;;  %s10047_s8 = inlined_call_operand.vmem [shape: f32[1,128], index: 8, kind: input, shape index: {}]   ;;  %s10048_s9 = inlined_call_operand.hbm [shape: bf16[128,256], index: 9, kind: input, shape index: {}]   ;;  %s10049_s10 = inlined_call_operand.vmem [shape: f32[1,256], index: 10, kind: input, shape index: {}]   ;;  %s10050_s11 = inlined_call_operand.vmem [shape: bf16[256,512], index: 11, kind: input, shape index: {}]   ;;  %s10051_s12 = inlined_call_operand.vmem [shape: f32[1,512], index: 12, kind: input, shape index: {}]   ;;  %s10052_s13 = inlined_call_operand.hbm [shape: bf16[512,256], index: 13, kind: input, shape index: {}]   ;;  %s10053_s14 = inlined_call_operand.vmem [shape: f32[1,256], index: 14, kind: input, shape index: {}]   ;;  %s10054_s15 = inlined_call_operand.hbm [shape: bf16[512,256], index: 15, kind: output, shape index: {}]  }
   0x1   :  { %10071 = sst [smem:[#allocation27_spill]] %s10041_s2 }
   0x2   :  { %10072 = sst [smem:[#allocation28_spill]] %s10043_s4 }
   0x3   :  { %10073 = sst [smem:[#allocation29_spill]] %s10054_s15 }
   0x4   :  { %20 = vsyncpa [#allocation3], 0 }
   0x5   :  { %21 = vsyncpa [#allocation6], 0 }
   0x6   :  { %22 = vsyncpa [#allocation9], 0 }
   0x7   :  { %23 = vsyncpa [#allocation12], 0 }
   0x8   :  { %24 = vsyncpa [#allocation4], 0 }
   0x9   :  { %26 = vsyncpa [#allocation4 + $0x1], 0  ;;  %s8250_s18 = smov 0   ;;  %s8252_s19 = smov 0  }
   0xa   :  { %s8254_s20 = smov 0   ;;  %s8256_s21 = smov 0  }
   0xb LB: > { %10074 = sst [smem:[#allocation19_spill]] %s8142_s18  ;;  %s8271_s22 = sadd.s32 4294967295, %s8154_s21   ;;  %s8154_s21 = sphi %s8256_s21, %s10108_s21   ;;  %s8150_s20 = sphi %s8254_s20, %s10111_s20   ;;  %s8146_s19 = sphi %s8252_s19, %s10110_s19   ;;  %s8142_s18 = sphi %s8250_s18, %s10109_s18  }
   0xc   : > { %10075 = sst [smem:[#allocation20_spill]] %s8146_s19  ;;  %s6170_s23 = sadd.s32 4294967294, %s8154_s21  }
   0xd   : > { %10076 = sst [smem:[#allocation21_spill]] %s8150_s20  ;;  %s8275_s24 = sadd.s32 1, %s8154_s21  }
   0xe   : > { %10077 = sst [smem:[#allocation22_spill]] %s8154_s21  ;;  %s359_s25 = sadd.s32 1, %s8150_s20 }
   0xf   : > { %10078 = sst [smem:[#allocation23_spill]] %s8275_s24  ;;  %s356_s26 = ssub.s32 %s8154_s21, %s8275_s24 }
  0x10   : > { %p369_p0 = scmp.ne.s32.totalorder %s8150_s20, %s8146_s19  ;;  %p357_p1 = scmp.eq.s32.totalorder %s356_s26, 0 }
  0x11   : > { %p370_p2 = scmp.eq.s32.totalorder %s8271_s22, 1  ;;  %p375_p3 = scmp.ne.s32.totalorder %s8146_s19, %s8142_s18 }
  0x12   : > { %p376_p4 = scmp.eq.s32.totalorder %s6170_s23, 1  ;;  %p6171_p7 = scmp.ge.s32.totalorder %s8154_s21, 1 }
  0x13   : > { %s8286_s27 = scalar_select %p357_p1, %s8150_s20, %s359_s25  }
  0x14   : > { %p8288_p5 = por %p370_p2, %p369_p0  ;;  %p8292_p6 = por %p376_p4, %p375_p3 }
  0x15   : > { %10079 = sst [smem:[#allocation24_spill]] %s8286_s27  ;;  %p383_p8 = scmp.lt.s32.totalorder %s8154_s21, 3 }
  0x16   : > { %s10080_s28 = scalar_select %p8288_p5, 1, 0 }
  0x17   : > { %s10082_s29 = scalar_select %p8292_p6, 1, 0 }
  0x18   : > { %10081 = sst [smem:[#allocation25_spill]] %s10080_s28  ;;  %p10062_p9 = scmp.eq.s32.totalorder %s8271_s22, 0 }
  0x19   : > { %10083 = sst [smem:[#allocation26_spill]] %s10082_s29  ;;  %p8299_p10 = pnand %p6171_p7, %p383_p8 }
  0x1a   : > { %s8156_s16 = smov [#allocation5]   ;;  %s8157_s25 = smov [#allocation8]  }
  0x1b   : > { %s10084_s30 = scalar_select %p8299_p10, 1, 0 }
  0x1c   : > { %s413_s17 = sshll.u32 %s8156_s16, 4  ;;  %p7091_p11 = pneg %p8299_p10  ;;  %s414_s17 = int_to_ptr.vmem [resolvable:$true] %s413_s17 }
  0x1d   : > { %s439_s26 = sshll.u32 %s8157_s25, 4  ;;  %s8158_s27 = smov [#allocation2]   ;;  %s8311_s26 = int_to_ptr.vmem [resolvable:$true] %s439_s26 }
  0x1e   : > { %p8307_p12 = pnand %p10062_p9, %p7091_p11  ;;  %s8313_s20 = sshll.u32 %s8158_s27, 4  ;;  %s400_s20 = int_to_ptr.vmem [resolvable:$true] %s8313_s20 }
  0x1f   : > { %s10086_s4 = sld [smem:[#allocation28_spill]] }
  0x20   : > { %p8323_p0 = pneg %p8307_p12 }
  0x25   : > { %s7908_s16 = scalar_lea.hbm %s10086_s4, 32 }
  0x26   : > { %p7909_p13 = scmp.ne.s32.totalorder %s10086_s4, %s7908_s16  ;;  %p7915_p3 = scmp.lt.u32.totalorder %s7908_s16, %s10086_s4 }
  0x28   : > { %p7911_p1 = pnand %p8323_p0, %p7909_p13 }
  0x2a   : > { %p7912_p2 = pneg %p7911_p1 }
  0x2c   : > { %p7917_p4 = pnand %p7915_p3, %p7912_p2 }
  0x2e   : > { %7920 = shalt.err (!%p7917_p4)
}
  0x2f   : > { %s7921_s24 = scalar_lea.vmem %s414_s17, 32  ;;  %p7929_p9 = scmp.lt.s32.totalorder %s414_s17, %s414_s17 }
  0x30   : > { %p7922_p7 = scmp.ne.s32.totalorder %s414_s17, %s7921_s24  ;;  %p7930_p6 = scmp.lt.s32.totalorder %s7921_s24, %s7921_s24 }
  0x32   : > { %p7924_p8 = pnand %p7922_p7, %p8323_p0  ;;  %p7931_p5 = por %p7930_p6, %p7929_p9 }
  0x34   : > { %p7925_p11 = pneg %p7924_p8 }
  0x36   : > { %p7932_p10 = pnand %p7931_p5, %p7925_p11 }
  0x38   : > { %7935 = shalt.err (!%p7932_p10)
}
  0x39   : > { %7097 = dma.hbm_to_vmem [thread:$0]  (!%p8307_p12), %s10086_s4, 32, %s414_s17, [#allocation6]  }
  0x3a   : > { %s7936_s25 = scalar_lea.hbm %s10046_s7, 1024 }
  0x3b   : > { %p7937_p13 = scmp.ne.s32.totalorder %s10046_s7, %s7936_s25  ;;  %p7943_p5 = scmp.lt.u32.totalorder %s7936_s25, %s10046_s7 }
  0x3d   : > { %p7939_p1 = pnand %p7937_p13, %p8323_p0 }
  0x3f   : > { %p7940_p6 = pneg %p7939_p1 }
  0x41   : > { %p7945_p9 = pnand %p7943_p5, %p7940_p6 }
  0x43   : > { %7948 = shalt.err (!%p7945_p9)
}
  0x44   : > { %s7949_s17 = scalar_lea.vmem %s8311_s26, 1024  ;;  %p7957_p4 = scmp.lt.s32.totalorder %s8311_s26, %s8311_s26 }
  0x45   : > { %p7950_p10 = scmp.ne.s32.totalorder %s8311_s26, %s7949_s17  ;;  %p7958_p7 = scmp.lt.s32.totalorder %s7949_s17, %s7949_s17 }
  0x47   : > { %p7952_p2 = pnand %p7950_p10, %p8323_p0  ;;  %p7959_p8 = por %p7958_p7, %p7957_p4 }
  0x49   : > { %p7953_p3 = pneg %p7952_p2 }
  0x4b   : > { %p7960_p11 = pnand %p7959_p8, %p7953_p3 }
  0x4d   : > { %7963 = shalt.err (!%p7960_p11)
}
  0x4e   : > { %s10069_s28 = smov 64   ;;  %s10070_s19 = smov 4  }
  0x4f   : > { %7103 = dma.hbm_to_vmem [thread:$0]  (!%p8307_p12), %s10046_s7, 1024, %s8311_s26, [#allocation9], %s10069_s28, %s10069_s28, %s10070_s19  }
  0x50   : > { %s10088_s2 = sld [smem:[#allocation27_spill]] }
  0x56   : > { %s7964_s25 = scalar_lea.hbm %s10088_s2, 64 }
  0x57   : > { %p7965_p13 = scmp.ne.s32.totalorder %s10088_s2, %s7964_s25  ;;  %p7971_p5 = scmp.lt.u32.totalorder %s7964_s25, %s10088_s2 }
  0x59   : > { %p7967_p1 = pnand %p7965_p13, %p8323_p0 }
  0x5b   : > { %p7968_p6 = pneg %p7967_p1 }
  0x5d   : > { %p7973_p9 = pnand %p7971_p5, %p7968_p6 }
  0x5f   : > { %7976 = shalt.err (!%p7973_p9)
}
  0x60   : > { %s7977_s18 = scalar_lea.vmem %s400_s20, 64  ;;  %p7985_p4 = scmp.lt.s32.totalorder %s400_s20, %s400_s20 }
  0x61   : > { %p7978_p10 = scmp.ne.s32.totalorder %s400_s20, %s7977_s18  ;;  %p7986_p7 = scmp.lt.s32.totalorder %s7977_s18, %s7977_s18 }
  0x63   : > { %p7980_p2 = pnand %p7978_p10, %p8323_p0  ;;  %p7987_p8 = por %p7986_p7, %p7985_p4 }
  0x65   : > { %p7981_p3 = pneg %p7980_p2 }
  0x67   : > { %p7988_p11 = pnand %p7987_p8, %p7981_p3 }
  0x69   : > { %7991 = shalt.err (!%p7988_p11)
}
  0x6a   : > { %7094 = dma.hbm_to_vmem [thread:$0]  (!%p8307_p12), %s10088_s2, 64, %s400_s20, [#allocation3]  }
  0x6b   : > { %s8161_s4 = smov [#allocation7]   ;;  %s8162_s16 = smov [#allocation10]  }
  0x6c   : > { %s423_s29 = sshll.u32 %s8161_s4, 4  ;;  %s455_s25 = sshll.u32 %s8162_s16, 4  ;;  %s424_s29 = int_to_ptr.vmem [resolvable:$true] %s423_s29  ;;  %s456_s25 = int_to_ptr.vmem [resolvable:$true] %s455_s25 }
  0x6d   : > { %s7992_s17 = scalar_lea.hbm %s10044_s5, 2048 }
  0x6e   : > { %p7993_p13 = scmp.ne.s32.totalorder %s10044_s5, %s7992_s17  ;;  %p7999_p5 = scmp.lt.u32.totalorder %s7992_s17, %s10044_s5 }
  0x70   : > { %p7995_p1 = pnand %p7993_p13, %p8323_p0 }
  0x72   : > { %p7996_p6 = pneg %p7995_p1 }
  0x74   : > { %p8001_p9 = pnand %p7999_p5, %p7996_p6 }
  0x76   : > { %8004 = shalt.err (!%p8001_p9)
}
  0x77   : > { %s8005_s20 = scalar_lea.vmem %s424_s29, 2048  ;;  %p8013_p4 = scmp.lt.s32.totalorder %s424_s29, %s424_s29 }
  0x78   : > { %p8006_p10 = scmp.ne.s32.totalorder %s424_s29, %s8005_s20  ;;  %p8014_p7 = scmp.lt.s32.totalorder %s8005_s20, %s8005_s20 }
  0x7a   : > { %p8008_p2 = pnand %p8006_p10, %p8323_p0  ;;  %p8015_p8 = por %p8014_p7, %p8013_p4 }
  0x7c   : > { %p8009_p3 = pneg %p8008_p2 }
  0x7e   : > { %p8016_p11 = pnand %p8015_p8, %p8009_p3 }
  0x80   : > { %8019 = shalt.err (!%p8016_p11)
}
  0x81   : > { %s10089_s28 = smov 4   ;;  %s10090_s21 = smov 64  }
  0x82   : > { %7100 = dma.hbm_to_vmem [thread:$0]  (!%p8307_p12), %s10044_s5, 2048, %s424_s29, [#allocation6], %s10090_s21, %s10090_s21, %s10089_s28  }
  0x83   : > { %s8020_s24 = scalar_lea.hbm %s10048_s9, 2048 }
  0x84   : > { %p8021_p13 = scmp.ne.s32.totalorder %s10048_s9, %s8020_s24  ;;  %p8027_p5 = scmp.lt.u32.totalorder %s8020_s24, %s10048_s9 }
  0x86   : > { %p8023_p1 = pnand %p8021_p13, %p8323_p0 }
  0x88   : > { %p8024_p6 = pneg %p8023_p1 }
  0x8a   : > { %p8029_p9 = pnand %p8027_p5, %p8024_p6 }
  0x8c   : > { %8032 = shalt.err (!%p8029_p9)
}
  0x8d   : > { %s8033_s19 = scalar_lea.vmem %s456_s25, 2048  ;;  %p8041_p4 = scmp.lt.s32.totalorder %s456_s25, %s456_s25 }
  0x8e   : > { %p8034_p10 = scmp.ne.s32.totalorder %s456_s25, %s8033_s19  ;;  %p8042_p7 = scmp.lt.s32.totalorder %s8033_s19, %s8033_s19 }
  0x90   : > { %p8036_p2 = pnand %p8034_p10, %p8323_p0  ;;  %p8043_p8 = por %p8042_p7, %p8041_p4 }
  0x92   : > { %p8037_p3 = pneg %p8036_p2 }
  0x94   : > { %p8044_p11 = pnand %p8043_p8, %p8037_p3 }
  0x96   : > { %8047 = shalt.err (!%p8044_p11)
}
  0x97   : > { %s8163_s29 = smov 128   ;;  %s8164_s28 = smov 8  }
  0x98   : > { %7106 = dma.hbm_to_vmem [thread:$0]  (!%p8307_p12), %s10048_s9, 2048, %s456_s25, [#allocation9], %s8163_s29, %s8163_s29, %s8164_s28  }
  0x99   : > { %s8165_s16 = smov [#allocation11]   ;;  %s8048_s18 = scalar_lea.hbm %s10052_s13, 8192 }
  0x9a   : > { %s477_s27 = sshll.u32 %s8165_s16, 4  ;;  %p8049_p13 = scmp.ne.s32.totalorder %s10052_s13, %s8048_s18  ;;  %s478_s27 = int_to_ptr.vmem [resolvable:$true] %s477_s27 }
  0x9b   : > { %p8055_p5 = scmp.lt.u32.totalorder %s8048_s18, %s10052_s13 }
  0x9c   : > { %p8051_p1 = pnand %p8049_p13, %p8323_p0 }
  0x9e   : > { %p8052_p6 = pneg %p8051_p1 }
  0xa0   : > { %p8057_p9 = pnand %p8055_p5, %p8052_p6 }
  0xa2   : > { %8060 = shalt.err (!%p8057_p9)
}
  0xa3   : > { %s8061_s25 = scalar_lea.vmem %s478_s27, 8192  ;;  %p8069_p4 = scmp.lt.s32.totalorder %s478_s27, %s478_s27 }
  0xa4   : > { %p8062_p10 = scmp.ne.s32.totalorder %s478_s27, %s8061_s25  ;;  %p8070_p7 = scmp.lt.s32.totalorder %s8061_s25, %s8061_s25 }
  0xa6   : > { %p8064_p2 = pnand %p8062_p10, %p8323_p0  ;;  %p8071_p8 = por %p8070_p7, %p8069_p4 }
  0xa8   : > { %p8065_p3 = pneg %p8064_p2 }
  0xaa   : > { %p8072_p11 = pnand %p8071_p8, %p8065_p3 }
  0xac   : > { %8075 = shalt.err (!%p8072_p11)
}
  0xad   : > { %7109 = dma.hbm_to_vmem [thread:$0]  (!%p8307_p12), %s10052_s13, 8192, %s478_s27, [#allocation12], %s8163_s29, %s8163_s29, %s8164_s28  }
  0xae   : > { %p10091_p13 = scmp.ne.s32.totalorder %s10084_s30, 0 }
  0xaf   : > { %p10092_p1 = scmp.eq.s32.totalorder (!%p10091_p13), %s8271_s22, 0 }
  0xb0   : > { %506 = sbr.rel (%p10091_p13) target bundleno = 2152 (0x868), region = 80 }
  0xb7   : > { %8121 = dma.done.wait (%p10092_p1), [#allocation3], 64   ;;  %p10093_p0 = pmov %p10092_p1 }
  0xb9   : > { %8123 = vsyncadd (%p10093_p0), [#allocation3], 4294967232  ;;  %p10094_p6 = pmov %p10093_p0 }
  0xba   : > { %p10095_p5 = pmov %p10093_p0 }
  0xbb   : > { %8125 = dma.done.wait (%p10094_p6), [#allocation6], 2080  }
  0xbc   : > { %8127 = vsyncadd (%p10095_p5), [#allocation6], 4294965216  ;;  %p10096_p9 = pmov %p10093_p0 }
  0xbd   : > { %p10097_p12 = pmov %p10093_p0 }
  0xbe   : > { %8129 = dma.done.wait (%p10096_p9), [#allocation9], 3072  }
  0xbf   : > { %8131 = vsyncadd (%p10097_p12), [#allocation9], 4294964224  ;;  %p10098_p10 = pmov %p10093_p0 }
  0xc0   : > { %p10099_p2 = pmov %p10093_p0 }
  0xc1   : > { %8133 = dma.done.wait (%p10098_p10), [#allocation12], 8192  }
  0xc2   : > { %8135 = vsyncadd (%p10099_p2), [#allocation12], 4294959104  ;;  %v7172_v0 = vld [vmem:[%s10040_s1 + $0x4] ss:$16 sps:$4 sm:$0xff]   ;;  %v7174_v1 = vld [vmem:[%s10040_s1] ss:$16 sps:$4 sm:$0xff]  }
  0xc3   : > { %1182 = vmatprep.subr.bf16.mxu0 %v7172_v0  ;;  %v7175_v2 = vld [vmem:[%s10040_s1 + $0x24] ss:$16 sps:$4 sm:$0xff]   ;;  %v7177_v3 = vld [vmem:[%s10040_s1 + $0x20] ss:$16 sps:$4 sm:$0xff]   ;;  %s6187_s18 = sshll.u32 %s8271_s22, 5  ;;  %s10100_s15 = sld [smem:[#allocation20_spill]] }
  0xc4   : > { %1183 = vmatpush1.bf16.msra.mxu0 %v7174_v1  ;;  %v7178_v4 = vld [vmem:[%s10040_s1 + $0x44] ss:$16 sps:$4 sm:$0xff]   ;;  %v7180_v5 = vld [vmem:[%s10040_s1 + $0x40] ss:$16 sps:$4 sm:$0xff]   ;;  %p576_p3 = scmp.lt.s32.totalorder %s6187_s18, 63  ;;  %s6592_s28 = sshll.u32 %s8271_s22, 12 }
  0xc5   : > { %1184 = vmatprep.subr.bf16.mxu0 %v7175_v2  ;;  %v7181_v6 = vld [vmem:[%s10040_s1 + $0x64] ss:$16 sps:$4 sm:$0xff]   ;;  %v7183_v7 = vld [vmem:[%s10040_s1 + $0x60] ss:$16 sps:$4 sm:$0xff]   ;;  %v7244_v20 = vld [vmem:[%s10040_s1 + $0xc] ss:$16 sps:$4 sm:$0xff]  }
  0xc6   : > { %v7184_v8 = vld [vmem:[%s10040_s1 + $0x84] ss:$16 sps:$4 sm:$0xff]   ;;  %s10113_s18 = smov (!%p576_p3, %s6187_s18), 63  ;;  %v7186_v9 = vld [vmem:[%s10040_s1 + $0x80] ss:$16 sps:$4 sm:$0xff]   ;;  %1375 = vmatprep.subr.bf16.mxu1 %v7244_v20  ;;  %s10102_s17 = sld [smem:[#allocation29_spill]] }
  0xc7   : > { %v7187_v10 = vld [vmem:[%s10040_s1 + $0xa4] ss:$16 sps:$4 sm:$0xff]   ;;  %s6558_s16 = sshll.u32 %s10113_s18, 3  ;;  %v7189_v11 = vld [vmem:[%s10040_s1 + $0xa0] ss:$16 sps:$4 sm:$0xff]   ;;  %s8167_s22 = smov [#allocation13]  }
  0xc8   : > { %1185 = vmatpush1.bf16.msra.mxu0 %v7177_v3  ;;  %s8499_s20 = scalar_lea.vmem %s10039_s0, %s6558_s16  ;;  %v7190_v12 = vld [vmem:[%s10040_s1 + $0xc4] ss:$16 sps:$4 sm:$0xff]   ;;  %v7192_v14 = vld [vmem:[%s10040_s1 + $0xc0] ss:$16 sps:$4 sm:$0xff]   ;;  %v7246_v21 = vld [vmem:[%s10040_s1 + $0x8] ss:$16 sps:$4 sm:$0xff]  }
  0xc9   : > { %1186 = vmatprep.subr.bf16.mxu0 %v7178_v4  ;;  %v7222_v13 = vld [vmem:[%s8499_s20 + $0x4] ss:$8 sps:$4 sm:$0xff]   ;;  %v7195_v16 = vld [vmem:[%s10040_s1 + $0xe0] ss:$16 sps:$4 sm:$0xff]   ;;  %1376 = vmatpush1.bf16.msra.mxu1 %v7246_v21  ;;  %v7252_v25 = vld [vmem:[%s10040_s1 + $0x28] ss:$16 sps:$4 sm:$0xff]  }
  0xca   : > { %v7193_v15 = vld [vmem:[%s10040_s1 + $0xe4] ss:$16 sps:$4 sm:$0xff]   ;;  %1214 = vmatprep.mubr.bf16.mxu0 %v7222_v13  ;;  %1407 = vmatprep.mubr.bf16.mxu1 %v7222_v13  ;;  %v7198_v18 = vld [vmem:[%s10040_s1 + $0x100] ss:$16 sps:$4 sm:$0xff]   ;;  %v7250_v24 = vld [vmem:[%s10040_s1 + $0x2c] ss:$16 sps:$4 sm:$0xff]  }
  0xcb   : > { %v7196_v17 = vld [vmem:[%s10040_s1 + $0x104] ss:$16 sps:$4 sm:$0xff]   ;;  %v7201_v22 = vld [vmem:[%s10040_s1 + $0x120] ss:$16 sps:$4 sm:$0xff]   ;;  %v7253_v26 = vld [vmem:[%s10040_s1 + $0x4c] ss:$16 sps:$4 sm:$0xff]   ;;  %1377 = vmatprep.subr.bf16.mxu1 %v7250_v24 }
  0xcc   : > { %1187 = vmatpush1.bf16.msra.mxu0 %v7180_v5  ;;  %v7199_v19 = vld [vmem:[%s10040_s1 + $0x124] ss:$16 sps:$4 sm:$0xff]   ;;  %v7204_v27 = vld [vmem:[%s10040_s1 + $0x140] ss:$16 sps:$4 sm:$0xff]   ;;  %v7255_v29 = vld [vmem:[%s10040_s1 + $0x48] ss:$16 sps:$4 sm:$0xff]   ;;  %s9991_s26 = scalar_lea.hbm %s10102_s17, %s6592_s28 }
  0xcd   : > { %1188 = vmatprep.subr.bf16.mxu0 %v7181_v6  ;;  %v7202_v23 = vld [vmem:[%s10040_s1 + $0x144] ss:$16 sps:$4 sm:$0xff]   ;;  %1378 = vmatpush1.bf16.msra.mxu1 %v7252_v25  ;;  %v7259_v30 = vld [vmem:[%s10040_s1 + $0x6c] ss:$16 sps:$4 sm:$0xff]   ;;  %v7207_v31 = vld [vmem:[%s10040_s1 + $0x160] ss:$16 sps:$4 sm:$0xff]  }
  0xce   : > { %v7205_v28 = vld [vmem:[%s10040_s1 + $0x164] ss:$16 sps:$4 sm:$0xff]   ;;  %1379 = vmatprep.subr.bf16.mxu1 %v7253_v26  ;;  %v7261_v33 = vld [vmem:[%s10040_s1 + $0x68] ss:$16 sps:$4 sm:$0xff]   ;;  %v7262_v34 = vld [vmem:[%s10040_s1 + $0x8c] ss:$16 sps:$4 sm:$0xff]  }
  0xcf   : > { %v7208_v32 = vld [vmem:[%s10040_s1 + $0x184] ss:$16 sps:$4 sm:$0xff]   ;;  %v7210_v35 = vld [vmem:[%s10040_s1 + $0x180] ss:$16 sps:$4 sm:$0xff]   ;;  %v7264_v37 = vld [vmem:[%s10040_s1 + $0x88] ss:$16 sps:$4 sm:$0xff]  }
  0xd0   : > { %1189 = vmatpush1.bf16.msra.mxu0 %v7183_v7  ;;  %v7211_v36 = vld [vmem:[%s10040_s1 + $0x1a4] ss:$16 sps:$4 sm:$0xff]   ;;  %v7268_v38 = vld [vmem:[%s10040_s1 + $0xac] ss:$16 sps:$4 sm:$0xff]   ;;  %v7213_v39 = vld [vmem:[%s10040_s1 + $0x1a0] ss:$16 sps:$4 sm:$0xff]  }
  0xd1   : > { %1190 = vmatprep.subr.bf16.mxu0 %v7184_v8  ;;  %1380 = vmatpush1.bf16.msra.mxu1 %v7255_v29  ;;  %v7214_v40 = vld [vmem:[%s10040_s1 + $0x1c4] ss:$16 sps:$4 sm:$0xff]   ;;  %v7270_v41 = vld [vmem:[%s10040_s1 + $0xa8] ss:$16 sps:$4 sm:$0xff]   ;;  %v7271_v42 = vld [vmem:[%s10040_s1 + $0xcc] ss:$16 sps:$4 sm:$0xff]  }
  0xd2   : > { %1381 = vmatprep.subr.bf16.mxu1 %v7259_v30  ;;  %v7216_v43 = vld [vmem:[%s10040_s1 + $0x1c0] ss:$16 sps:$4 sm:$0xff]   ;;  %v7217_v44 = vld [vmem:[%s10040_s1 + $0x1e4] ss:$16 sps:$4 sm:$0xff]   ;;  %v7273_v45 = vld [vmem:[%s10040_s1 + $0xc8] ss:$16 sps:$4 sm:$0xff]  }
  0xd3   : > { %v7277_v46 = vld [vmem:[%s10040_s1 + $0xec] ss:$16 sps:$4 sm:$0xff]   ;;  %v7219_v47 = vld [vmem:[%s10040_s1 + $0x1e0] ss:$16 sps:$4 sm:$0xff]   ;;  %v7279_v48 = vld [vmem:[%s10040_s1 + $0xe8] ss:$16 sps:$4 sm:$0xff]  }
  0xd4   : > { %1191 = vmatpush1.bf16.msra.mxu0 %v7186_v9  ;;  %v7280_v49 = vld [vmem:[%s10040_s1 + $0x10c] ss:$16 sps:$4 sm:$0xff]   ;;  %v8617_v51 = vld [vmem:[%s8499_s20] ss:$8 sps:$4 sm:$0xff]   ;;  %v7294_v59 = vld [vmem:[%s10042_s3 + $0x10] ss:$8 sps:$4 sm:$0xff]  }
  0xd5   : > { %1192 = vmatprep.subr.bf16.mxu0 %v7187_v10  ;;  %1382 = vmatpush1.bf16.msra.mxu1 %v7261_v33  ;;  %v7284_v50 = vld [vmem:[%s10042_s3 + $0x4] ss:$8 sps:$4 sm:$0xff]   ;;  %v8620_v52 = vld [vmem:[%s8499_s20 + $0x14] ss:$8 sps:$4 sm:$0xff]   ;;  %v7282_v53 = vld [vmem:[%s10042_s3] ss:$8 sps:$4 sm:$0xff]  }
  0xd6   : > { %1383 = vmatprep.subr.bf16.mxu1 %v7262_v34  ;;  %v7285_v54 = vld [vmem:[%s10040_s1 + $0x108] ss:$16 sps:$4 sm:$0xff]   ;;  %v7289_v55 = vld [vmem:[%s10040_s1 + $0x12c] ss:$16 sps:$4 sm:$0xff]   ;;  %s572_s30 = sand.u32 1, %s10100_s15   ;;  %s8080_s21 = sshll.u32 %s8167_s22, 4  ;;  %s8081_s21 = int_to_ptr.vmem [resolvable:$false] %s8080_s21 }
  0xd7   : > { %v7296_v56 = vld [vmem:[%s10042_s3 + $0x14] ss:$8 sps:$4 sm:$0xff]   ;;  %v7291_v57 = vld [vmem:[%s10040_s1 + $0x128] ss:$16 sps:$4 sm:$0xff]   ;;  %v7308_v60 = vld [vmem:[%s10042_s3 + $0x24] ss:$8 sps:$4 sm:$0xff]  }
  0xd8   : > { %1193 = vmatpush1.bf16.msra.mxu0 %v7189_v11  ;;  %v7292_v58 = vld [vmem:[%s10040_s1 + $0x14c] ss:$16 sps:$4 sm:$0xff]   ;;  %v8649_v61 = vld [vmem:[%s8499_s20 + $0x10] ss:$8 sps:$4 sm:$0xff]   ;;  %v7306_v1 = vld [vmem:[%s10042_s3 + $0x20] ss:$8 sps:$4 sm:$0xff]  }
  0xd9   : > { %1194 = vmatprep.subr.bf16.mxu0 %v7190_v12  ;;  %1384 = vmatpush1.bf16.msra.mxu1 %v7264_v37  ;;  %v8652_v62 = vld [vmem:[%s8499_s20 + $0x24] ss:$8 sps:$4 sm:$0xff]   ;;  %v7297_v63 = vld [vmem:[%s10040_s1 + $0x148] ss:$16 sps:$4 sm:$0xff]   ;;  %v7320_v2 = vld [vmem:[%s10042_s3 + $0x34] ss:$8 sps:$4 sm:$0xff]  }
  0xda   : > { %1385 = vmatprep.subr.bf16.mxu1 %v7268_v38  ;;  %v7301_v0 = vld [vmem:[%s10040_s1 + $0x16c] ss:$16 sps:$4 sm:$0xff]   ;;  %v7303_v3 = vld [vmem:[%s10040_s1 + $0x168] ss:$16 sps:$4 sm:$0xff]   ;;  %s9902_s23 = sshll.u32 %s572_s30, 8  ;;  %s9998_s19 = scalar_lea.sflag [#allocation4], %s572_s30 }
  0xdb   : > { %v7304_v4 = vld [vmem:[%s10040_s1 + $0x18c] ss:$16 sps:$4 sm:$0xff]   ;;  %v7318_v5 = vld [vmem:[%s10042_s3 + $0x30] ss:$8 sps:$4 sm:$0xff]   ;;  %v8681_v7 = vld [vmem:[%s8499_s20 + $0x20] ss:$8 sps:$4 sm:$0xff]  }
  0xdc   : > { %1195 = vmatpush1.bf16.msra.mxu0 %v7192_v14  ;;  %v7330_v6 = vld [vmem:[%s10042_s3 + $0x44] ss:$8 sps:$4 sm:$0xff]   ;;  %v8684_v8 = vld [vmem:[%s8499_s20 + $0x34] ss:$8 sps:$4 sm:$0xff]   ;;  %v7309_v9 = vld [vmem:[%s10040_s1 + $0x188] ss:$16 sps:$4 sm:$0xff]  }
  0xdd   : > { %1196 = vmatprep.subr.bf16.mxu0 %v7193_v15  ;;  %1386 = vmatpush1.bf16.msra.mxu1 %v7270_v41  ;;  %v7313_v10 = vld [vmem:[%s10040_s1 + $0x1ac] ss:$16 sps:$4 sm:$0xff]   ;;  %v7328_v11 = vld [vmem:[%s10042_s3 + $0x40] ss:$8 sps:$4 sm:$0xff]   ;;  %v7331_v15 = vld [vmem:[%s10042_s3 + $0x50] ss:$8 sps:$4 sm:$0xff]  }
  0xde   : > { %1387 = vmatprep.subr.bf16.mxu1 %v7271_v42  ;;  %v7333_v12 = vld [vmem:[%s10042_s3 + $0x54] ss:$8 sps:$4 sm:$0xff]   ;;  %v7315_v13 = vld [vmem:[%s10040_s1 + $0x1a8] ss:$16 sps:$4 sm:$0xff]   ;;  %v7342_v25 = vld [vmem:[%s10042_s3 + $0x84] ss:$8 sps:$4 sm:$0xff]  }
  0xdf   : > { %v7316_v14 = vld [vmem:[%s10040_s1 + $0x1cc] ss:$16 sps:$4 sm:$0xff]   ;;  %v7334_v21 = vld [vmem:[%s10042_s3 + $0x60] ss:$8 sps:$4 sm:$0xff]   ;;  %v7337_v24 = vld [vmem:[%s10042_s3 + $0x70] ss:$8 sps:$4 sm:$0xff]  }
  0xe0   : > { %1197 = vmatpush1.bf16.msra.mxu0 %v7195_v16  ;;  %v8710_v16 = vld [vmem:[%s8499_s20 + $0x30] ss:$8 sps:$4 sm:$0xff]   ;;  %v7325_v20 = vld [vmem:[%s10040_s1 + $0x1ec] ss:$16 sps:$4 sm:$0xff]   ;;  %v7234_v26 = vld [vmem:[%s8499_s20 + $0x40] ss:$8 sps:$4 sm:$0xff]  }
  0xe1   : > { %1198 = vmatprep.subr.bf16.mxu0 %v7196_v17  ;;  %1388 = vmatpush1.bf16.msra.mxu1 %v7273_v45  ;;  %v7336_v17 = vld [vmem:[%s10042_s3 + $0x64] ss:$8 sps:$4 sm:$0xff]   ;;  %v7345_v29 = vld [vmem:[%s10042_s3 + $0x94] ss:$8 sps:$4 sm:$0xff]   ;;  %v7343_v30 = vld [vmem:[%s10042_s3 + $0x90] ss:$8 sps:$4 sm:$0xff]  }
  0xe2   : > { %1389 = vmatprep.subr.bf16.mxu1 %v7277_v46  ;;  %v7238_v33 = vld [vmem:[%s8499_s20 + $0x64] ss:$8 sps:$4 sm:$0xff]   ;;  %v7346_v34 = vld [vmem:[%s10042_s3 + $0xa0] ss:$8 sps:$4 sm:$0xff]   ;;  %v7357_v41 = vld [vmem:[%s10042_s3 + $0xd4] ss:$8 sps:$4 sm:$0xff]  }
  0xe3   : > { %v7354_v37 = vld [vmem:[%s10042_s3 + $0xc4] ss:$8 sps:$4 sm:$0xff]   ;;  %v7240_v38 = vld [vmem:[%s8499_s20 + $0x60] ss:$8 sps:$4 sm:$0xff]   ;;  %v7355_v42 = vld [vmem:[%s10042_s3 + $0xd0] ss:$8 sps:$4 sm:$0xff]  }
  0xe4   : > { %1199 = vmatpush1.bf16.msra.mxu0 %v7198_v18  ;;  %v8716_v18 = vld [vmem:[%s8499_s20 + $0x44] ss:$8 sps:$4 sm:$0xff]   ;;  %v7358_v46 = vld [vmem:[%s10042_s3 + $0xe0] ss:$8 sps:$4 sm:$0xff]   ;;  %s9908_s29 = scalar_lea.vmem [#allocation13], %s9902_s23  ;;  %s8082_s18 = scalar_lea.vmem %s8081_s21, 8192 }
  0xe5   : > { %1200 = vmatprep.subr.bf16.mxu0 %v7199_v19  ;;  %1390 = vmatpush1.bf16.msra.mxu1 %v7279_v48  ;;  %v7321_v19 = vld [vmem:[%s10040_s1 + $0x1c8] ss:$16 sps:$4 sm:$0xff]   ;;  %v7247_v45 = vld [vmem:[%s8499_s20 + $0x84] ss:$8 sps:$4 sm:$0xff]   ;;  %v7256_v48 = vld [vmem:[%s8499_s20 + $0x94] ss:$8 sps:$4 sm:$0xff]  }
  0xe6   : > { %1391 = vmatprep.subr.bf16.mxu1 %v7280_v49  ;;  %v7258_v49 = vld [vmem:[%s8499_s20 + $0x90] ss:$8 sps:$4 sm:$0xff]   ;;  %s6048_s16 = sshll.u32 %s9908_s29, 4  ;;  %s9993_s16 = int_to_ptr.vmem [resolvable:$true] %s6048_s16 }
  0xe7   : > { %s8076_s25 = scalar_lea.vmem %s9993_s16, 4096  ;;  %p8083_p13 = scmp.lt.s32.totalorder %s9993_s16, %s8081_s21 }
  0xe8   : > { %1201 = vmatpush1.bf16.msra.mxu0 %v7201_v22  ;;  %v7339_v22 = vld [vmem:[%s10042_s3 + $0x74] ss:$8 sps:$4 sm:$0xff]   ;;  %p8077_p4 = scmp.ne.s32.totalorder %s9993_s16, %s8076_s25  ;;  %p8084_p1 = scmp.lt.s32.totalorder %s8082_s18, %s8076_s25 }
  0xe9   : > { %1202 = vmatprep.subr.bf16.mxu0 %v7202_v23  ;;  %1392 = vmatpush1.bf16.msra.mxu1 %v7285_v54  ;;  %v7327_v23 = vld [vmem:[%s10040_s1 + $0x1e8] ss:$16 sps:$4 sm:$0xff]   ;;  %v7286_v54 = vld [vmem:[%s8499_s20 + $0xc4] ss:$8 sps:$4 sm:$0xff]  }
  0xea   : > { %1393 = vmatprep.subr.bf16.mxu1 %v7289_v55  ;;  %v7363_v55 = vld [vmem:[%s10042_s3 + $0xf4] ss:$8 sps:$4 sm:$0xff]   ;;  %p8085_p0 = por %p8084_p1, %p8083_p13 }
  0xec   : > { %1203 = vmatpush1.bf16.msra.mxu0 %v7204_v27  ;;  %v7235_v27 = vld [vmem:[%s8499_s20 + $0x54] ss:$8 sps:$4 sm:$0xff]  }
  0xed   : > { %1204 = vmatprep.subr.bf16.mxu0 %v7205_v28  ;;  %1394 = vmatpush1.bf16.msra.mxu1 %v7291_v57  ;;  %v7340_v28 = vld [vmem:[%s10042_s3 + $0x80] ss:$8 sps:$4 sm:$0xff]  }
  0xee   : > { %1395 = vmatprep.subr.bf16.mxu1 %v7292_v58  ;;  %v7288_v57 = vld [vmem:[%s8499_s20 + $0xc0] ss:$8 sps:$4 sm:$0xff]   ;;  %v7298_v58 = vld [vmem:[%s8499_s20 + $0xd4] ss:$8 sps:$4 sm:$0xff]  }
  0xf0   : > { %1205 = vmatpush1.bf16.msra.mxu0 %v7207_v31  ;;  %v7348_v31 = vld [vmem:[%s10042_s3 + $0xa4] ss:$8 sps:$4 sm:$0xff]  }
  0xf1   : > { %1206 = vmatprep.subr.bf16.mxu0 %v7208_v32  ;;  %1396 = vmatpush1.bf16.msra.mxu1 %v7297_v63  ;;  %v7237_v32 = vld [vmem:[%s8499_s20 + $0x50] ss:$8 sps:$4 sm:$0xff]   ;;  %v7322_v63 = vld [vmem:[%s8499_s20 + $0xf4] ss:$8 sps:$4 sm:$0xff]  }
  0xf2   : > { %1397 = vmatprep.subr.bf16.mxu1 %v7301_v0  ;;  %v7324_v0 = vld [vmem:[%s8499_s20 + $0xf0] ss:$8 sps:$4 sm:$0xff]  }
  0xf4   : > { %1207 = vmatpush1.bf16.msra.mxu0 %v7210_v35  ;;  %v7351_v35 = vld [vmem:[%s10042_s3 + $0xb4] ss:$8 sps:$4 sm:$0xff]  }
  0xf5   : > { %1208 = vmatprep.subr.bf16.mxu0 %v7211_v36  ;;  %1398 = vmatpush1.bf16.msra.mxu1 %v7303_v3  ;;  %v7349_v36 = vld [vmem:[%s10042_s3 + $0xb0] ss:$8 sps:$4 sm:$0xff]  }
  0xf6   : > { %1399 = vmatprep.subr.bf16.mxu1 %v7304_v4  ;;  %v8825_v4 = vld [vmem:[#allocation2] sm:$0xf] }
  0xf8   : > { %1209 = vmatpush1.bf16.msra.mxu0 %v7213_v39  ;;  %v7241_v39 = vld [vmem:[%s8499_s20 + $0x74] ss:$8 sps:$4 sm:$0xff]  }
  0xf9   : > { %1210 = vmatprep.subr.bf16.mxu0 %v7214_v40  ;;  %1400 = vmatpush1.bf16.msra.mxu1 %v7309_v9  ;;  %v7352_v40 = vld [vmem:[%s10042_s3 + $0xc0] ss:$8 sps:$4 sm:$0xff]  }
  0xfa   : > { %1401 = vmatprep.subr.bf16.mxu1 %v7313_v10 }
  0xfc   : > { %1211 = vmatpush1.bf16.msra.mxu0 %v7216_v43  ;;  %v7360_v43 = vld [vmem:[%s10042_s3 + $0xe4] ss:$8 sps:$4 sm:$0xff]  }
  0xfd   : > { %1212 = vmatprep.subr.bf16.mxu0 %v7217_v44  ;;  %1402 = vmatpush1.bf16.msra.mxu1 %v7315_v13  ;;  %v7243_v44 = vld [vmem:[%s8499_s20 + $0x70] ss:$8 sps:$4 sm:$0xff]  }
  0xfe   : > { %1403 = vmatprep.subr.bf16.mxu1 %v7316_v14 }
 0x100   : > { %1213 = vmatpush1.bf16.msra.mxu0 %v7219_v47  ;;  %v7249_v47 = vld [vmem:[%s8499_s20 + $0x80] ss:$8 sps:$4 sm:$0xff]  }
 0x101   : > { %2156 = vmatprep.subr.bf16.mxu0 %v7284_v50  ;;  %1404 = vmatpush1.bf16.msra.mxu1 %v7321_v19  ;;  %v7265_v50 = vld [vmem:[%s8499_s20 + $0xa4] ss:$8 sps:$4 sm:$0xff]  }
 0x102   : > { %1405 = vmatprep.subr.bf16.mxu1 %v7325_v20 }
 0x103   : > { %1215 = vmatmul.mubr.bf16.vlgmr.msra.gmra.mrb[0].mxu0 %v8617_v51 }
 0x104   : > { %1224 = vmatprep.mubr.bf16.mxu0 %v8620_v52  ;;  %2157 = vmatpush1.bf16.msra.mxu0 %v7282_v53  ;;  %v7276_v53 = vld [vmem:[%s8499_s20 + $0xb0] ss:$8 sps:$4 sm:$0xff]  }
 0x105   : > { %2158 = vmatprep.subr.bf16.mxu0 %v7296_v56  ;;  %1406 = vmatpush1.bf16.msra.mxu1 %v7327_v23  ;;  %v7361_v56 = vld [vmem:[%s10042_s3 + $0xf0] ss:$8 sps:$4 sm:$0xff]   ;;  %v7364_v23 = vld [vmem:[%s10042_s3 + $0x100] ss:$8 sps:$4 sm:$0xff]  }
 0x108   : > { %2159 = vmatpush1.bf16.msra.mxu0 %v7294_v59  ;;  %1408 = vmatmul.mubr.bf16.vlgmr.msra.gmra.mrb[0].mxu1 %v8617_v51  ;;  %v7267_v51 = vld [vmem:[%s8499_s20 + $0xa0] ss:$8 sps:$4 sm:$0xff]   ;;  %v7366_v59 = vld [vmem:[%s10042_s3 + $0x104] ss:$8 sps:$4 sm:$0xff]  }
 0x109   : > { %2160 = vmatprep.subr.bf16.mxu0 %v7308_v60  ;;  %1417 = vmatprep.mubr.bf16.mxu1 %v8620_v52  ;;  %v7274_v52 = vld [vmem:[%s8499_s20 + $0xb4] ss:$8 sps:$4 sm:$0xff]   ;;  %v7300_v60 = vld [vmem:[%s8499_s20 + $0xd0] ss:$8 sps:$4 sm:$0xff]  }
 0x10b   : > { %1225 = vmatmul.mubr.bf16.gmra.mrb[4].mxu0 %v8649_v61 }
 0x10c   : > { %1234 = vmatprep.mubr.bf16.mxu0 %v8652_v62  ;;  %2161 = vmatpush1.bf16.msra.mxu0 %v7306_v1  ;;  %v682_v1 = vlaneseq }
 0x10d   : > { %2162 = vmatprep.subr.bf16.mxu0 %v7320_v2 }
 0x10e   : > { %v8820_v2 = vshrl.u32 %v682_v1, 7 }
 0x110   : > { %2163 = vmatpush1.bf16.msra.mxu0 %v7318_v5  ;;  %1418 = vmatmul.mubr.bf16.gmra.mrb[4].mxu1 %v8649_v61  ;;  %v7310_v61 = vld [vmem:[%s8499_s20 + $0xe4] ss:$8 sps:$4 sm:$0xff]   ;;  %v8823_v3 = vsub.s32 0, %v8820_v2  ;;  %v8828_v5 = vsub.s32 1, %v8820_v2 }
 0x111   : > { %2164 = vmatprep.subr.bf16.mxu0 %v7330_v6  ;;  %1427 = vmatprep.mubr.bf16.mxu1 %v8652_v62  ;;  %v7312_v62 = vld [vmem:[%s8499_s20 + $0xe0] ss:$8 sps:$4 sm:$0xff]   ;;  %s10101_s20 = sld [smem:[#allocation25_spill]] }
 0x112   : > { %v8832_v6 = vrot.slane %v8825_v4, %v8823_v3 }
 0x113   : > { %1235 = vmatmul.mubr.bf16.gmra.mrb[8].mxu0 %v8681_v7 }
 0x114   : > { %1244 = vmatprep.mubr.bf16.mxu0 %v8684_v8  ;;  %2165 = vmatpush1.bf16.msra.mxu0 %v7328_v11 }
 0x115   : > { %2166 = vmatprep.subr.bf16.mxu0 %v7333_v12 }
 0x117   : > { %p10103_p7 = scmp.ne.s32.totalorder %s10101_s20, 0 }
 0x118   : > { %2167 = vmatpush1.bf16.msra.mxu0 %v7331_v15  ;;  %1428 = vmatmul.mubr.bf16.gmra.mrb[8].mxu1 %v8681_v7  ;;  %v8836_v7 = vrot.slane %v8825_v4, %v8828_v5 }
 0x119   : > { %2168 = vmatprep.subr.bf16.mxu0 %v7336_v17  ;;  %1437 = vmatprep.mubr.bf16.mxu1 %v8684_v8  ;;  %p8078_p8 = pnand %p8077_p4, %p10103_p7 }
 0x11b   : > { %1245 = vmatmul.mubr.bf16.gmra.mrb[12].mxu0 %v8710_v16  ;;  %p8079_p11 = pneg %p8078_p8 }
 0x11c   : > { %1254 = vmatprep.mubr.bf16.mxu0 %v8716_v18  ;;  %2169 = vmatpush1.bf16.msra.mxu0 %v7334_v21 }
 0x11d   : > { %2170 = vmatprep.subr.bf16.mxu0 %v7339_v22  ;;  %p8086_p6 = pnand %p8085_p0, %p8079_p11 }
 0x120   : > { %2171 = vmatpush1.bf16.msra.mxu0 %v7337_v24  ;;  %1438 = vmatmul.mubr.bf16.gmra.mrb[12].mxu1 %v8710_v16 }
 0x121   : > { %2172 = vmatprep.subr.bf16.mxu0 %v7342_v25  ;;  %1447 = vmatprep.mubr.bf16.mxu1 %v8716_v18 }
 0x123   : > { %1255 = vmatmul.mubr.bf16.gmra.mrb[16].mxu0 %v7234_v26 }
 0x124   : > { %1264 = vmatprep.mubr.bf16.mxu0 %v7235_v27  ;;  %2173 = vmatpush1.bf16.msra.mxu0 %v7340_v28 }
 0x125   : > { %2174 = vmatprep.subr.bf16.mxu0 %v7345_v29 }
 0x128   : > { %2175 = vmatpush1.bf16.msra.mxu0 %v7343_v30  ;;  %1448 = vmatmul.mubr.bf16.gmra.mrb[16].mxu1 %v7234_v26  ;;  %v7369_v26 = vld [vmem:[%s10042_s3 + $0x114] ss:$8 sps:$4 sm:$0xff]  }
 0x129   : > { %2176 = vmatprep.subr.bf16.mxu0 %v7348_v31  ;;  %1457 = vmatprep.mubr.bf16.mxu1 %v7235_v27 }
 0x12b   : > { %1265 = vmatmul.mubr.bf16.gmra.mrb[20].mxu0 %v7237_v32 }
 0x12c   : > { %1274 = vmatprep.mubr.bf16.mxu0 %v7238_v33  ;;  %2177 = vmatpush1.bf16.msra.mxu0 %v7346_v34 }
 0x12d   : > { %2178 = vmatprep.subr.bf16.mxu0 %v7351_v35  ;;  %v7372_v35 = vld [vmem:[%s10042_s3 + $0x124] ss:$8 sps:$4 sm:$0xff]  }
 0x130   : > { %2179 = vmatpush1.bf16.msra.mxu0 %v7349_v36  ;;  %1458 = vmatmul.mubr.bf16.gmra.mrb[20].mxu1 %v7237_v32  ;;  %v7367_v32 = vld [vmem:[%s10042_s3 + $0x110] ss:$8 sps:$4 sm:$0xff]  }
 0x131   : > { %2180 = vmatprep.subr.bf16.mxu0 %v7354_v37  ;;  %1467 = vmatprep.mubr.bf16.mxu1 %v7238_v33 }
 0x133   : > { %1275 = vmatmul.mubr.bf16.gmra.mrb[24].mxu0 %v7240_v38 }
 0x134   : > { %1284 = vmatprep.mubr.bf16.mxu0 %v7241_v39  ;;  %2181 = vmatpush1.bf16.msra.mxu0 %v7352_v40 }
 0x135   : > { %2182 = vmatprep.subr.bf16.mxu0 %v7357_v41  ;;  %v7370_v41 = vld [vmem:[%s10042_s3 + $0x120] ss:$8 sps:$4 sm:$0xff]  }
 0x138   : > { %2183 = vmatpush1.bf16.msra.mxu0 %v7355_v42  ;;  %1468 = vmatmul.mubr.bf16.gmra.mrb[24].mxu1 %v7240_v38 }
 0x139   : > { %2184 = vmatprep.subr.bf16.mxu0 %v7360_v43  ;;  %1477 = vmatprep.mubr.bf16.mxu1 %v7241_v39 }
 0x13b   : > { %1285 = vmatmul.mubr.bf16.gmra.mrb[28].mxu0 %v7243_v44 }
 0x13c   : > { %1294 = vmatprep.mubr.bf16.mxu0 %v7247_v45  ;;  %2185 = vmatpush1.bf16.msra.mxu0 %v7358_v46 }
 0x13d   : > { %2186 = vmatprep.subr.bf16.mxu0 %v7363_v55 }
 0x140   : > { %1478 = vmatmul.mubr.bf16.gmra.mrb[28].mxu1 %v7243_v44  ;;  %2187 = vmatpush1.bf16.msra.mxu0 %v7361_v56  ;;  %v7375_v44 = vld [vmem:[%s10042_s3 + $0x134] ss:$8 sps:$4 sm:$0xff]  }
 0x141   : > { %1487 = vmatprep.mubr.bf16.mxu1 %v7247_v45  ;;  %2349 = vmatprep.subr.bf16.mxu0 %v7366_v59  ;;  %v7376_v59 = vld [vmem:[%s10042_s3 + $0x140] ss:$8 sps:$4 sm:$0xff]  }
 0x143   : > { %1295 = vmatmul.mubr.bf16.gmra.mrb[32].mxu0 %v7249_v47 }
 0x144   : > { %1304 = vmatprep.mubr.bf16.mxu0 %v7256_v48 }
 0x148   : > { %1488 = vmatmul.mubr.bf16.gmra.mrb[32].mxu1 %v7249_v47 }
 0x149   : > { %1497 = vmatprep.mubr.bf16.mxu1 %v7256_v48 }
 0x14b   : > { %1305 = vmatmul.mubr.bf16.gmra.mrb[36].mxu0 %v7258_v49 }
 0x14c   : > { %1314 = vmatprep.mubr.bf16.mxu0 %v7265_v50 }
 0x150   : > { %1498 = vmatmul.mubr.bf16.gmra.mrb[36].mxu1 %v7258_v49 }
 0x151   : > { %1507 = vmatprep.mubr.bf16.mxu1 %v7265_v50  ;;  %v7373_v50 = vld [vmem:[%s10042_s3 + $0x130] ss:$8 sps:$4 sm:$0xff]  }
 0x153   : > { %1315 = vmatmul.mubr.bf16.gmra.mrb[40].mxu0 %v7267_v51 }
 0x154   : > { %1324 = vmatprep.mubr.bf16.mxu0 %v7274_v52 }
 0x158   : > { %1508 = vmatmul.mubr.bf16.gmra.mrb[40].mxu1 %v7267_v51 }
 0x159   : > { %1517 = vmatprep.mubr.bf16.mxu1 %v7274_v52 }
 0x15b   : > { %1325 = vmatmul.mubr.bf16.gmra.mrb[44].mxu0 %v7276_v53 }
 0x15c   : > { %1334 = vmatprep.mubr.bf16.mxu0 %v7286_v54 }
 0x160   : > { %1518 = vmatmul.mubr.bf16.gmra.mrb[44].mxu1 %v7276_v53  ;;  %v7378_v53 = vld [vmem:[%s10042_s3 + $0x144] ss:$8 sps:$4 sm:$0xff]  }
 0x161   : > { %1527 = vmatprep.mubr.bf16.mxu1 %v7286_v54 }
 0x163   : > { %1335 = vmatmul.mubr.bf16.gmra.mrb[48].mxu0 %v7288_v57 }
 0x164   : > { %1344 = vmatprep.mubr.bf16.mxu0 %v7298_v58 }
 0x168   : > { %1528 = vmatmul.mubr.bf16.gmra.mrb[48].mxu1 %v7288_v57 }
 0x169   : > { %1537 = vmatprep.mubr.bf16.mxu1 %v7298_v58 }
 0x16b   : > { %1345 = vmatmul.mubr.bf16.gmra.mrb[52].mxu0 %v7300_v60 }
 0x16c   : > { %1354 = vmatprep.mubr.bf16.mxu0 %v7310_v61 }
 0x170   : > { %1538 = vmatmul.mubr.bf16.gmra.mrb[52].mxu1 %v7300_v60 }
 0x171   : > { %1547 = vmatprep.mubr.bf16.mxu1 %v7310_v61 }
 0x173   : > { %1355 = vmatmul.mubr.bf16.gmra.mrb[56].mxu0 %v7312_v62 }
 0x174   : > { %1364 = vmatprep.mubr.bf16.mxu0 %v7322_v63 }
 0x178   : > { %1548 = vmatmul.mubr.bf16.gmra.mrb[56].mxu1 %v7312_v62  ;;  %v7381_v62 = vld [vmem:[%s10042_s3 + $0x154] ss:$8 sps:$4 sm:$0xff]  }
 0x179   : > { %1557 = vmatprep.mubr.bf16.mxu1 %v7322_v63  ;;  %v692_v63 = vsub.s32 2, %v8820_v2 }
 0x17b   : > { %1365 = vmatmul.mubr.bf16.gmra.mrb[60].mxu0 %v7324_v0 }
 0x180   : > { %1558 = vmatmul.mubr.bf16.gmra.mrb[60].mxu1 %v7324_v0 }
 0x1d6   : > { %v1216_v8 = vpop.f32.mrb[0].mxu0 }
 0x1d7   : > { %v1217_v9 = vadd.f32 %v1216_v8, %v8832_v6  ;;  %v1218_v10 = vpop.f32.mrb[1].mxu0  ;;  %v696_v8 = vsub.s32 3, %v8820_v2 }
 0x1d8   : > { %v1219_v11 = vadd.f32 %v1218_v10, %v8836_v7  ;;  %v1220_v12 = vpop.f32.mrb[2].mxu0 }
 0x1d9   : > { %v1221_v13 = vadd.f32 %v1220_v12, %v8832_v6  ;;  %v1222_v14 = vpop.f32.mrb[3].mxu0  ;;  %v1568_v16 = vmax.f32 %v1217_v9, 0.0  ;;  %v7379_v12 = vld [vmem:[%s10042_s3 + $0x150] ss:$8 sps:$4 sm:$0xff]  }
 0x1da   : > { %v1223_v15 = vadd.f32 %v1222_v14, %v8836_v7  ;;  %v1569_v18 = vmax.f32 %v1219_v11, 0.0 }
 0x1db   : > { %v1572_v17 = vmax.f32 %v1221_v13, 0.0 }
 0x1dc   : > { %v1573_v19 = vmax.f32 %v1223_v15, 0.0  ;;  %v7384_v15 = vld [vmem:[%s10042_s3 + $0x164] ss:$8 sps:$4 sm:$0xff]  }
 0x1dd   : > { %v1696_v20 = vpack.c.bf16 %v1572_v17, %v1568_v16  ;;  %v8895_v16 = vrot.slane %v8825_v4, %v692_v63 }
 0x1de   : > { %v1697_v21 = vpack.c.bf16 %v1573_v19, %v1569_v18  ;;  %v1226_v22 = vpop.f32.mrb[4].mxu0  ;;  %v8900_v19 = vrot.slane %v8825_v4, %v696_v8 }
 0x1df   : > { %v1227_v24 = vadd.f32 %v1226_v22, %v8832_v6  ;;  %v1228_v25 = vpop.f32.mrb[5].mxu0 }
 0x1e0   : > { %v1229_v27 = vadd.f32 %v1228_v25, %v8836_v7  ;;  %v1230_v28 = vpop.f32.mrb[6].mxu0  ;;  %2188 = vmatprep.mubr.bf16.mxu0 %v1697_v21 }
 0x1e1   : > { %v1231_v29 = vadd.f32 %v1230_v28, %v8832_v6  ;;  %v1232_v30 = vpop.f32.mrb[7].mxu0  ;;  %2189 = vmatmul.mubr.bf16.vlgmr.msra.gmra.mrb[64].mxu0 %v1696_v20  ;;  %v1576_v33 = vmax.f32 %v1227_v24, 0.0  ;;  %v1409_v24 = vpop.f32.mrb[0].mxu1 }
 0x1e2   : > { %v1233_v31 = vadd.f32 %v1232_v30, %v8836_v7  ;;  %2350 = vmatpush1.bf16.msra.mxu0 %v7364_v23  ;;  %v1577_v36 = vmax.f32 %v1229_v27, 0.0  ;;  %v7382_v23 = vld [vmem:[%s10042_s3 + $0x160] ss:$8 sps:$4 sm:$0xff]   ;;  %v7387_v27 = vld [vmem:[%s10042_s3 + $0x174] ss:$8 sps:$4 sm:$0xff]   ;;  %v1410_v4 = vadd.f32 %v1409_v24, %v8895_v16  ;;  %v1411_v28 = vpop.f32.mrb[1].mxu1 }
 0x1e3   : > { %v1580_v34 = vmax.f32 %v1231_v29, 0.0  ;;  %2351 = vmatprep.subr.bf16.mxu0 %v7369_v26 }
 0x1e4   : > { %v1581_v37 = vmax.f32 %v1233_v31, 0.0  ;;  %v1412_v31 = vadd.f32 %v1411_v28, %v8900_v19 }
 0x1e5   : > { %v1700_v38 = vpack.c.bf16 %v1580_v34, %v1576_v33 }
 0x1e6   : > { %v1701_v39 = vpack.c.bf16 %v1581_v37, %v1577_v36  ;;  %v1236_v40 = vpop.f32.mrb[8].mxu0  ;;  %2352 = vmatpush1.bf16.msra.mxu0 %v7367_v32  ;;  %v1413_v32 = vpop.f32.mrb[2].mxu1 }
 0x1e7   : > { %v1237_v42 = vadd.f32 %v1236_v40, %v8832_v6  ;;  %v1238_v43 = vpop.f32.mrb[9].mxu0  ;;  %2353 = vmatprep.subr.bf16.mxu0 %v7372_v35  ;;  %v1570_v35 = vmax.f32 %v1410_v4, 0.0  ;;  %v1414_v36 = vadd.f32 %v1413_v32, %v8895_v16  ;;  %v1415_v37 = vpop.f32.mrb[3].mxu1  ;;  %v1571_v40 = vmax.f32 %v1412_v31, 0.0 }
 0x1e8   : > { %v1239_v45 = vadd.f32 %v1238_v43, %v8836_v7  ;;  %v1240_v46 = vpop.f32.mrb[10].mxu0  ;;  %2198 = vmatprep.mubr.bf16.mxu0 %v1701_v39  ;;  %v7385_v39 = vld [vmem:[%s10042_s3 + $0x170] ss:$8 sps:$4 sm:$0xff]  }
 0x1e9   : > { %v1241_v47 = vadd.f32 %v1240_v46, %v8832_v6  ;;  %v1242_v48 = vpop.f32.mrb[11].mxu0  ;;  %2199 = vmatmul.mubr.bf16.gmra.mrb[68].mxu0 %v1700_v38  ;;  %v1584_v51 = vmax.f32 %v1237_v42, 0.0 }
 0x1ea   : > { %v1243_v49 = vadd.f32 %v1242_v48, %v8836_v7  ;;  %2354 = vmatpush1.bf16.msra.mxu0 %v7370_v41  ;;  %v1585_v54 = vmax.f32 %v1239_v45, 0.0  ;;  %v1416_v41 = vadd.f32 %v1415_v37, %v8900_v19  ;;  %v1574_v45 = vmax.f32 %v1414_v36, 0.0 }
 0x1eb   : > { %v1588_v52 = vmax.f32 %v1241_v47, 0.0  ;;  %2355 = vmatprep.subr.bf16.mxu0 %v7375_v44  ;;  %v7390_v44 = vld [vmem:[%s10042_s3 + $0x184] ss:$8 sps:$4 sm:$0xff]  }
 0x1ec   : > { %v1589_v55 = vmax.f32 %v1243_v49, 0.0  ;;  %v1575_v48 = vmax.f32 %v1416_v41, 0.0 }
 0x1ed   : > { %v1704_v56 = vpack.c.bf16 %v1588_v52, %v1584_v51 }
 0x1ee   : > { %v1705_v57 = vpack.c.bf16 %v1589_v55, %v1585_v54  ;;  %v1246_v58 = vpop.f32.mrb[12].mxu0  ;;  %2356 = vmatpush1.bf16.msra.mxu0 %v7373_v50  ;;  %v8922_v50 = vpack.c.bf16 %v1574_v45, %v1570_v35  ;;  %v1419_v54 = vpop.f32.mrb[4].mxu1  ;;  %v8927_v55 = vpack.c.bf16 %v1575_v48, %v1571_v40  ;;  %v7399_v35 = vld [vmem:[%s10042_s3 + $0x1b4] ss:$8 sps:$4 sm:$0xff]   ;;  %v7397_v48 = vld [vmem:[%s10042_s3 + $0x1b0] ss:$8 sps:$4 sm:$0xff]  }
 0x1ef   : > { %v1247_v60 = vadd.f32 %v1246_v58, %v8832_v6  ;;  %v1248_v61 = vpop.f32.mrb[13].mxu0  ;;  %2357 = vmatprep.subr.bf16.mxu0 %v7378_v53  ;;  %v7388_v53 = vld [vmem:[%s10042_s3 + $0x180] ss:$8 sps:$4 sm:$0xff]   ;;  %v7393_v58 = vld [vmem:[%s10042_s3 + $0x194] ss:$8 sps:$4 sm:$0xff]  }
 0x1f0   : > { %v1249_v0 = vadd.f32 %v1248_v61, %v8836_v7  ;;  %v1250_v1 = vpop.f32.mrb[14].mxu0  ;;  %2208 = vmatprep.mubr.bf16.mxu0 %v1705_v57 }
 0x1f1   : > { %v1251_v9 = vadd.f32 %v1250_v1, %v8832_v6  ;;  %v1252_v10 = vpop.f32.mrb[15].mxu0  ;;  %2209 = vmatmul.mubr.bf16.gmra.mrb[72].mxu0 %v1704_v56  ;;  %v1592_v13 = vmax.f32 %v1247_v60, 0.0  ;;  %v1421_v60 = vpop.f32.mrb[5].mxu1 }
 0x1f2   : > { %v1253_v11 = vadd.f32 %v1252_v10, %v8836_v7  ;;  %2358 = vmatpush1.bf16.msra.mxu0 %v7376_v59  ;;  %v1593_v17 = vmax.f32 %v1249_v0, 0.0  ;;  %v1420_v59 = vadd.f32 %v1419_v54, %v8895_v16  ;;  %v1422_v0 = vadd.f32 %v1421_v60, %v8900_v19  ;;  %v1423_v1 = vpop.f32.mrb[6].mxu1  ;;  %v7402_v54 = vld [vmem:[%s10042_s3 + $0x1c4] ss:$8 sps:$4 sm:$0xff]  }
 0x1f3   : > { %v1596_v14 = vmax.f32 %v1251_v9, 0.0  ;;  %2359 = vmatprep.subr.bf16.mxu0 %v7381_v62 }
 0x1f4   : > { %v1597_v18 = vmax.f32 %v1253_v11, 0.0  ;;  %v1578_v11 = vmax.f32 %v1420_v59, 0.0 }
 0x1f5   : > { %v1708_v20 = vpack.c.bf16 %v1596_v14, %v1592_v13  ;;  %v1425_v13 = vpop.f32.mrb[7].mxu1 }
 0x1f6   : > { %v1709_v21 = vpack.c.bf16 %v1597_v18, %v1593_v17  ;;  %v1256_v22 = vpop.f32.mrb[16].mxu0  ;;  %2360 = vmatpush1.bf16.msra.mxu0 %v7379_v12  ;;  %v1424_v12 = vadd.f32 %v1423_v1, %v8895_v16  ;;  %v1579_v17 = vmax.f32 %v1422_v0, 0.0  ;;  %v1426_v18 = vadd.f32 %v1425_v13, %v8900_v19  ;;  %v1429_v31 = vpop.f32.mrb[8].mxu1  ;;  %v7400_v1 = vld [vmem:[%s10042_s3 + $0x1c0] ss:$8 sps:$4 sm:$0xff]  }
 0x1f7   : > { %v1257_v25 = vadd.f32 %v1256_v22, %v8832_v6  ;;  %v1258_v26 = vpop.f32.mrb[17].mxu0  ;;  %2361 = vmatprep.subr.bf16.mxu0 %v7384_v15  ;;  %v7391_v15 = vld [vmem:[%s10042_s3 + $0x190] ss:$8 sps:$4 sm:$0xff]   ;;  %v7396_v22 = vld [vmem:[%s10042_s3 + $0x1a4] ss:$8 sps:$4 sm:$0xff]   ;;  %v1430_v36 = vadd.f32 %v1429_v31, %v8895_v16  ;;  %v1431_v37 = vpop.f32.mrb[9].mxu1 }
 0x1f8   : > { %v1259_v29 = vadd.f32 %v1258_v26, %v8836_v7  ;;  %v1260_v30 = vpop.f32.mrb[18].mxu0  ;;  %2218 = vmatprep.mubr.bf16.mxu0 %v1709_v21  ;;  %v1583_v26 = vmax.f32 %v1426_v18, 0.0  ;;  %v1432_v40 = vadd.f32 %v1431_v37, %v8900_v19  ;;  %v1433_v41 = vpop.f32.mrb[10].mxu1  ;;  %v7405_v13 = vld [vmem:[%s10042_s3 + $0x1d4] ss:$8 sps:$4 sm:$0xff]  }
 0x1f9   : > { %v1261_v33 = vadd.f32 %v1260_v30, %v8832_v6  ;;  %v1262_v34 = vpop.f32.mrb[19].mxu0  ;;  %2219 = vmatmul.mubr.bf16.gmra.mrb[76].mxu0 %v1708_v20  ;;  %v1600_v42 = vmax.f32 %v1257_v25, 0.0  ;;  %v7394_v30 = vld [vmem:[%s10042_s3 + $0x1a0] ss:$8 sps:$4 sm:$0xff]   ;;  %v1434_v45 = vadd.f32 %v1433_v41, %v8895_v16 }
 0x1fa   : > { %v1263_v38 = vadd.f32 %v1262_v34, %v8836_v7  ;;  %2362 = vmatpush1.bf16.msra.mxu0 %v7382_v23  ;;  %v1601_v46 = vmax.f32 %v1259_v29, 0.0  ;;  %v1582_v23 = vmax.f32 %v1424_v12, 0.0  ;;  %v8951_v32 = vpack.c.bf16 %v1583_v26, %v1579_v17 }
 0x1fb   : > { %v1604_v43 = vmax.f32 %v1261_v33, 0.0  ;;  %2363 = vmatprep.subr.bf16.mxu0 %v7387_v27 }
 0x1fc   : > { %v1605_v47 = vmax.f32 %v1263_v38, 0.0  ;;  %v8946_v4 = vpack.c.bf16 %v1582_v23, %v1578_v11 }
 0x1fd   : > { %v1712_v49 = vpack.c.bf16 %v1604_v43, %v1600_v42 }
 0x1fe   : > { %v1713_v51 = vpack.c.bf16 %v1605_v47, %v1601_v46  ;;  %v1266_v52 = vpop.f32.mrb[20].mxu0  ;;  %2364 = vmatpush1.bf16.msra.mxu0 %v7385_v39  ;;  %v1435_v46 = vpop.f32.mrb[11].mxu1 }
 0x1ff   : > { %v1267_v56 = vadd.f32 %v1266_v52, %v8832_v6  ;;  %v1268_v57 = vpop.f32.mrb[21].mxu0  ;;  %2365 = vmatprep.subr.bf16.mxu0 %v7390_v44  ;;  %v1586_v44 = vmax.f32 %v1430_v36, 0.0 }
 0x200   : > { %v1269_v61 = vadd.f32 %v1268_v57, %v8836_v7  ;;  %v1270_v62 = vpop.f32.mrb[22].mxu0  ;;  %2228 = vmatprep.mubr.bf16.mxu0 %v1713_v51  ;;  %v1436_v51 = vadd.f32 %v1435_v46, %v8900_v19 }
 0x201   : > { %v1271_v9 = vadd.f32 %v1270_v62, %v8832_v6  ;;  %v1272_v10 = vpop.f32.mrb[23].mxu0  ;;  %2229 = vmatmul.mubr.bf16.gmra.mrb[80].mxu0 %v1712_v49  ;;  %v1608_v20 = vmax.f32 %v1267_v56, 0.0  ;;  %v1587_v49 = vmax.f32 %v1432_v40, 0.0  ;;  %v1590_v56 = vmax.f32 %v1434_v45, 0.0 }
 0x202   : > { %v1273_v14 = vadd.f32 %v1272_v10, %v8836_v7  ;;  %2366 = vmatpush1.bf16.msra.mxu0 %v7388_v53  ;;  %v1609_v24 = vmax.f32 %v1269_v61, 0.0  ;;  %v1591_v59 = vmax.f32 %v1436_v51, 0.0 }
 0x203   : > { %v1612_v21 = vmax.f32 %v1271_v9, 0.0  ;;  %2367 = vmatprep.subr.bf16.mxu0 %v7393_v58  ;;  %v8970_v61 = vpack.c.bf16 %v1590_v56, %v1586_v44  ;;  %v1439_v9 = vpop.f32.mrb[12].mxu1 }
 0x204   : > { %v1613_v25 = vmax.f32 %v1273_v14, 0.0  ;;  %v8975_v10 = vpack.c.bf16 %v1591_v59, %v1587_v49  ;;  %v1440_v14 = vadd.f32 %v1439_v9, %v8895_v16 }
 0x205   : > { %v1716_v27 = vpack.c.bf16 %v1612_v21, %v1608_v20 }
 0x206   : > { %v1717_v28 = vpack.c.bf16 %v1613_v25, %v1609_v24  ;;  %v1276_v29 = vpop.f32.mrb[24].mxu0  ;;  %2368 = vmatpush1.bf16.msra.mxu0 %v7391_v15  ;;  %v1441_v15 = vpop.f32.mrb[13].mxu1  ;;  %v1594_v24 = vmax.f32 %v1440_v14, 0.0 }
 0x207   : > { %v1277_v33 = vadd.f32 %v1276_v29, %v8832_v6  ;;  %v1278_v34 = vpop.f32.mrb[25].mxu0  ;;  %2369 = vmatprep.subr.bf16.mxu0 %v7396_v22  ;;  %v1442_v20 = vadd.f32 %v1441_v15, %v8900_v19  ;;  %v1443_v21 = vpop.f32.mrb[14].mxu1 }
 0x208   : > { %v1279_v38 = vadd.f32 %v1278_v34, %v8836_v7  ;;  %v1280_v39 = vpop.f32.mrb[26].mxu0  ;;  %2238 = vmatprep.mubr.bf16.mxu0 %v1717_v28  ;;  %v1444_v25 = vadd.f32 %v1443_v21, %v8895_v16  ;;  %v1445_v26 = vpop.f32.mrb[15].mxu1  ;;  %v7403_v28 = vld [vmem:[%s10042_s3 + $0x1d0] ss:$8 sps:$4 sm:$0xff]   ;;  %v7408_v34 = vld [vmem:[%s10042_s3 + $0x1e4] ss:$8 sps:$4 sm:$0xff]  }
 0x209   : > { %v1281_v42 = vadd.f32 %v1280_v39, %v8832_v6  ;;  %v1282_v43 = vpop.f32.mrb[27].mxu0  ;;  %2239 = vmatmul.mubr.bf16.gmra.mrb[84].mxu0 %v1716_v27  ;;  %v1616_v52 = vmax.f32 %v1277_v33, 0.0  ;;  %v1595_v29 = vmax.f32 %v1442_v20, 0.0  ;;  %v1449_v44 = vpop.f32.mrb[16].mxu1 }
 0x20a   : > { %v1283_v47 = vadd.f32 %v1282_v43, %v8836_v7  ;;  %2370 = vmatpush1.bf16.msra.mxu0 %v7394_v30  ;;  %v1617_v57 = vmax.f32 %v1279_v38, 0.0  ;;  %v1446_v30 = vadd.f32 %v1445_v26, %v8900_v19  ;;  %v7406_v43 = vld [vmem:[%s10042_s3 + $0x1e0] ss:$8 sps:$4 sm:$0xff]   ;;  %v1450_v49 = vadd.f32 %v1449_v44, %v8895_v16  ;;  %v1451_v51 = vpop.f32.mrb[17].mxu1 }
 0x20b   : > { %v1620_v53 = vmax.f32 %v1281_v42, 0.0  ;;  %2371 = vmatprep.subr.bf16.mxu0 %v7399_v35  ;;  %v1598_v35 = vmax.f32 %v1444_v25, 0.0  ;;  %v1453_v56 = vpop.f32.mrb[18].mxu1 }
 0x20c   : > { %v1621_v58 = vmax.f32 %v1283_v47, 0.0  ;;  %v1599_v38 = vmax.f32 %v1446_v30, 0.0  ;;  %v1602_v59 = vmax.f32 %v1450_v49, 0.0 }
 0x20d   : > { %v1720_v60 = vpack.c.bf16 %v1620_v53, %v1616_v52  ;;  %v8994_v40 = vpack.c.bf16 %v1598_v35, %v1594_v24 }
 0x20e   : > { %v1721_v62 = vpack.c.bf16 %v1621_v58, %v1617_v57  ;;  %v1286_v0 = vpop.f32.mrb[28].mxu0  ;;  %2372 = vmatpush1.bf16.msra.mxu0 %v7397_v48  ;;  %v8999_v45 = vpack.c.bf16 %v1599_v38, %v1595_v29  ;;  %v7411_v48 = vld [vmem:[%s10042_s3 + $0x1f4] ss:$8 sps:$4 sm:$0xff]  }
 0x20f   : > { %v1287_v11 = vadd.f32 %v1286_v0, %v8832_v6  ;;  %v1288_v12 = vpop.f32.mrb[29].mxu0  ;;  %2373 = vmatprep.subr.bf16.mxu0 %v7402_v54  ;;  %v1452_v54 = vadd.f32 %v1451_v51, %v8900_v19 }
 0x210   : > { %v1289_v17 = vadd.f32 %v1288_v12, %v8836_v7  ;;  %v1290_v18 = vpop.f32.mrb[30].mxu0  ;;  %2248 = vmatprep.mubr.bf16.mxu0 %v1721_v62  ;;  %v1455_v62 = vpop.f32.mrb[19].mxu1 }
 0x211   : > { %v1291_v22 = vadd.f32 %v1290_v18, %v8832_v6  ;;  %v1292_v23 = vpop.f32.mrb[31].mxu0  ;;  %2249 = vmatmul.mubr.bf16.gmra.mrb[88].mxu0 %v1720_v60  ;;  %v1624_v31 = vmax.f32 %v1287_v11, 0.0  ;;  %v1454_v60 = vadd.f32 %v1453_v56, %v8895_v16  ;;  %v1603_v9 = vmax.f32 %v1452_v54, 0.0  ;;  %v1459_v24 = vpop.f32.mrb[20].mxu1 }
 0x212   : > { %v1293_v27 = vadd.f32 %v1292_v23, %v8836_v7  ;;  %2374 = vmatpush1.bf16.msra.mxu0 %v7400_v1  ;;  %v1625_v36 = vmax.f32 %v1289_v17, 0.0  ;;  %v7409_v1 = vld [vmem:[%s10042_s3 + $0x1f0] ss:$8 sps:$4 sm:$0xff]   ;;  %v1456_v11 = vadd.f32 %v1455_v62, %v8900_v19  ;;  %v1461_v29 = vpop.f32.mrb[21].mxu1 }
 0x213   : > { %v1628_v33 = vmax.f32 %v1291_v22, 0.0  ;;  %2375 = vmatprep.subr.bf16.mxu0 %v7405_v13  ;;  %v1606_v14 = vmax.f32 %v1454_v60, 0.0 }
 0x214   : > { %v1629_v37 = vmax.f32 %v1293_v27, 0.0  ;;  %v1607_v18 = vmax.f32 %v1456_v11, 0.0 }
 0x215   : > { %v1724_v39 = vpack.c.bf16 %v1628_v33, %v1624_v31  ;;  %v9015_v21 = vpack.c.bf16 %v1606_v14, %v1602_v59  ;;  %v1462_v33 = vadd.f32 %v1461_v29, %v8900_v19 }
 0x216   : > { %v1725_v41 = vpack.c.bf16 %v1629_v37, %v1625_v36  ;;  %v1296_v42 = vpop.f32.mrb[32].mxu0  ;;  %2376 = vmatpush1.bf16.msra.mxu0 %v7403_v28  ;;  %v9017_v25 = vpack.c.bf16 %v1607_v18, %v1603_v9  ;;  %v1460_v28 = vadd.f32 %v1459_v24, %v8895_v16 }
 0x217   : > { %v1297_v46 = vadd.f32 %v1296_v42, %v8832_v6  ;;  %v1298_v47 = vpop.f32.mrb[33].mxu0  ;;  %2377 = vmatprep.subr.bf16.mxu0 %v7408_v34  ;;  %v1463_v34 = vpop.f32.mrb[22].mxu1  ;;  %v1611_v42 = vmax.f32 %v1462_v33, 0.0 }
 0x218   : > { %v1299_v52 = vadd.f32 %v1298_v47, %v8836_v7  ;;  %v1300_v53 = vpop.f32.mrb[34].mxu0  ;;  %2258 = vmatprep.mubr.bf16.mxu0 %v1725_v41  ;;  %v1610_v37 = vmax.f32 %v1460_v28, 0.0  ;;  %v1464_v38 = vadd.f32 %v1463_v34, %v8895_v16 }
 0x219   : > { %v1301_v57 = vadd.f32 %v1300_v53, %v8832_v6  ;;  %v1302_v58 = vpop.f32.mrb[35].mxu0  ;;  %2259 = vmatmul.mubr.bf16.gmra.mrb[92].mxu0 %v1724_v39  ;;  %v1632_v12 = vmax.f32 %v1297_v46, 0.0  ;;  %v1465_v39 = vpop.f32.mrb[23].mxu1 }
 0x21a   : > { %v1303_v0 = vadd.f32 %v1302_v58, %v8836_v7  ;;  %2378 = vmatpush1.bf16.msra.mxu0 %v7406_v43  ;;  %v1633_v15 = vmax.f32 %v1299_v52, 0.0  ;;  %v1466_v43 = vadd.f32 %v1465_v39, %v8900_v19  ;;  %v1614_v47 = vmax.f32 %v1464_v38, 0.0 }
 0x21b   : > { %v1636_v13 = vmax.f32 %v1301_v57, 0.0  ;;  %2379 = vmatprep.subr.bf16.mxu0 %v7411_v48  ;;  %v1469_v57 = vpop.f32.mrb[24].mxu1 }
 0x21c   : > { %v1637_v17 = vmax.f32 %v1303_v0, 0.0  ;;  %v1615_v51 = vmax.f32 %v1466_v43, 0.0  ;;  %v9027_v53 = vpack.c.bf16 %v1614_v47, %v1610_v37  ;;  %v1470_v62 = vadd.f32 %v1469_v57, %v8895_v16  ;;  %v1471_v0 = vpop.f32.mrb[25].mxu1 }
 0x21d   : > { %v1728_v20 = vpack.c.bf16 %v1636_v13, %v1632_v12  ;;  %v1472_v11 = vadd.f32 %v1471_v0, %v8900_v19  ;;  %v1473_v12 = vpop.f32.mrb[26].mxu1 }
 0x21e   : > { %v1729_v22 = vpack.c.bf16 %v1637_v17, %v1633_v15  ;;  %v1306_v23 = vpop.f32.mrb[36].mxu0  ;;  %2380 = vmatpush1.bf16.msra.mxu0 %v7409_v1  ;;  %v9029_v58 = vpack.c.bf16 %v1615_v51, %v1611_v42  ;;  %v1618_v15 = vmax.f32 %v1470_v62, 0.0  ;;  %v1474_v17 = vadd.f32 %v1473_v12, %v8895_v16  ;;  %v1475_v18 = vpop.f32.mrb[27].mxu1 }
 0x21f   : > { %v1307_v26 = vadd.f32 %v1306_v23, %v8832_v6  ;;  %v1308_v27 = vpop.f32.mrb[37].mxu0  ;;  %v1476_v23 = vadd.f32 %v1475_v18, %v8900_v19 }
 0x220   : > { %v1309_v30 = vadd.f32 %v1308_v27, %v8836_v7  ;;  %v1310_v31 = vpop.f32.mrb[38].mxu0  ;;  %2268 = vmatprep.mubr.bf16.mxu0 %v1729_v22  ;;  %v1619_v22 = vmax.f32 %v1472_v11, 0.0  ;;  %v1622_v27 = vmax.f32 %v1474_v17, 0.0 }
 0x221   : > { %v1311_v35 = vadd.f32 %v1310_v31, %v8832_v6  ;;  %v1312_v36 = vpop.f32.mrb[39].mxu0  ;;  %2269 = vmatmul.mubr.bf16.gmra.mrb[96].mxu0 %v1728_v20  ;;  %v1640_v44 = vmax.f32 %v1307_v26, 0.0 }
 0x222   : > { %v1313_v41 = vadd.f32 %v1312_v36, %v8836_v7  ;;  %v1641_v48 = vmax.f32 %v1309_v30, 0.0  ;;  %v1623_v30 = vmax.f32 %v1476_v23, 0.0  ;;  %v9039_v33 = vpack.c.bf16 %v1622_v27, %v1618_v15  ;;  %v1479_v36 = vpop.f32.mrb[28].mxu1 }
 0x223   : > { %v1644_v46 = vmax.f32 %v1311_v35, 0.0  ;;  %v1481_v42 = vpop.f32.mrb[29].mxu1 }
 0x224   : > { %v1645_v49 = vmax.f32 %v1313_v41, 0.0  ;;  %v9041_v37 = vpack.c.bf16 %v1623_v30, %v1619_v22  ;;  %v1480_v41 = vadd.f32 %v1479_v36, %v8895_v16  ;;  %v1483_v47 = vpop.f32.mrb[30].mxu1 }
 0x225   : > { %v1732_v52 = vpack.c.bf16 %v1644_v46, %v1640_v44  ;;  %v1482_v46 = vadd.f32 %v1481_v42, %v8900_v19  ;;  %v7412_v42 = vld [vmem:[#allocation7 + $0x40] sm:$0xff]  }
 0x226   : > { %v1733_v54 = vpack.c.bf16 %v1645_v49, %v1641_v48  ;;  %v1316_v56 = vpop.f32.mrb[40].mxu0  ;;  %v1626_v51 = vmax.f32 %v1480_v41, 0.0  ;;  %6593 = vmatprep.subr.bf16.mxu1 %v7412_v42 }
 0x227   : > { %v1317_v59 = vadd.f32 %v1316_v56, %v8832_v6  ;;  %v1318_v60 = vpop.f32.mrb[41].mxu0  ;;  %v1627_v57 = vmax.f32 %v1482_v46, 0.0 }
 0x228   : > { %v1319_v1 = vadd.f32 %v1318_v60, %v8836_v7  ;;  %v1320_v9 = vpop.f32.mrb[42].mxu0  ;;  %2278 = vmatprep.mubr.bf16.mxu0 %v1733_v54  ;;  %v1485_v54 = vpop.f32.mrb[31].mxu1 }
 0x229   : > { %v1321_v13 = vadd.f32 %v1320_v9, %v8832_v6  ;;  %v1322_v14 = vpop.f32.mrb[43].mxu0  ;;  %2279 = vmatmul.mubr.bf16.gmra.mrb[100].mxu0 %v1732_v52  ;;  %v1648_v24 = vmax.f32 %v1317_v59, 0.0  ;;  %v1484_v52 = vadd.f32 %v1483_v47, %v8895_v16  ;;  %v1486_v59 = vadd.f32 %v1485_v54, %v8900_v19  ;;  %v1489_v17 = vpop.f32.mrb[32].mxu1 }
 0x22a   : > { %v1323_v20 = vadd.f32 %v1322_v14, %v8836_v7  ;;  %v1649_v28 = vmax.f32 %v1319_v1, 0.0  ;;  %v1490_v23 = vadd.f32 %v1489_v17, %v8895_v16 }
 0x22b   : > { %v1652_v26 = vmax.f32 %v1321_v13, 0.0  ;;  %v1630_v0 = vmax.f32 %v1484_v52, 0.0  ;;  %v1631_v11 = vmax.f32 %v1486_v59, 0.0 }
 0x22c   : > { %v1653_v29 = vmax.f32 %v1323_v20, 0.0 }
 0x22d   : > { %v1736_v31 = vpack.c.bf16 %v1652_v26, %v1648_v24  ;;  %v9051_v13 = vpack.c.bf16 %v1630_v0, %v1626_v51  ;;  %v9053_v18 = vpack.c.bf16 %v1631_v11, %v1627_v57  ;;  %v1491_v24 = vpop.f32.mrb[33].mxu1 }
 0x22e   : > { %v1737_v34 = vpack.c.bf16 %v1653_v29, %v1649_v28  ;;  %v1326_v35 = vpop.f32.mrb[44].mxu0  ;;  %v1492_v28 = vadd.f32 %v1491_v24, %v8900_v19  ;;  %v1493_v29 = vpop.f32.mrb[34].mxu1 }
 0x22f   : > { %v1327_v38 = vadd.f32 %v1326_v35, %v8832_v6  ;;  %v1328_v39 = vpop.f32.mrb[45].mxu0  ;;  %v1494_v35 = vadd.f32 %v1493_v29, %v8895_v16  ;;  %v1495_v36 = vpop.f32.mrb[35].mxu1 }
 0x230   : > { %v1329_v43 = vadd.f32 %v1328_v39, %v8836_v7  ;;  %v1330_v44 = vpop.f32.mrb[46].mxu0  ;;  %2288 = vmatprep.mubr.bf16.mxu0 %v1737_v34  ;;  %v1634_v34 = vmax.f32 %v1490_v23, 0.0  ;;  %v1635_v39 = vmax.f32 %v1492_v28, 0.0  ;;  %v1496_v41 = vadd.f32 %v1495_v36, %v8900_v19  ;;  %v1499_v59 = vpop.f32.mrb[36].mxu1 }
 0x231   : > { %v1331_v48 = vadd.f32 %v1330_v44, %v8832_v6  ;;  %v1332_v49 = vpop.f32.mrb[47].mxu0  ;;  %2289 = vmatmul.mubr.bf16.gmra.mrb[104].mxu0 %v1736_v31  ;;  %v1656_v60 = vmax.f32 %v1327_v38, 0.0  ;;  %v1638_v47 = vmax.f32 %v1494_v35, 0.0 }
 0x232   : > { %v1333_v56 = vadd.f32 %v1332_v49, %v8836_v7  ;;  %v1657_v1 = vmax.f32 %v1329_v43, 0.0  ;;  %v7413_v43 = vld [vmem:[#allocation7] sm:$0xff]   ;;  %v1639_v51 = vmax.f32 %v1496_v41, 0.0 }
 0x233   : > { %v1660_v62 = vmax.f32 %v1331_v48, 0.0  ;;  %v9063_v54 = vpack.c.bf16 %v1638_v47, %v1634_v34  ;;  %6594 = vmatpush3.bf16.msra.mxu1 %v7413_v43 }
 0x234   : > { %v1661_v9 = vmax.f32 %v1333_v56, 0.0 }
 0x235   : > { %v1740_v12 = vpack.c.bf16 %v1660_v62, %v1656_v60  ;;  %v9065_v60 = vpack.c.bf16 %v1639_v51, %v1635_v39 }
 0x236   : > { %v1741_v14 = vpack.c.bf16 %v1661_v9, %v1657_v1  ;;  %v1336_v15 = vpop.f32.mrb[48].mxu0  ;;  %v1500_v1 = vadd.f32 %v1499_v59, %v8895_v16  ;;  %v1501_v9 = vpop.f32.mrb[37].mxu1 }
 0x237   : > { %v1337_v20 = vadd.f32 %v1336_v15, %v8832_v6  ;;  %v1338_v22 = vpop.f32.mrb[49].mxu0  ;;  %v1503_v15 = vpop.f32.mrb[38].mxu1 }
 0x238   : > { %v1339_v26 = vadd.f32 %v1338_v22, %v8836_v7  ;;  %v1340_v27 = vpop.f32.mrb[50].mxu0  ;;  %2298 = vmatprep.mubr.bf16.mxu0 %v1741_v14  ;;  %v1502_v14 = vadd.f32 %v1501_v9, %v8900_v19  ;;  %v1642_v22 = vmax.f32 %v1500_v1, 0.0  ;;  %v1504_v23 = vadd.f32 %v1503_v15, %v8895_v16  ;;  %v1505_v24 = vpop.f32.mrb[39].mxu1  ;;  %v7414_v15 = vld [vmem:[#allocation7 + $0x48] sm:$0xff]  }
 0x239   : > { %v1341_v30 = vadd.f32 %v1340_v27, %v8832_v6  ;;  %v1342_v31 = vpop.f32.mrb[51].mxu0  ;;  %2299 = vmatmul.mubr.bf16.gmra.mrb[108].mxu0 %v1740_v12  ;;  %v1664_v44 = vmax.f32 %v1337_v20, 0.0  ;;  %v1506_v28 = vadd.f32 %v1505_v24, %v8900_v19  ;;  %v1509_v43 = vpop.f32.mrb[40].mxu1  ;;  %6595 = vmatprep.subr.bf16.mxu1 %v7414_v15 }
 0x23a   : > { %v1343_v38 = vadd.f32 %v1342_v31, %v8836_v7  ;;  %v1665_v48 = vmax.f32 %v1339_v26, 0.0  ;;  %v1643_v27 = vmax.f32 %v1502_v14, 0.0  ;;  %v1646_v31 = vmax.f32 %v1504_v23, 0.0 }
 0x23b   : > { %v1668_v46 = vmax.f32 %v1341_v30, 0.0  ;;  %v1647_v36 = vmax.f32 %v1506_v28, 0.0 }
 0x23c   : > { %v1669_v49 = vmax.f32 %v1343_v38, 0.0  ;;  %v9075_v39 = vpack.c.bf16 %v1646_v31, %v1642_v22 }
 0x23d   : > { %v1744_v52 = vpack.c.bf16 %v1668_v46, %v1664_v44  ;;  %v9077_v44 = vpack.c.bf16 %v1647_v36, %v1643_v27 }
 0x23e   : > { %v1745_v56 = vpack.c.bf16 %v1669_v49, %v1665_v48  ;;  %v1346_v57 = vpop.f32.mrb[52].mxu0  ;;  %v1510_v48 = vadd.f32 %v1509_v43, %v8895_v16  ;;  %v1511_v49 = vpop.f32.mrb[41].mxu1 }
 0x23f   : > { %v1347_v62 = vadd.f32 %v1346_v57, %v8832_v6  ;;  %v1348_v0 = vpop.f32.mrb[53].mxu0  ;;  %v1513_v57 = vpop.f32.mrb[42].mxu1 }
 0x240   : > { %v1349_v11 = vadd.f32 %v1348_v0, %v8836_v7  ;;  %v1350_v12 = vpop.f32.mrb[54].mxu0  ;;  %2308 = vmatprep.mubr.bf16.mxu0 %v1745_v56  ;;  %v1512_v56 = vadd.f32 %v1511_v49, %v8900_v19  ;;  %v1650_v0 = vmax.f32 %v1510_v48, 0.0  ;;  %v1514_v1 = vadd.f32 %v1513_v57, %v8895_v16  ;;  %v1515_v9 = vpop.f32.mrb[43].mxu1 }
 0x241   : > { %v1351_v17 = vadd.f32 %v1350_v12, %v8832_v6  ;;  %v1352_v20 = vpop.f32.mrb[55].mxu0  ;;  %2309 = vmatmul.mubr.bf16.gmra.mrb[112].mxu0 %v1744_v52  ;;  %v1672_v29 = vmax.f32 %v1347_v62, 0.0  ;;  %v1516_v14 = vadd.f32 %v1515_v9, %v8900_v19 }
 0x242   : > { %v1353_v26 = vadd.f32 %v1352_v20, %v8836_v7  ;;  %v1673_v34 = vmax.f32 %v1349_v11, 0.0  ;;  %v1651_v12 = vmax.f32 %v1512_v56, 0.0  ;;  %v1654_v23 = vmax.f32 %v1514_v1, 0.0 }
 0x243   : > { %v1676_v30 = vmax.f32 %v1351_v17, 0.0  ;;  %v7415_v17 = vld [vmem:[#allocation7 + $0x8] sm:$0xff]   ;;  %v1655_v27 = vmax.f32 %v1516_v14, 0.0 }
 0x244   : > { %v1677_v35 = vmax.f32 %v1353_v26, 0.0  ;;  %6596 = vmatpush3.bf16.msra.mxu1 %v7415_v17 }
 0x245   : > { %v1748_v38 = vpack.c.bf16 %v1676_v30, %v1672_v29  ;;  %v9087_v29 = vpack.c.bf16 %v1654_v23, %v1650_v0 }
 0x246   : > { %v1749_v41 = vpack.c.bf16 %v1677_v35, %v1673_v34  ;;  %v1356_v42 = vpop.f32.mrb[56].mxu0  ;;  %v1519_v34 = vpop.f32.mrb[44].mxu1  ;;  %v9089_v35 = vpack.c.bf16 %v1655_v27, %v1651_v12 }
 0x247   : > { %v1357_v46 = vadd.f32 %v1356_v42, %v8832_v6  ;;  %v1358_v47 = vpop.f32.mrb[57].mxu0  ;;  %v1521_v42 = vpop.f32.mrb[45].mxu1 }
 0x248   : > { %v1359_v51 = vadd.f32 %v1358_v47, %v8836_v7  ;;  %v1360_v52 = vpop.f32.mrb[58].mxu0  ;;  %2318 = vmatprep.mubr.bf16.mxu0 %v1749_v41  ;;  %v1520_v41 = vadd.f32 %v1519_v34, %v8895_v16  ;;  %v1522_v47 = vadd.f32 %v1521_v42, %v8900_v19  ;;  %v1523_v48 = vpop.f32.mrb[46].mxu1  ;;  %v7416_v34 = vld [vmem:[#allocation7 + $0x50] sm:$0xff]  }
 0x249   : > { %v1361_v59 = vadd.f32 %v1360_v52, %v8832_v6  ;;  %v1362_v62 = vpop.f32.mrb[59].mxu0  ;;  %2319 = vmatmul.mubr.bf16.gmra.mrb[116].mxu0 %v1748_v38  ;;  %v1680_v20 = vmax.f32 %v1357_v46, 0.0  ;;  %v1524_v56 = vadd.f32 %v1523_v48, %v8895_v16  ;;  %v1525_v57 = vpop.f32.mrb[47].mxu1  ;;  %6597 = vmatprep.subr.bf16.mxu1 %v7416_v34 }
 0x24a   : > { %v1363_v11 = vadd.f32 %v1362_v62, %v8836_v7  ;;  %v1681_v24 = vmax.f32 %v1359_v51, 0.0  ;;  %v1658_v52 = vmax.f32 %v1520_v41, 0.0  ;;  %v1659_v62 = vmax.f32 %v1522_v47, 0.0  ;;  %v7419_v47 = vld [vmem:[#allocation7 + $0x18] sm:$0xff]  }
 0x24b   : > { %v1684_v22 = vmax.f32 %v1361_v59, 0.0  ;;  %v1526_v0 = vadd.f32 %v1525_v57, %v8900_v19 }
 0x24c   : > { %v1685_v26 = vmax.f32 %v1363_v11, 0.0  ;;  %v1662_v11 = vmax.f32 %v1524_v56, 0.0 }
 0x24d   : > { %v1752_v28 = vpack.c.bf16 %v1684_v22, %v1680_v20  ;;  %v1663_v15 = vmax.f32 %v1526_v0, 0.0  ;;  %v1529_v22 = vpop.f32.mrb[48].mxu1 }
 0x24e   : > { %v1753_v30 = vpack.c.bf16 %v1685_v26, %v1681_v24  ;;  %v1366_v31 = vpop.f32.mrb[60].mxu0  ;;  %v9099_v20 = vpack.c.bf16 %v1662_v11, %v1658_v52  ;;  %v1530_v24 = vadd.f32 %v1529_v22, %v8895_v16  ;;  %v1531_v26 = vpop.f32.mrb[49].mxu1  ;;  %v7422_v11 = vld [vmem:[#allocation7 + $0x68] sm:$0xff]  }
 0x24f   : > { %v1367_v36 = vadd.f32 %v1366_v31, %v8832_v6  ;;  %v1368_v38 = vpop.f32.mrb[61].mxu0  ;;  %v9101_v23 = vpack.c.bf16 %v1663_v15, %v1659_v62  ;;  %v1533_v27 = vpop.f32.mrb[50].mxu1  ;;  %v7421_v62 = vld [vmem:[#allocation7 + $0x20] sm:$0xff]  }
 0x250   : > { %v1369_v43 = vadd.f32 %v1368_v38, %v8836_v7  ;;  %v1370_v46 = vpop.f32.mrb[62].mxu0  ;;  %2328 = vmatprep.mubr.bf16.mxu0 %v1753_v30  ;;  %v1534_v30 = vadd.f32 %v1533_v27, %v8895_v16  ;;  %v1535_v31 = vpop.f32.mrb[51].mxu1  ;;  %v7418_v38 = vld [vmem:[#allocation7 + $0x58] sm:$0xff]  }
 0x251   : > { %v1371_v49 = vadd.f32 %v1370_v46, %v8832_v6  ;;  %v1372_v51 = vpop.f32.mrb[63].mxu0  ;;  %2329 = vmatmul.mubr.bf16.gmra.mrb[120].mxu0 %v1752_v28  ;;  %v1688_v1 = vmax.f32 %v1367_v36, 0.0  ;;  %v1666_v28 = vmax.f32 %v1530_v24, 0.0  ;;  %v7417_v36 = vld [vmem:[#allocation7 + $0x10] sm:$0xff]   ;;  %v1536_v42 = vadd.f32 %v1535_v31, %v8900_v19 }
 0x252   : > { %v1373_v59 = vadd.f32 %v1372_v51, %v8836_v7  ;;  %v1689_v12 = vmax.f32 %v1369_v43, 0.0  ;;  %v1532_v7 = vadd.f32 %v1531_v26, %v8900_v19  ;;  %v1670_v43 = vmax.f32 %v1534_v30, 0.0  ;;  %6598 = vmatpush3.bf16.msra.mxu1 %v7417_v36  ;;  %v1539_v51 = vpop.f32.mrb[52].mxu1  ;;  %v7424_v24 = vld [vmem:[#allocation7 + $0x70] sm:$0xff]  }
 0x253   : > { %v1692_v9 = vmax.f32 %v1371_v49, 0.0  ;;  %v1671_v46 = vmax.f32 %v1536_v42, 0.0  ;;  %6599 = vmatprep.subr.bf16.mxu1 %v7418_v38  ;;  %v7420_v49 = vld [vmem:[#allocation7 + $0x60] sm:$0xff]   ;;  %v1540_v56 = vadd.f32 %v1539_v51, %v8895_v16  ;;  %v1541_v57 = vpop.f32.mrb[53].mxu1  ;;  %v7426_v38 = vld [vmem:[#allocation7 + $0x78] sm:$0xff]  }
 0x254   : > { %v1693_v14 = vmax.f32 %v1373_v59, 0.0  ;;  %v1667_v41 = vmax.f32 %v1532_v7, 0.0  ;;  %v9108_v48 = vpack.c.bf16 %v1670_v43, %v1666_v28  ;;  %v1543_v59 = vpop.f32.mrb[54].mxu1 }
 0x255   : > { %v1756_v17 = vpack.c.bf16 %v1692_v9, %v1688_v1  ;;  %v1674_v0 = vmax.f32 %v1540_v56, 0.0  ;;  %v1544_v1 = vadd.f32 %v1543_v59, %v8895_v16  ;;  %v1545_v9 = vpop.f32.mrb[55].mxu1 }
 0x256   : > { %v1757_v6 = vpack.c.bf16 %v1693_v14, %v1689_v12  ;;  %v9110_v52 = vpack.c.bf16 %v1671_v46, %v1667_v41  ;;  %6600 = vmatpush3.bf16.msra.mxu1 %v7419_v47  ;;  %v1546_v14 = vadd.f32 %v1545_v9, %v8900_v19  ;;  %v7427_v47 = vld [vmem:[#allocation7 + $0x38] sm:$0xff]  }
 0x257   : > { %6601 = vmatprep.subr.bf16.mxu1 %v7420_v49  ;;  %v1678_v15 = vmax.f32 %v1544_v1, 0.0 }
 0x258   : > { %2338 = vmatprep.mubr.bf16.mxu0 %v1757_v6  ;;  %v7423_v6 = vld [vmem:[#allocation7 + $0x28] sm:$0xff]  }
 0x259   : > { %2339 = vmatmul.mubr.bf16.gmra.mrb[124].mxu0 %v1756_v17  ;;  %v1679_v17 = vmax.f32 %v1546_v14, 0.0  ;;  %v9118_v22 = vpack.c.bf16 %v1678_v15, %v1674_v0 }
 0x25a   : > { %2381 = vmatprep.mubr.bf16.mxu0 %v8927_v55  ;;  %v1542_v55 = vadd.f32 %v1541_v57, %v8900_v19  ;;  %6602 = vmatpush3.bf16.msra.mxu1 %v7421_v62 }
 0x25b   : > { %6603 = vmatprep.subr.bf16.mxu1 %v7422_v11 }
 0x25c   : > { %v1675_v12 = vmax.f32 %v1542_v55, 0.0 }
 0x25e   : > { %v1751_v26 = vpack.c.bf16 %v1679_v17, %v1675_v12  ;;  %6604 = vmatpush3.bf16.msra.mxu1 %v7423_v6 }
 0x25f   : > { %6605 = vmatprep.subr.bf16.mxu1 %v7424_v24 }
 0x261   : > { %2382 = vmatmul.mubr.bf16.vlgmr.msra.gmra.mrb[64].mxu0 %v8922_v50  ;;  %v1549_v50 = vpop.f32.mrb[56].mxu1 }
 0x262   : > { %2391 = vmatprep.mubr.bf16.mxu0 %v8951_v32  ;;  %v1550_v7 = vadd.f32 %v1549_v50, %v8895_v16  ;;  %v1551_v27 = vpop.f32.mrb[57].mxu1  ;;  %v7425_v32 = vld [vmem:[#allocation7 + $0x30] sm:$0xff]  }
 0x263   : > { %v1552_v28 = vadd.f32 %v1551_v27, %v8900_v19  ;;  %v1553_v30 = vpop.f32.mrb[58].mxu1  ;;  %6606 = vmatpush3.bf16.msra.mxu1 %v7425_v32 }
 0x264   : > { %v1682_v31 = vmax.f32 %v1550_v7, 0.0  ;;  %v1554_v34 = vadd.f32 %v1553_v30, %v8895_v16  ;;  %v1555_v36 = vpop.f32.mrb[59].mxu1  ;;  %6607 = vmatprep.subr.bf16.mxu1 %v7426_v38  ;;  %v7430_v7 = vld [vmem:[#allocation8 + $0x10] sm:$0xff]   ;;  %v7431_v38 = vld [vmem:[#allocation8 + $0x18] sm:$0xff]  }
 0x265   : > { %v1683_v41 = vmax.f32 %v1552_v28, 0.0  ;;  %v1556_v42 = vadd.f32 %v1555_v36, %v8900_v19  ;;  %v1559_v51 = vpop.f32.mrb[60].mxu1 }
 0x266   : > { %v1686_v43 = vmax.f32 %v1554_v34, 0.0  ;;  %v1561_v57 = vpop.f32.mrb[61].mxu1 }
 0x267   : > { %v1687_v46 = vmax.f32 %v1556_v42, 0.0  ;;  %v1562_v55 = vadd.f32 %v1561_v57, %v8900_v19  ;;  %v1563_v59 = vpop.f32.mrb[62].mxu1  ;;  %6608 = vmatpush3.bf16.msra.mxu1 %v7427_v47 }
 0x268   : > { %v1754_v49 = vpack.c.bf16 %v1686_v43, %v1682_v31  ;;  %v1564_v62 = vadd.f32 %v1563_v59, %v8895_v16  ;;  %v1565_v0 = vpop.f32.mrb[63].mxu1 }
 0x269   : > { %2392 = vmatmul.mubr.bf16.gmra.mrb[68].mxu0 %v8946_v4  ;;  %v1755_v56 = vpack.c.bf16 %v1687_v46, %v1683_v41  ;;  %v1560_v4 = vadd.f32 %v1559_v51, %v8895_v16  ;;  %v1691_v1 = vmax.f32 %v1562_v55, 0.0  ;;  %v1566_v9 = vadd.f32 %v1565_v0, %v8900_v19  ;;  %v7428_v16 = vld [vmem:[#allocation8] sm:$0xff]   ;;  %v1824_v19 = vld [vmem:[#allocation5] sm:$0x3] }
 0x26a   : > { %2401 = vmatprep.mubr.bf16.mxu0 %v8975_v10  ;;  %v1694_v11 = vmax.f32 %v1564_v62, 0.0  ;;  %6729 = vmatprep.subr.bf16.mxu1 %v7428_v16 }
 0x26b   : > { %v1690_v10 = vmax.f32 %v1560_v4, 0.0  ;;  %v1695_v12 = vmax.f32 %v1566_v9, 0.0 }
 0x26d   : > { %v1758_v14 = vpack.c.bf16 %v1694_v11, %v1690_v10  ;;  %v1759_v15 = vpack.c.bf16 %v1695_v12, %v1691_v1  ;;  %v7433_v1 = vld [vmem:[#allocation8 + $0x28] sm:$0xff]  }
 0x271   : > { %2402 = vmatmul.mubr.bf16.gmra.mrb[72].mxu0 %v8970_v61  ;;  %v9153_v61 = vrot.slane %v1824_v19, %v8823_v3 }
 0x272   : > { %2411 = vmatprep.mubr.bf16.mxu0 %v8999_v45 }
 0x279   : > { %2412 = vmatmul.mubr.bf16.gmra.mrb[76].mxu0 %v8994_v40  ;;  %v9156_v40 = vrot.slane %v1824_v19, %v8828_v5 }
 0x27a   : > { %2421 = vmatprep.mubr.bf16.mxu0 %v9017_v25 }
 0x281   : > { %2422 = vmatmul.mubr.bf16.gmra.mrb[80].mxu0 %v9015_v21 }
 0x282   : > { %2431 = vmatprep.mubr.bf16.mxu0 %v9029_v58 }
 0x289   : > { %2432 = vmatmul.mubr.bf16.gmra.mrb[84].mxu0 %v9027_v53 }
 0x28a   : > { %2441 = vmatprep.mubr.bf16.mxu0 %v9041_v37 }
 0x291   : > { %2442 = vmatmul.mubr.bf16.gmra.mrb[88].mxu0 %v9039_v33 }
 0x292   : > { %2451 = vmatprep.mubr.bf16.mxu0 %v9053_v18 }
 0x299   : > { %2452 = vmatmul.mubr.bf16.gmra.mrb[92].mxu0 %v9051_v13 }
 0x29a   : > { %2461 = vmatprep.mubr.bf16.mxu0 %v9065_v60 }
 0x2a1   : > { %2462 = vmatmul.mubr.bf16.gmra.mrb[96].mxu0 %v9063_v54 }
 0x2a2   : > { %2471 = vmatprep.mubr.bf16.mxu0 %v9077_v44 }
 0x2a9   : > { %2472 = vmatmul.mubr.bf16.gmra.mrb[100].mxu0 %v9075_v39 }
 0x2aa   : > { %2481 = vmatprep.mubr.bf16.mxu0 %v9089_v35 }
 0x2b1   : > { %2482 = vmatmul.mubr.bf16.gmra.mrb[104].mxu0 %v9087_v29 }
 0x2b2   : > { %2491 = vmatprep.mubr.bf16.mxu0 %v9101_v23 }
 0x2b9   : > { %2492 = vmatmul.mubr.bf16.gmra.mrb[108].mxu0 %v9099_v20 }
 0x2ba   : > { %2501 = vmatprep.mubr.bf16.mxu0 %v9110_v52 }
 0x2c1   : > { %2502 = vmatmul.mubr.bf16.gmra.mrb[112].mxu0 %v9108_v48  ;;  %v7429_v48 = vld [vmem:[#allocation8 + $0x8] sm:$0xff]  }
 0x2c2   : > { %2511 = vmatprep.mubr.bf16.mxu0 %v1751_v26 }
 0x2c9   : > { %2512 = vmatmul.mubr.bf16.gmra.mrb[116].mxu0 %v9118_v22 }
 0x2ca   : > { %2521 = vmatprep.mubr.bf16.mxu0 %v1755_v56  ;;  %v7432_v56 = vld [vmem:[#allocation8 + $0x20] sm:$0xff]  }
 0x2d1   : > { %2522 = vmatmul.mubr.bf16.gmra.mrb[120].mxu0 %v1754_v49 }
 0x2d2   : > { %2531 = vmatprep.mubr.bf16.mxu0 %v1759_v15 }
 0x2d9   : > { %2532 = vmatmul.mubr.bf16.gmra.mrb[124].mxu0 %v1758_v14 }
 0x334   : > { %v2383_v45 = vpop.f32.mrb[64].mxu0 }
 0x335   : > { %v6809_v21 = vadd.f32 %v2383_v45, %v9153_v61  ;;  %v2385_v25 = vpop.f32.mrb[65].mxu0  ;;  %v7434_v45 = vld [vmem:[#allocation8 + $0x30] sm:$0xff]  }
 0x336   : > { %v6810_v53 = vadd.f32 %v2385_v25, %v9156_v40  ;;  %v2387_v58 = vpop.f32.mrb[66].mxu0 }
 0x337   : > { %v6811_v33 = vadd.f32 %v2387_v58, %v9153_v61  ;;  %v2389_v37 = vpop.f32.mrb[67].mxu0  ;;  %v2542_v18 = vmax.f32 %v6809_v21, 0.0 }
 0x338   : > { %v6812_v13 = vadd.f32 %v2389_v37, %v9156_v40  ;;  %v2543_v60 = vmax.f32 %v6810_v53, 0.0 }
 0x339   : > { %v2544_v54 = vmax.f32 %v6811_v33, 0.0 }
 0x33a   : > { %v2545_v39 = vmax.f32 %v6812_v13, 0.0 }
 0x33b   : > { %v2606_v44 = vpack.c.bf16 %v2544_v54, %v2542_v18 }
 0x33c   : > { %v2607_v29 = vpack.c.bf16 %v2545_v39, %v2543_v60  ;;  %v2393_v35 = vpop.f32.mrb[68].mxu0 }
 0x33d   : > { %v6813_v20 = vadd.f32 %v2393_v35, %v9153_v61  ;;  %v2395_v23 = vpop.f32.mrb[69].mxu0 }
 0x33e   : > { %v6814_v52 = vadd.f32 %v2395_v23, %v9156_v40  ;;  %v2397_v17 = vpop.f32.mrb[70].mxu0  ;;  %2805 = vmatprep.mubr.bf16.mxu1 %v2607_v29 }
 0x33f   : > { %v6815_v6 = vadd.f32 %v2397_v17, %v9153_v61  ;;  %v2399_v22 = vpop.f32.mrb[71].mxu0  ;;  %2806 = vmatmul.mubr.bf16.vlgmr.msra.gmra.mrb[64].mxu1 %v2606_v44  ;;  %v2546_v50 = vmax.f32 %v6813_v20, 0.0 }
 0x340   : > { %v6816_v24 = vadd.f32 %v2399_v22, %v9156_v40  ;;  %6730 = vmatpush3.bf16.msra.mxu1 %v7428_v16  ;;  %v2547_v27 = vmax.f32 %v6814_v52, 0.0 }
 0x341   : > { %v2548_v26 = vmax.f32 %v6815_v6, 0.0  ;;  %6731 = vmatprep.subr.bf16.mxu1 %v7429_v48 }
 0x342   : > { %v2549_v28 = vmax.f32 %v6816_v24, 0.0 }
 0x343   : > { %v2608_v30 = vpack.c.bf16 %v2548_v26, %v2546_v50 }
 0x344   : > { %v2609_v32 = vpack.c.bf16 %v2549_v28, %v2547_v27  ;;  %v2403_v31 = vpop.f32.mrb[72].mxu0  ;;  %6732 = vmatpush3.bf16.msra.mxu1 %v7429_v48 }
 0x345   : > { %v6817_v34 = vadd.f32 %v2403_v31, %v9153_v61  ;;  %v2405_v36 = vpop.f32.mrb[73].mxu0  ;;  %6733 = vmatprep.subr.bf16.mxu1 %v7430_v7 }
 0x346   : > { %v6818_v41 = vadd.f32 %v2405_v36, %v9156_v40  ;;  %v2407_v42 = vpop.f32.mrb[74].mxu0  ;;  %2813 = vmatprep.mubr.bf16.mxu1 %v2609_v32 }
 0x347   : > { %v6819_v43 = vadd.f32 %v2407_v42, %v9153_v61  ;;  %v2409_v46 = vpop.f32.mrb[75].mxu0  ;;  %2814 = vmatmul.mubr.bf16.gmra.mrb[68].mxu1 %v2608_v30  ;;  %v2550_v49 = vmax.f32 %v6817_v34, 0.0 }
 0x348   : > { %v6820_v47 = vadd.f32 %v2409_v46, %v9156_v40  ;;  %6734 = vmatpush3.bf16.msra.mxu1 %v7430_v7  ;;  %v2551_v4 = vmax.f32 %v6818_v41, 0.0 }
 0x349   : > { %v2552_v51 = vmax.f32 %v6819_v43, 0.0  ;;  %6735 = vmatprep.subr.bf16.mxu1 %v7431_v38 }
 0x34a   : > { %v2553_v57 = vmax.f32 %v6820_v47, 0.0 }
 0x34b   : > { %v2610_v55 = vpack.c.bf16 %v2552_v51, %v2550_v49 }
 0x34c   : > { %v2611_v59 = vpack.c.bf16 %v2553_v57, %v2551_v4  ;;  %v2413_v10 = vpop.f32.mrb[76].mxu0  ;;  %6736 = vmatpush3.bf16.msra.mxu1 %v7431_v38 }
 0x34d   : > { %v6821_v62 = vadd.f32 %v2413_v10, %v9153_v61  ;;  %v2415_v0 = vpop.f32.mrb[77].mxu0  ;;  %6737 = vmatprep.subr.bf16.mxu1 %v7432_v56 }
 0x34e   : > { %v6822_v9 = vadd.f32 %v2415_v0, %v9156_v40  ;;  %v2417_v11 = vpop.f32.mrb[78].mxu0  ;;  %2821 = vmatprep.mubr.bf16.mxu1 %v2611_v59 }
 0x34f   : > { %v6823_v12 = vadd.f32 %v2417_v11, %v9153_v61  ;;  %v2419_v14 = vpop.f32.mrb[79].mxu0  ;;  %2822 = vmatmul.mubr.bf16.gmra.mrb[72].mxu1 %v2610_v55  ;;  %v2554_v16 = vmax.f32 %v6821_v62, 0.0 }
 0x350   : > { %v6824_v15 = vadd.f32 %v2419_v14, %v9156_v40  ;;  %6738 = vmatpush3.bf16.msra.mxu1 %v7432_v56  ;;  %v2555_v21 = vmax.f32 %v6822_v9, 0.0 }
 0x351   : > { %v2556_v19 = vmax.f32 %v6823_v12, 0.0  ;;  %6739 = vmatprep.subr.bf16.mxu1 %v7433_v1 }
 0x352   : > { %v2557_v25 = vmax.f32 %v6824_v15, 0.0 }
 0x353   : > { %v2612_v53 = vpack.c.bf16 %v2556_v19, %v2554_v16 }
 0x354   : > { %v2613_v58 = vpack.c.bf16 %v2557_v25, %v2555_v21  ;;  %v2423_v33 = vpop.f32.mrb[80].mxu0  ;;  %6740 = vmatpush3.bf16.msra.mxu1 %v7433_v1 }
 0x355   : > { %v6825_v37 = vadd.f32 %v2423_v33, %v9153_v61  ;;  %v2425_v13 = vpop.f32.mrb[81].mxu0  ;;  %6741 = vmatprep.subr.bf16.mxu1 %v7434_v45 }
 0x356   : > { %v6826_v18 = vadd.f32 %v2425_v13, %v9156_v40  ;;  %v2427_v54 = vpop.f32.mrb[82].mxu0  ;;  %2829 = vmatprep.mubr.bf16.mxu1 %v2613_v58 }
 0x357   : > { %v6827_v60 = vadd.f32 %v2427_v54, %v9153_v61  ;;  %v2429_v39 = vpop.f32.mrb[83].mxu0  ;;  %2830 = vmatmul.mubr.bf16.gmra.mrb[76].mxu1 %v2612_v53  ;;  %v2558_v29 = vmax.f32 %v6825_v37, 0.0 }
 0x358   : > { %v6828_v44 = vadd.f32 %v2429_v39, %v9156_v40  ;;  %6742 = vmatpush3.bf16.msra.mxu1 %v7434_v45  ;;  %v2559_v20 = vmax.f32 %v6826_v18, 0.0 }
 0x359   : > { %v2560_v35 = vmax.f32 %v6827_v60, 0.0 }
 0x35a   : > { %v2561_v23 = vmax.f32 %v6828_v44, 0.0 }
 0x35b   : > { %v2614_v48 = vpack.c.bf16 %v2560_v35, %v2558_v29 }
 0x35c   : > { %v2615_v52 = vpack.c.bf16 %v2561_v23, %v2559_v20  ;;  %v2433_v17 = vpop.f32.mrb[84].mxu0 }
 0x35d   : > { %v6829_v6 = vadd.f32 %v2433_v17, %v9153_v61  ;;  %v2435_v22 = vpop.f32.mrb[85].mxu0 }
 0x35e   : > { %v6830_v24 = vadd.f32 %v2435_v22, %v9156_v40  ;;  %v2437_v50 = vpop.f32.mrb[86].mxu0  ;;  %2837 = vmatprep.mubr.bf16.mxu1 %v2615_v52 }
 0x35f   : > { %v6831_v26 = vadd.f32 %v2437_v50, %v9153_v61  ;;  %v2439_v7 = vpop.f32.mrb[87].mxu0  ;;  %2838 = vmatmul.mubr.bf16.gmra.mrb[80].mxu1 %v2614_v48  ;;  %v2562_v28 = vmax.f32 %v6829_v6, 0.0 }
 0x360   : > { %v6832_v27 = vadd.f32 %v2439_v7, %v9156_v40  ;;  %v2563_v32 = vmax.f32 %v6830_v24, 0.0 }
 0x361   : > { %v2564_v30 = vmax.f32 %v6831_v26, 0.0 }
 0x362   : > { %v2565_v31 = vmax.f32 %v6832_v27, 0.0 }
 0x363   : > { %v2616_v34 = vpack.c.bf16 %v2564_v30, %v2562_v28 }
 0x364   : > { %v2617_v36 = vpack.c.bf16 %v2565_v31, %v2563_v32  ;;  %v2443_v38 = vpop.f32.mrb[88].mxu0 }
 0x365   : > { %v6833_v41 = vadd.f32 %v2443_v38, %v9153_v61  ;;  %v2445_v42 = vpop.f32.mrb[89].mxu0 }
 0x366   : > { %v6834_v43 = vadd.f32 %v2445_v42, %v9156_v40  ;;  %v2447_v46 = vpop.f32.mrb[90].mxu0  ;;  %2845 = vmatprep.mubr.bf16.mxu1 %v2617_v36 }
 0x367   : > { %v6835_v47 = vadd.f32 %v2447_v46, %v9153_v61  ;;  %v2449_v49 = vpop.f32.mrb[91].mxu0  ;;  %2846 = vmatmul.mubr.bf16.gmra.mrb[84].mxu1 %v2616_v34  ;;  %v2566_v56 = vmax.f32 %v6833_v41, 0.0 }
 0x368   : > { %v6836_v51 = vadd.f32 %v2449_v49, %v9156_v40  ;;  %v2567_v57 = vmax.f32 %v6834_v43, 0.0 }
 0x369   : > { %v2568_v4 = vmax.f32 %v6835_v47, 0.0 }
 0x36a   : > { %v2569_v55 = vmax.f32 %v6836_v51, 0.0 }
 0x36b   : > { %v2618_v59 = vpack.c.bf16 %v2568_v4, %v2566_v56 }
 0x36c   : > { %v2619_v10 = vpack.c.bf16 %v2569_v55, %v2567_v57  ;;  %v2453_v62 = vpop.f32.mrb[92].mxu0 }
 0x36d   : > { %v6837_v0 = vadd.f32 %v2453_v62, %v9153_v61  ;;  %v2455_v1 = vpop.f32.mrb[93].mxu0 }
 0x36e   : > { %v6838_v9 = vadd.f32 %v2455_v1, %v9156_v40  ;;  %v2457_v11 = vpop.f32.mrb[94].mxu0  ;;  %2853 = vmatprep.mubr.bf16.mxu1 %v2619_v10 }
 0x36f   : > { %v6839_v12 = vadd.f32 %v2457_v11, %v9153_v61  ;;  %v2459_v14 = vpop.f32.mrb[95].mxu0  ;;  %2854 = vmatmul.mubr.bf16.gmra.mrb[88].mxu1 %v2618_v59  ;;  %v2570_v16 = vmax.f32 %v6837_v0, 0.0 }
 0x370   : > { %v6840_v15 = vadd.f32 %v2459_v14, %v9156_v40  ;;  %v2571_v45 = vmax.f32 %v6838_v9, 0.0 }
 0x371   : > { %v2572_v19 = vmax.f32 %v6839_v12, 0.0 }
 0x372   : > { %v2573_v21 = vmax.f32 %v6840_v15, 0.0 }
 0x373   : > { %v2620_v25 = vpack.c.bf16 %v2572_v19, %v2570_v16 }
 0x374   : > { %v2621_v53 = vpack.c.bf16 %v2573_v21, %v2571_v45  ;;  %v2463_v58 = vpop.f32.mrb[96].mxu0 }
 0x375   : > { %v6841_v33 = vadd.f32 %v2463_v58, %v9153_v61  ;;  %v2465_v37 = vpop.f32.mrb[97].mxu0 }
 0x376   : > { %v6842_v13 = vadd.f32 %v2465_v37, %v9156_v40  ;;  %v2467_v18 = vpop.f32.mrb[98].mxu0  ;;  %2861 = vmatprep.mubr.bf16.mxu1 %v2621_v53 }
 0x377   : > { %v6843_v54 = vadd.f32 %v2467_v18, %v9153_v61  ;;  %v2469_v60 = vpop.f32.mrb[99].mxu0  ;;  %2862 = vmatmul.mubr.bf16.gmra.mrb[92].mxu1 %v2620_v25  ;;  %v2574_v44 = vmax.f32 %v6841_v33, 0.0 }
 0x378   : > { %v6844_v39 = vadd.f32 %v2469_v60, %v9156_v40  ;;  %v2575_v35 = vmax.f32 %v6842_v13, 0.0 }
 0x379   : > { %v2576_v29 = vmax.f32 %v6843_v54, 0.0 }
 0x37a   : > { %v2577_v20 = vmax.f32 %v6844_v39, 0.0  ;;  %v7435_v39 = vld [vmem:[#allocation8 + $0x38] sm:$0xff]  }
 0x37b   : > { %v2622_v23 = vpack.c.bf16 %v2576_v29, %v2574_v44  ;;  %6743 = vmatprep.subr.bf16.mxu1 %v7435_v39 }
 0x37c   : > { %v2623_v48 = vpack.c.bf16 %v2577_v20, %v2575_v35  ;;  %v2473_v52 = vpop.f32.mrb[100].mxu0  ;;  %6744 = vmatpush3.bf16.msra.mxu1 %v7435_v39 }
 0x37d   : > { %v6845_v17 = vadd.f32 %v2473_v52, %v9153_v61  ;;  %v2475_v6 = vpop.f32.mrb[101].mxu0 }
 0x37e   : > { %v6846_v22 = vadd.f32 %v2475_v6, %v9156_v40  ;;  %v2477_v24 = vpop.f32.mrb[102].mxu0  ;;  %2869 = vmatprep.mubr.bf16.mxu1 %v2623_v48 }
 0x37f   : > { %v6847_v50 = vadd.f32 %v2477_v24, %v9153_v61  ;;  %v2479_v26 = vpop.f32.mrb[103].mxu0  ;;  %2870 = vmatmul.mubr.bf16.gmra.mrb[96].mxu1 %v2622_v23  ;;  %v2578_v27 = vmax.f32 %v6845_v17, 0.0 }
 0x380   : > { %v6848_v7 = vadd.f32 %v2479_v26, %v9156_v40  ;;  %v2579_v30 = vmax.f32 %v6846_v22, 0.0 }
 0x381   : > { %v2580_v28 = vmax.f32 %v6847_v50, 0.0 }
 0x382   : > { %v2581_v32 = vmax.f32 %v6848_v7, 0.0 }
 0x383   : > { %v2624_v31 = vpack.c.bf16 %v2580_v28, %v2578_v27 }
 0x384   : > { %v2625_v34 = vpack.c.bf16 %v2581_v32, %v2579_v30  ;;  %v2483_v36 = vpop.f32.mrb[104].mxu0 }
 0x385   : > { %v6849_v38 = vadd.f32 %v2483_v36, %v9153_v61  ;;  %v2485_v41 = vpop.f32.mrb[105].mxu0 }
 0x386   : > { %v6850_v42 = vadd.f32 %v2485_v41, %v9156_v40  ;;  %v2487_v43 = vpop.f32.mrb[106].mxu0  ;;  %2877 = vmatprep.mubr.bf16.mxu1 %v2625_v34 }
 0x387   : > { %v6851_v46 = vadd.f32 %v2487_v43, %v9153_v61  ;;  %v2489_v47 = vpop.f32.mrb[107].mxu0  ;;  %2878 = vmatmul.mubr.bf16.gmra.mrb[100].mxu1 %v2624_v31  ;;  %v2582_v51 = vmax.f32 %v6849_v38, 0.0 }
 0x388   : > { %v6852_v49 = vadd.f32 %v2489_v47, %v9156_v40  ;;  %v2583_v4 = vmax.f32 %v6850_v42, 0.0 }
 0x389   : > { %v2584_v56 = vmax.f32 %v6851_v46, 0.0 }
 0x38a   : > { %v2585_v57 = vmax.f32 %v6852_v49, 0.0 }
 0x38b   : > { %v2626_v55 = vpack.c.bf16 %v2584_v56, %v2582_v51 }
 0x38c   : > { %v2627_v59 = vpack.c.bf16 %v2585_v57, %v2583_v4  ;;  %v2493_v10 = vpop.f32.mrb[108].mxu0 }
 0x38d   : > { %v6853_v62 = vadd.f32 %v2493_v10, %v9153_v61  ;;  %v2495_v0 = vpop.f32.mrb[109].mxu0 }
 0x38e   : > { %v6854_v1 = vadd.f32 %v2495_v0, %v9156_v40  ;;  %v2497_v9 = vpop.f32.mrb[110].mxu0  ;;  %2885 = vmatprep.mubr.bf16.mxu1 %v2627_v59 }
 0x38f   : > { %v6855_v11 = vadd.f32 %v2497_v9, %v9153_v61  ;;  %v2499_v12 = vpop.f32.mrb[111].mxu0  ;;  %2886 = vmatmul.mubr.bf16.gmra.mrb[104].mxu1 %v2626_v55  ;;  %v2586_v15 = vmax.f32 %v6853_v62, 0.0 }
 0x390   : > { %v6856_v14 = vadd.f32 %v2499_v12, %v9156_v40  ;;  %v2587_v19 = vmax.f32 %v6854_v1, 0.0 }
 0x391   : > { %v2588_v16 = vmax.f32 %v6855_v11, 0.0 }
 0x392   : > { %v2589_v45 = vmax.f32 %v6856_v14, 0.0 }
 0x393   : > { %v2628_v21 = vpack.c.bf16 %v2588_v16, %v2586_v15 }
 0x394   : > { %v2629_v25 = vpack.c.bf16 %v2589_v45, %v2587_v19  ;;  %v2503_v53 = vpop.f32.mrb[112].mxu0 }
 0x395   : > { %v6857_v58 = vadd.f32 %v2503_v53, %v9153_v61  ;;  %v2505_v33 = vpop.f32.mrb[113].mxu0 }
 0x396   : > { %v6858_v37 = vadd.f32 %v2505_v33, %v9156_v40  ;;  %v2507_v13 = vpop.f32.mrb[114].mxu0  ;;  %2893 = vmatprep.mubr.bf16.mxu1 %v2629_v25 }
 0x397   : > { %v6859_v18 = vadd.f32 %v2507_v13, %v9153_v61  ;;  %v2509_v54 = vpop.f32.mrb[115].mxu0  ;;  %2894 = vmatmul.mubr.bf16.gmra.mrb[108].mxu1 %v2628_v21  ;;  %v2590_v44 = vmax.f32 %v6857_v58, 0.0  ;;  %v9225_v58 = vld [vmem:[%s10045_s6] ss:$0 sm:$0xff] }
 0x398   : > { %v6860_v60 = vadd.f32 %v2509_v54, %v9156_v40  ;;  %v2591_v35 = vmax.f32 %v6858_v37, 0.0  ;;  %v7438_v54 = vld [vmem:[#allocation10 + $0x4] ss:$8 sps:$4 sm:$0xff]  }
 0x399   : > { %v2592_v29 = vmax.f32 %v6859_v18, 0.0  ;;  %3370 = vmatprep.subr.bf16.mxu1 %v7438_v54 }
 0x39a   : > { %v2593_v20 = vmax.f32 %v6860_v60, 0.0 }
 0x39b   : > { %v2630_v23 = vpack.c.bf16 %v2592_v29, %v2590_v44 }
 0x39c   : > { %v2631_v48 = vpack.c.bf16 %v2593_v20, %v2591_v35  ;;  %v2513_v52 = vpop.f32.mrb[116].mxu0 }
 0x39d   : > { %v6861_v17 = vadd.f32 %v2513_v52, %v9153_v61  ;;  %v2515_v6 = vpop.f32.mrb[117].mxu0 }
 0x39e   : > { %v6862_v22 = vadd.f32 %v2515_v6, %v9156_v40  ;;  %v2517_v24 = vpop.f32.mrb[118].mxu0  ;;  %2901 = vmatprep.mubr.bf16.mxu1 %v2631_v48 }
 0x39f   : > { %v6863_v50 = vadd.f32 %v2517_v24, %v9153_v61  ;;  %v2519_v26 = vpop.f32.mrb[119].mxu0  ;;  %2902 = vmatmul.mubr.bf16.gmra.mrb[112].mxu1 %v2630_v23  ;;  %v2594_v27 = vmax.f32 %v6861_v17, 0.0 }
 0x3a0   : > { %v6864_v7 = vadd.f32 %v2519_v26, %v9156_v40  ;;  %v2595_v30 = vmax.f32 %v6862_v22, 0.0 }
 0x3a1   : > { %v2596_v28 = vmax.f32 %v6863_v50, 0.0 }
 0x3a2   : > { %v2597_v32 = vmax.f32 %v6864_v7, 0.0 }
 0x3a3   : > { %v2632_v31 = vpack.c.bf16 %v2596_v28, %v2594_v27  ;;  %v7436_v27 = vld [vmem:[#allocation10] ss:$8 sps:$4 sm:$0xff]  }
 0x3a4   : > { %v2633_v34 = vpack.c.bf16 %v2597_v32, %v2595_v30  ;;  %v2523_v36 = vpop.f32.mrb[120].mxu0 }
 0x3a5   : > { %v6865_v38 = vadd.f32 %v2523_v36, %v9153_v61  ;;  %v2525_v41 = vpop.f32.mrb[121].mxu0 }
 0x3a6   : > { %v6866_v42 = vadd.f32 %v2525_v41, %v9156_v40  ;;  %v2527_v43 = vpop.f32.mrb[122].mxu0  ;;  %2909 = vmatprep.mubr.bf16.mxu1 %v2633_v34  ;;  %v7439_v41 = vld [vmem:[#allocation10 + $0x10] ss:$8 sps:$4 sm:$0xff]  }
 0x3a7   : > { %v6867_v46 = vadd.f32 %v2527_v43, %v9153_v61  ;;  %v2529_v47 = vpop.f32.mrb[123].mxu0  ;;  %2910 = vmatmul.mubr.bf16.gmra.mrb[116].mxu1 %v2632_v31  ;;  %v2598_v51 = vmax.f32 %v6865_v38, 0.0  ;;  %v7441_v31 = vld [vmem:[#allocation10 + $0x14] ss:$8 sps:$4 sm:$0xff]   ;;  %v7444_v43 = vld [vmem:[#allocation10 + $0x24] ss:$8 sps:$4 sm:$0xff]  }
 0x3a8   : > { %v6868_v49 = vadd.f32 %v2529_v47, %v9156_v40  ;;  %v2599_v4 = vmax.f32 %v6866_v42, 0.0 }
 0x3a9   : > { %v2600_v56 = vmax.f32 %v6867_v46, 0.0 }
 0x3aa   : > { %v2601_v57 = vmax.f32 %v6868_v49, 0.0 }
 0x3ab   : > { %v2634_v55 = vpack.c.bf16 %v2600_v56, %v2598_v51  ;;  %v7442_v56 = vld [vmem:[#allocation10 + $0x20] ss:$8 sps:$4 sm:$0xff]  }
 0x3ac   : > { %v2635_v59 = vpack.c.bf16 %v2601_v57, %v2599_v4  ;;  %v2533_v10 = vpop.f32.mrb[124].mxu0 }
 0x3ad   : > { %v6869_v62 = vadd.f32 %v2533_v10, %v9153_v61  ;;  %v2535_v0 = vpop.f32.mrb[125].mxu0 }
 0x3ae   : > { %v6870_v1 = vadd.f32 %v2535_v0, %v9156_v40  ;;  %v2537_v9 = vpop.f32.mrb[126].mxu0  ;;  %2917 = vmatprep.mubr.bf16.mxu1 %v2635_v59  ;;  %v7447_v59 = vld [vmem:[#allocation10 + $0x34] ss:$8 sps:$4 sm:$0xff]  }
 0x3af   : > { %v6871_v11 = vadd.f32 %v2537_v9, %v9153_v61  ;;  %v2539_v12 = vpop.f32.mrb[127].mxu0  ;;  %2918 = vmatmul.mubr.bf16.gmra.mrb[120].mxu1 %v2634_v55  ;;  %v2602_v15 = vmax.f32 %v6869_v62, 0.0 }
 0x3b0   : > { %v6872_v14 = vadd.f32 %v2539_v12, %v9156_v40  ;;  %v2603_v19 = vmax.f32 %v6870_v1, 0.0  ;;  %v7445_v1 = vld [vmem:[#allocation10 + $0x30] ss:$8 sps:$4 sm:$0xff]  }
 0x3b1   : > { %v2604_v16 = vmax.f32 %v6871_v11, 0.0  ;;  %v7450_v11 = vld [vmem:[#allocation10 + $0x44] ss:$8 sps:$4 sm:$0xff]  }
 0x3b2   : > { %v2605_v45 = vmax.f32 %v6872_v14, 0.0 }
 0x3b3   : > { %v2636_v21 = vpack.c.bf16 %v2604_v16, %v2602_v15 }
 0x3b4   : > { %v2637_v25 = vpack.c.bf16 %v2605_v45, %v2603_v19  ;;  %v7448_v19 = vld [vmem:[#allocation10 + $0x40] ss:$8 sps:$4 sm:$0xff]  }
 0x3b6   : > { %2925 = vmatprep.mubr.bf16.mxu1 %v2637_v25 }
 0x3b7   : > { %2926 = vmatmul.mubr.bf16.gmra.mrb[124].mxu1 %v2636_v21 }
 0x412   : > { %v6609_v53 = vpop.f32.mrb[64].mxu1 }
 0x413   : > { %v6610_v33 = vpop.f32.mrb[65].mxu1 }
 0x414   : > { %v6611_v61 = vadd.f32 %v6610_v33, %v6609_v53  ;;  %v6612_v37 = vpop.f32.mrb[66].mxu1  ;;  %v7453_v53 = vld [vmem:[#allocation10 + $0x54] ss:$8 sps:$4 sm:$0xff]  }
 0x415   : > { %v6613_v13 = vpop.f32.mrb[67].mxu1 }
 0x416   : > { %v2808_v40 = vadd.f32 %v6611_v61, %v9225_v58  ;;  %v6614_v18 = vadd.f32 %v6613_v13, %v6612_v37  ;;  %v7451_v13 = vld [vmem:[#allocation10 + $0x50] ss:$8 sps:$4 sm:$0xff]  }
 0x418   : > { %v2811_v60 = vadd.f32 %v6614_v18, %v9225_v58  ;;  %v2934_v44 = vmax.f32 %v2808_v40, 0.0  ;;  %v7456_v18 = vld [vmem:[#allocation10 + $0x64] ss:$8 sps:$4 sm:$0xff]  }
 0x41a   : > { %v6615_v39 = vpop.f32.mrb[68].mxu1  ;;  %v2935_v29 = vmax.f32 %v2811_v60, 0.0 }
 0x41b   : > { %v6616_v35 = vpop.f32.mrb[69].mxu1 }
 0x41c   : > { %v6617_v20 = vadd.f32 %v6616_v35, %v6615_v39  ;;  %v6618_v23 = vpop.f32.mrb[70].mxu1  ;;  %v2966_v48 = vpack.c.bf16 %v2935_v29, %v2934_v44  ;;  %v7454_v29 = vld [vmem:[#allocation10 + $0x60] ss:$8 sps:$4 sm:$0xff]  }
 0x41d   : > { %v6619_v52 = vpop.f32.mrb[71].mxu1 }
 0x41e   : > { %v2816_v17 = vadd.f32 %v6617_v20, %v9225_v58  ;;  %v6620_v6 = vadd.f32 %v6619_v52, %v6618_v23  ;;  %6745 = vmatprep.mubr.bf16.mxu1 %v2966_v48 }
 0x420   : > { %v2819_v22 = vadd.f32 %v6620_v6, %v9225_v58  ;;  %v2936_v24 = vmax.f32 %v2816_v17, 0.0 }
 0x422   : > { %v2937_v50 = vmax.f32 %v2819_v22, 0.0  ;;  %v6621_v26 = vpop.f32.mrb[72].mxu1 }
 0x423   : > { %v6622_v7 = vpop.f32.mrb[73].mxu1 }
 0x424   : > { %v2967_v28 = vpack.c.bf16 %v2937_v50, %v2936_v24  ;;  %v6623_v30 = vadd.f32 %v6622_v7, %v6621_v26  ;;  %v6624_v32 = vpop.f32.mrb[74].mxu1 }
 0x425   : > { %v6625_v34 = vpop.f32.mrb[75].mxu1 }
 0x426   : > { %v2824_v36 = vadd.f32 %v6623_v30, %v9225_v58  ;;  %v6626_v38 = vadd.f32 %v6625_v34, %v6624_v32  ;;  %6746 = vmatmul.mubr.bf16.vlgmr.msra.gmra.mrb[128].mxu1 %v2967_v28 }
 0x427   : > { %3371 = vmatpush1.bf16.msra.mxu1 %v7436_v27 }
 0x428   : > { %v2827_v42 = vadd.f32 %v6626_v38, %v9225_v58  ;;  %3372 = vmatprep.subr.bf16.mxu1 %v7441_v31  ;;  %v2938_v47 = vmax.f32 %v2824_v36, 0.0 }
 0x42a   : > { %v6627_v46 = vpop.f32.mrb[76].mxu1  ;;  %v2939_v49 = vmax.f32 %v2827_v42, 0.0 }
 0x42b   : > { %v6628_v51 = vpop.f32.mrb[77].mxu1  ;;  %3373 = vmatpush1.bf16.msra.mxu1 %v7439_v41 }
 0x42c   : > { %v6629_v4 = vadd.f32 %v6628_v51, %v6627_v46  ;;  %v6630_v57 = vpop.f32.mrb[78].mxu1  ;;  %v2968_v55 = vpack.c.bf16 %v2939_v49, %v2938_v47  ;;  %3374 = vmatprep.subr.bf16.mxu1 %v7444_v43 }
 0x42d   : > { %v6631_v10 = vpop.f32.mrb[79].mxu1 }
 0x42e   : > { %v2832_v62 = vadd.f32 %v6629_v4, %v9225_v58  ;;  %v6632_v0 = vadd.f32 %v6631_v10, %v6630_v57  ;;  %6749 = vmatprep.mubr.bf16.mxu1 %v2968_v55 }
 0x42f   : > { %3375 = vmatpush1.bf16.msra.mxu1 %v7442_v56 }
 0x430   : > { %v2835_v9 = vadd.f32 %v6632_v0, %v9225_v58  ;;  %3376 = vmatprep.subr.bf16.mxu1 %v7447_v59  ;;  %v2940_v14 = vmax.f32 %v2832_v62, 0.0 }
 0x432   : > { %v6633_v12 = vpop.f32.mrb[80].mxu1  ;;  %v2941_v15 = vmax.f32 %v2835_v9, 0.0 }
 0x433   : > { %v6634_v16 = vpop.f32.mrb[81].mxu1  ;;  %3377 = vmatpush1.bf16.msra.mxu1 %v7445_v1 }
 0x434   : > { %v6635_v45 = vadd.f32 %v6634_v16, %v6633_v12  ;;  %v6636_v21 = vpop.f32.mrb[82].mxu1  ;;  %v2969_v25 = vpack.c.bf16 %v2941_v15, %v2940_v14  ;;  %3378 = vmatprep.subr.bf16.mxu1 %v7450_v11 }
 0x435   : > { %v6637_v33 = vpop.f32.mrb[83].mxu1 }
 0x436   : > { %v2840_v61 = vadd.f32 %v6635_v45, %v9225_v58  ;;  %v6638_v37 = vadd.f32 %v6637_v33, %v6636_v21  ;;  %6750 = vmatmul.mubr.bf16.gmra.mrb[132].mxu1 %v2969_v25 }
 0x437   : > { %3379 = vmatpush1.bf16.msra.mxu1 %v7448_v19 }
 0x438   : > { %v2843_v40 = vadd.f32 %v6638_v37, %v9225_v58  ;;  %3380 = vmatprep.subr.bf16.mxu1 %v7453_v53  ;;  %v2942_v54 = vmax.f32 %v2840_v61, 0.0 }
 0x43a   : > { %v2943_v60 = vmax.f32 %v2843_v40, 0.0  ;;  %v6639_v39 = vpop.f32.mrb[84].mxu1 }
 0x43b   : > { %v6640_v44 = vpop.f32.mrb[85].mxu1  ;;  %3381 = vmatpush1.bf16.msra.mxu1 %v7451_v13 }
 0x43c   : > { %v6641_v35 = vadd.f32 %v6640_v44, %v6639_v39  ;;  %v6642_v20 = vpop.f32.mrb[86].mxu1  ;;  %v2970_v23 = vpack.c.bf16 %v2943_v60, %v2942_v54  ;;  %3382 = vmatprep.subr.bf16.mxu1 %v7456_v18 }
 0x43d   : > { %v6643_v48 = vpop.f32.mrb[87].mxu1 }
 0x43e   : > { %v2848_v52 = vadd.f32 %v6641_v35, %v9225_v58  ;;  %v6644_v17 = vadd.f32 %v6643_v48, %v6642_v20  ;;  %6753 = vmatprep.mubr.bf16.mxu1 %v2970_v23 }
 0x43f   : > { %3383 = vmatpush1.bf16.msra.mxu1 %v7454_v29 }
 0x440   : > { %v2851_v6 = vadd.f32 %v6644_v17, %v9225_v58  ;;  %v2944_v22 = vmax.f32 %v2848_v52, 0.0 }
 0x442   : > { %v2945_v24 = vmax.f32 %v2851_v6, 0.0  ;;  %v6645_v50 = vpop.f32.mrb[88].mxu1 }
 0x443   : > { %v6646_v26 = vpop.f32.mrb[89].mxu1 }
 0x444   : > { %v6647_v7 = vadd.f32 %v6646_v26, %v6645_v50  ;;  %v6648_v27 = vpop.f32.mrb[90].mxu1  ;;  %v2971_v28 = vpack.c.bf16 %v2945_v24, %v2944_v22 }
 0x445   : > { %v6649_v30 = vpop.f32.mrb[91].mxu1 }
 0x446   : > { %v2856_v32 = vadd.f32 %v6647_v7, %v9225_v58  ;;  %v6650_v31 = vadd.f32 %v6649_v30, %v6648_v27  ;;  %6754 = vmatmul.mubr.bf16.gmra.mrb[136].mxu1 %v2971_v28 }
 0x448   : > { %v2859_v34 = vadd.f32 %v6650_v31, %v9225_v58  ;;  %v2946_v36 = vmax.f32 %v2856_v32, 0.0 }
 0x44a   : > { %v2947_v38 = vmax.f32 %v2859_v34, 0.0  ;;  %v6651_v41 = vpop.f32.mrb[92].mxu1 }
 0x44b   : > { %v6652_v42 = vpop.f32.mrb[93].mxu1 }
 0x44c   : > { %v6653_v43 = vadd.f32 %v6652_v42, %v6651_v41  ;;  %v6654_v46 = vpop.f32.mrb[94].mxu1  ;;  %v2972_v47 = vpack.c.bf16 %v2947_v38, %v2946_v36 }
 0x44d   : > { %v6655_v49 = vpop.f32.mrb[95].mxu1 }
 0x44e   : > { %v2864_v51 = vadd.f32 %v6653_v43, %v9225_v58  ;;  %v6656_v56 = vadd.f32 %v6655_v49, %v6654_v46  ;;  %6757 = vmatprep.mubr.bf16.mxu1 %v2972_v47 }
 0x450   : > { %v2867_v4 = vadd.f32 %v6656_v56, %v9225_v58  ;;  %v2948_v57 = vmax.f32 %v2864_v51, 0.0 }
 0x452   : > { %v2949_v55 = vmax.f32 %v2867_v4, 0.0  ;;  %v6657_v59 = vpop.f32.mrb[96].mxu1 }
 0x453   : > { %v6658_v10 = vpop.f32.mrb[97].mxu1 }
 0x454   : > { %v6659_v62 = vadd.f32 %v6658_v10, %v6657_v59  ;;  %v6660_v0 = vpop.f32.mrb[98].mxu1  ;;  %v2973_v1 = vpack.c.bf16 %v2949_v55, %v2948_v57 }
 0x455   : > { %v6661_v9 = vpop.f32.mrb[99].mxu1 }
 0x456   : > { %v2872_v11 = vadd.f32 %v6659_v62, %v9225_v58  ;;  %v6662_v12 = vadd.f32 %v6661_v9, %v6660_v0  ;;  %6758 = vmatmul.mubr.bf16.gmra.mrb[140].mxu1 %v2973_v1  ;;  %v7457_v0 = vld [vmem:[#allocation10 + $0x70] ss:$8 sps:$4 sm:$0xff]   ;;  %v7459_v1 = vld [vmem:[#allocation10 + $0x74] ss:$8 sps:$4 sm:$0xff]  }
 0x457   : > { %3384 = vmatprep.subr.bf16.mxu1 %v7459_v1 }
 0x458   : > { %v2875_v14 = vadd.f32 %v6662_v12, %v9225_v58  ;;  %v2950_v15 = vmax.f32 %v2872_v11, 0.0  ;;  %3385 = vmatpush1.bf16.msra.mxu1 %v7457_v0  ;;  %v7475_v0 = vld [vmem:[%s10050_s11 + $0x8] ss:$16 sps:$4 sm:$0xff]  }
 0x45a   : > { %v2951_v16 = vmax.f32 %v2875_v14, 0.0  ;;  %v6663_v19 = vpop.f32.mrb[100].mxu1 }
 0x45b   : > { %v6664_v45 = vpop.f32.mrb[101].mxu1 }
 0x45c   : > { %v6665_v21 = vadd.f32 %v6664_v45, %v6663_v19  ;;  %v6666_v25 = vpop.f32.mrb[102].mxu1  ;;  %v2974_v53 = vpack.c.bf16 %v2951_v16, %v2950_v15 }
 0x45d   : > { %v6667_v33 = vpop.f32.mrb[103].mxu1 }
 0x45e   : > { %v2880_v61 = vadd.f32 %v6665_v21, %v9225_v58  ;;  %v6668_v37 = vadd.f32 %v6667_v33, %v6666_v25  ;;  %6761 = vmatprep.mubr.bf16.mxu1 %v2974_v53 }
 0x460   : > { %v2883_v13 = vadd.f32 %v6668_v37, %v9225_v58  ;;  %v2952_v40 = vmax.f32 %v2880_v61, 0.0 }
 0x462   : > { %v2953_v18 = vmax.f32 %v2883_v13, 0.0  ;;  %v6669_v54 = vpop.f32.mrb[104].mxu1 }
 0x463   : > { %v6670_v60 = vpop.f32.mrb[105].mxu1 }
 0x464   : > { %v6671_v39 = vadd.f32 %v6670_v60, %v6669_v54  ;;  %v6672_v44 = vpop.f32.mrb[106].mxu1  ;;  %v2975_v29 = vpack.c.bf16 %v2953_v18, %v2952_v40 }
 0x465   : > { %v6673_v35 = vpop.f32.mrb[107].mxu1 }
 0x466   : > { %v2888_v20 = vadd.f32 %v6671_v39, %v9225_v58  ;;  %v6674_v23 = vadd.f32 %v6673_v35, %v6672_v44  ;;  %6762 = vmatmul.mubr.bf16.gmra.mrb[144].mxu1 %v2975_v29 }
 0x468   : > { %v2891_v48 = vadd.f32 %v6674_v23, %v9225_v58  ;;  %v2954_v52 = vmax.f32 %v2888_v20, 0.0 }
 0x46a   : > { %v2955_v17 = vmax.f32 %v2891_v48, 0.0  ;;  %v6675_v6 = vpop.f32.mrb[108].mxu1 }
 0x46b   : > { %v6676_v22 = vpop.f32.mrb[109].mxu1 }
 0x46c   : > { %v6677_v24 = vadd.f32 %v6676_v22, %v6675_v6  ;;  %v6678_v50 = vpop.f32.mrb[110].mxu1  ;;  %v2976_v26 = vpack.c.bf16 %v2955_v17, %v2954_v52  ;;  %v8166_v6 = vmov 0   ;;  %v7460_v22 = vld [vmem:[%s10050_s11] ss:$16 sps:$4 sm:$0xff]  }
 0x46d   : > { %v6679_v7 = vpop.f32.mrb[111].mxu1 }
 0x46e   : > { %v2896_v27 = vadd.f32 %v6677_v24, %v9225_v58  ;;  %v6680_v28 = vadd.f32 %v6679_v7, %v6678_v50  ;;  %6765 = vmatprep.mubr.bf16.mxu1 %v2976_v26  ;;  %v7462_v24 = vld [vmem:[%s10050_s11 + $0x4] ss:$16 sps:$4 sm:$0xff]   ;;  %v7463_v50 = vld [vmem:[%s10050_s11 + $0x20] ss:$16 sps:$4 sm:$0xff]  }
 0x46f   : > { %4065 = vmatprep.subr.bf16.mxu0 %v7462_v24  ;;  %v7466_v26 = vld [vmem:[%s10050_s11 + $0x40] ss:$16 sps:$4 sm:$0xff]   ;;  %v7468_v7 = vld [vmem:[%s10050_s11 + $0x44] ss:$16 sps:$4 sm:$0xff]  }
 0x470   : > { %v2899_v30 = vadd.f32 %v6680_v28, %v9225_v58  ;;  %v2956_v32 = vmax.f32 %v2896_v27, 0.0  ;;  %4066 = vmatpush1.bf16.msra.mxu0 %v7460_v22  ;;  %v7471_v27 = vld [vmem:[%s10050_s11 + $0x64] ss:$16 sps:$4 sm:$0xff]   ;;  %v7469_v28 = vld [vmem:[%s10050_s11 + $0x60] ss:$16 sps:$4 sm:$0xff]  }
 0x471   : > { %v7499_v22 = vld [vmem:[%s10050_s11 + $0x88] ss:$16 sps:$4 sm:$0xff]  }
 0x472   : > { %v2957_v31 = vmax.f32 %v2899_v30, 0.0  ;;  %v6681_v34 = vpop.f32.mrb[112].mxu1  ;;  %v9287_v30 = vld [vmem:[%s10047_s8] ss:$0 sm:$0xff] }
 0x473   : > { %v6682_v36 = vpop.f32.mrb[113].mxu1 }
 0x474   : > { %v6683_v38 = vadd.f32 %v6682_v36, %v6681_v34  ;;  %v6684_v41 = vpop.f32.mrb[114].mxu1  ;;  %v2977_v42 = vpack.c.bf16 %v2957_v31, %v2956_v32 }
 0x475   : > { %v6685_v43 = vpop.f32.mrb[115].mxu1 }
 0x476   : > { %v2904_v46 = vadd.f32 %v6683_v38, %v9225_v58  ;;  %v6686_v47 = vadd.f32 %v6685_v43, %v6684_v41  ;;  %6766 = vmatmul.mubr.bf16.gmra.mrb[148].mxu1 %v2977_v42  ;;  %v7472_v41 = vld [vmem:[%s10050_s11 + $0x80] ss:$16 sps:$4 sm:$0xff]   ;;  %v7474_v42 = vld [vmem:[%s10050_s11 + $0x84] ss:$16 sps:$4 sm:$0xff]  }
 0x478   : > { %v2907_v49 = vadd.f32 %v6686_v47, %v9225_v58  ;;  %v2958_v51 = vmax.f32 %v2904_v46, 0.0  ;;  %v7477_v47 = vld [vmem:[%s10050_s11 + $0xc] ss:$16 sps:$4 sm:$0xff]  }
 0x479   : > { %4258 = vmatprep.subr.bf16.mxu1 %v7477_v47  ;;  %v7531_v47 = vld [vmem:[%s10050_s11 + $0x1a4] ss:$16 sps:$4 sm:$0xff]  }
 0x47a   : > { %v2959_v56 = vmax.f32 %v2907_v49, 0.0  ;;  %v6687_v4 = vpop.f32.mrb[116].mxu1 }
 0x47b   : > { %v6688_v57 = vpop.f32.mrb[117].mxu1 }
 0x47c   : > { %v6689_v55 = vadd.f32 %v6688_v57, %v6687_v4  ;;  %v6690_v59 = vpop.f32.mrb[118].mxu1  ;;  %v2978_v10 = vpack.c.bf16 %v2959_v56, %v2958_v51  ;;  %v7480_v51 = vld [vmem:[%s10050_s11 + $0xa4] ss:$16 sps:$4 sm:$0xff]   ;;  %v7478_v57 = vld [vmem:[%s10050_s11 + $0xa0] ss:$16 sps:$4 sm:$0xff]  }
 0x47d   : > { %v6691_v62 = vpop.f32.mrb[119].mxu1 }
 0x47e   : > { %v2912_v9 = vadd.f32 %v6689_v55, %v9225_v58  ;;  %v6692_v11 = vadd.f32 %v6691_v62, %v6690_v59  ;;  %6769 = vmatprep.mubr.bf16.mxu1 %v2978_v10  ;;  %v7486_v10 = vld [vmem:[%s10050_s11 + $0xc4] ss:$16 sps:$4 sm:$0xff]  }
 0x480   : > { %v2915_v12 = vadd.f32 %v6692_v11, %v9225_v58  ;;  %v2960_v14 = vmax.f32 %v2912_v9, 0.0  ;;  %v7483_v9 = vld [vmem:[%s10050_s11 + $0x2c] ss:$16 sps:$4 sm:$0xff]   ;;  %v7484_v11 = vld [vmem:[%s10050_s11 + $0xc0] ss:$16 sps:$4 sm:$0xff]  }
 0x482   : > { %v2961_v15 = vmax.f32 %v2915_v12, 0.0  ;;  %v6693_v16 = vpop.f32.mrb[120].mxu1  ;;  %v7492_v12 = vld [vmem:[%s10050_s11 + $0xe4] ss:$16 sps:$4 sm:$0xff]  }
 0x483   : > { %v6694_v19 = vpop.f32.mrb[121].mxu1 }
 0x484   : > { %v6695_v45 = vadd.f32 %v6694_v19, %v6693_v16  ;;  %v6696_v21 = vpop.f32.mrb[122].mxu1  ;;  %v2979_v25 = vpack.c.bf16 %v2961_v15, %v2960_v14  ;;  %v7481_v14 = vld [vmem:[%s10050_s11 + $0x28] ss:$16 sps:$4 sm:$0xff]   ;;  %v7489_v15 = vld [vmem:[%s10050_s11 + $0x4c] ss:$16 sps:$4 sm:$0xff]  }
 0x485   : > { %v6697_v53 = vpop.f32.mrb[123].mxu1  ;;  %v7490_v16 = vld [vmem:[%s10050_s11 + $0xe0] ss:$16 sps:$4 sm:$0xff]   ;;  %v7498_v19 = vld [vmem:[%s10050_s11 + $0x104] ss:$16 sps:$4 sm:$0xff]  }
 0x486   : > { %v2920_v33 = vadd.f32 %v6695_v45, %v9225_v58  ;;  %v6698_v61 = vadd.f32 %v6697_v53, %v6696_v21  ;;  %6770 = vmatmul.mubr.bf16.gmra.mrb[152].mxu1 %v2979_v25  ;;  %v7487_v45 = vld [vmem:[%s10050_s11 + $0x48] ss:$16 sps:$4 sm:$0xff]   ;;  %v7495_v25 = vld [vmem:[%s10050_s11 + $0x6c] ss:$16 sps:$4 sm:$0xff]  }
 0x488   : > { %v2923_v37 = vadd.f32 %v6698_v61, %v9225_v58  ;;  %v2962_v13 = vmax.f32 %v2920_v33, 0.0  ;;  %v7496_v61 = vld [vmem:[%s10050_s11 + $0x100] ss:$16 sps:$4 sm:$0xff]  }
 0x48a   : > { %v2963_v40 = vmax.f32 %v2923_v37, 0.0  ;;  %v6699_v18 = vpop.f32.mrb[124].mxu1 }
 0x48b   : > { %v6700_v54 = vpop.f32.mrb[125].mxu1 }
 0x48c   : > { %v6701_v60 = vadd.f32 %v6700_v54, %v6699_v18  ;;  %v6702_v39 = vpop.f32.mrb[126].mxu1  ;;  %v2980_v44 = vpack.c.bf16 %v2963_v40, %v2962_v13  ;;  %v7504_v40 = vld [vmem:[%s10050_s11 + $0x124] ss:$16 sps:$4 sm:$0xff]  }
 0x48d   : > { %v6703_v29 = vpop.f32.mrb[127].mxu1 }
 0x48e   : > { %v2928_v35 = vadd.f32 %v6701_v60, %v9225_v58  ;;  %v6704_v20 = vadd.f32 %v6703_v29, %v6702_v39  ;;  %6773 = vmatprep.mubr.bf16.mxu1 %v2980_v44  ;;  %v7493_v60 = vld [vmem:[%s10050_s11 + $0x68] ss:$16 sps:$4 sm:$0xff]   ;;  %v7501_v44 = vld [vmem:[%s10050_s11 + $0x8c] ss:$16 sps:$4 sm:$0xff]  }
 0x490   : > { %v2931_v23 = vadd.f32 %v6704_v20, %v9225_v58  ;;  %v2964_v48 = vmax.f32 %v2928_v35, 0.0  ;;  %v7465_v58 = vld [vmem:[%s10050_s11 + $0x24] ss:$16 sps:$4 sm:$0xff]   ;;  %v7502_v20 = vld [vmem:[%s10050_s11 + $0x120] ss:$16 sps:$4 sm:$0xff]  }
 0x491   : > { %4067 = vmatprep.subr.bf16.mxu0 %v7465_v58  ;;  %v7507_v58 = vld [vmem:[%s10050_s11 + $0xac] ss:$16 sps:$4 sm:$0xff]  }
 0x492   : > { %v2965_v52 = vmax.f32 %v2931_v23, 0.0  ;;  %4068 = vmatpush1.bf16.msra.mxu0 %v7463_v50  ;;  %v7508_v50 = vld [vmem:[%s10050_s11 + $0x140] ss:$16 sps:$4 sm:$0xff]  }
 0x493   : > { %4069 = vmatprep.subr.bf16.mxu0 %v7468_v7  ;;  %v7505_v7 = vld [vmem:[%s10050_s11 + $0xa8] ss:$16 sps:$4 sm:$0xff]  }
 0x494   : > { %v2981_v17 = vpack.c.bf16 %v2965_v52, %v2964_v48  ;;  %v7510_v52 = vld [vmem:[%s10050_s11 + $0x144] ss:$16 sps:$4 sm:$0xff]  }
 0x496   : > { %6774 = vmatmul.mubr.bf16.gmra.mrb[156].mxu1 %v2981_v17  ;;  %4070 = vmatpush1.bf16.msra.mxu0 %v7466_v26  ;;  %v7516_v26 = vld [vmem:[%s10050_s11 + $0x164] ss:$16 sps:$4 sm:$0xff]  }
 0x497   : > { %3402 = vmatprep.mubr.bf16.mxu1 %v8166_v6  ;;  %4071 = vmatprep.subr.bf16.mxu0 %v7471_v27  ;;  %v7513_v27 = vld [vmem:[%s10050_s11 + $0xcc] ss:$16 sps:$4 sm:$0xff]  }
 0x49a   : > { %4072 = vmatpush1.bf16.msra.mxu0 %v7469_v28  ;;  %v7514_v28 = vld [vmem:[%s10050_s11 + $0x160] ss:$16 sps:$4 sm:$0xff]  }
 0x49b   : > { %4073 = vmatprep.subr.bf16.mxu0 %v7474_v42  ;;  %v7520_v42 = vld [vmem:[%s10050_s11 + $0x180] ss:$16 sps:$4 sm:$0xff]  }
 0x49e   : > { %4074 = vmatpush1.bf16.msra.mxu0 %v7472_v41 }
 0x49f   : > { %4075 = vmatprep.subr.bf16.mxu0 %v7480_v51 }
 0x4a2   : > { %4076 = vmatpush1.bf16.msra.mxu0 %v7478_v57  ;;  %v7525_v57 = vld [vmem:[%s10050_s11 + $0x10c] ss:$16 sps:$4 sm:$0xff]  }
 0x4a3   : > { %4077 = vmatprep.subr.bf16.mxu0 %v7486_v10  ;;  %v7529_v10 = vld [vmem:[%s10050_s11 + $0x1a0] ss:$16 sps:$4 sm:$0xff]  }
 0x4a6   : > { %4078 = vmatpush1.bf16.msra.mxu0 %v7484_v11  ;;  %v7523_v11 = vld [vmem:[%s10050_s11 + $0x108] ss:$16 sps:$4 sm:$0xff]  }
 0x4a7   : > { %4079 = vmatprep.subr.bf16.mxu0 %v7492_v12 }
 0x4aa   : > { %4080 = vmatpush1.bf16.msra.mxu0 %v7490_v16  ;;  %v7526_v16 = vld [vmem:[%s10050_s11 + $0x128] ss:$16 sps:$4 sm:$0xff]  }
 0x4ab   : > { %4081 = vmatprep.subr.bf16.mxu0 %v7498_v19  ;;  %v7534_v19 = vld [vmem:[%s10050_s11 + $0x14c] ss:$16 sps:$4 sm:$0xff]  }
 0x4ae   : > { %4082 = vmatpush1.bf16.msra.mxu0 %v7496_v61 }
 0x4af   : > { %4083 = vmatprep.subr.bf16.mxu0 %v7504_v40 }
 0x4b2   : > { %4084 = vmatpush1.bf16.msra.mxu0 %v7502_v20 }
 0x4b3   : > { %4085 = vmatprep.subr.bf16.mxu0 %v7510_v52  ;;  %v7546_v52 = vld [vmem:[%s10050_s11 + $0x1ac] ss:$16 sps:$4 sm:$0xff]  }
 0x4b6   : > { %4086 = vmatpush1.bf16.msra.mxu0 %v7508_v50 }
 0x4b7   : > { %4087 = vmatprep.subr.bf16.mxu0 %v7516_v26 }
 0x4ba   : > { %4088 = vmatpush1.bf16.msra.mxu0 %v7514_v28 }
 0x4f9   : > { %v6747_v32 = vpop.f32.mrb[128].mxu1 }
 0x4fa   : > { %v3096_v31 = vadd.f32 %v6747_v32, %v9287_v30  ;;  %v3087_v34 = vpop.f32.mrb[129].mxu1  ;;  %v7522_v32 = vld [vmem:[%s10050_s11 + $0x184] ss:$16 sps:$4 sm:$0xff]  }
 0x4fb   : > { %v3088_v36 = vadd.f32 %v9287_v30, %v3087_v34  ;;  %v6748_v38 = vpop.f32.mrb[130].mxu1  ;;  %4089 = vmatprep.subr.bf16.mxu0 %v7522_v32 }
 0x4fc   : > { %v3099_v43 = vadd.f32 %v6748_v38, %v9287_v30  ;;  %v3090_v46 = vpop.f32.mrb[131].mxu1  ;;  %v3216_v56 = vmax.f32 %v3096_v31, 0.0  ;;  %v7511_v31 = vld [vmem:[%s10050_s11 + $0xc8] ss:$16 sps:$4 sm:$0xff]   ;;  %4090 = vmatpush1.bf16.msra.mxu0 %v7520_v42 }
 0x4fd   : > { %v3091_v49 = vadd.f32 %v9287_v30, %v3090_v46  ;;  %v3214_v55 = vmax.f32 %v3088_v36, 0.0  ;;  %v7519_v36 = vld [vmem:[%s10050_s11 + $0xec] ss:$16 sps:$4 sm:$0xff]   ;;  %4091 = vmatprep.subr.bf16.mxu0 %v7531_v47 }
 0x4fe   : > { %v3217_v4 = vmax.f32 %v3099_v43, 0.0 }
 0x4ff   : > { %v3215_v59 = vmax.f32 %v3091_v49, 0.0 }
 0x500   : > { %v3247_v62 = vpack.c.bf16 %v3217_v4, %v3216_v56  ;;  %v7517_v56 = vld [vmem:[%s10050_s11 + $0xe8] ss:$16 sps:$4 sm:$0xff]   ;;  %4092 = vmatpush1.bf16.msra.mxu0 %v7529_v10 }
 0x501   : > { %v3246_v1 = vpack.c.bf16 %v3215_v59, %v3214_v55 }
 0x503   : > { %3403 = vmatmul.mubr.bf16.vlgmr.msra.gmra.mrb[160].mxu1 %v3246_v1  ;;  %v7540_v1 = vld [vmem:[%s10050_s11 + $0x1c4] ss:$16 sps:$4 sm:$0xff]  }
 0x504   : > { %3412 = vmatprep.mubr.bf16.mxu1 %v8166_v6  ;;  %4259 = vmatpush1.bf16.msra.mxu1 %v7475_v0 }
 0x505   : > { %4260 = vmatprep.subr.bf16.mxu1 %v7483_v9  ;;  %4093 = vmatprep.subr.bf16.mxu0 %v7540_v1  ;;  %v7552_v1 = vld [vmem:[%s10050_s11 + $0x1cc] ss:$16 sps:$4 sm:$0xff]  }
 0x508   : > { %4261 = vmatpush1.bf16.msra.mxu1 %v7481_v14  ;;  %v7528_v14 = vld [vmem:[%s10050_s11 + $0x12c] ss:$16 sps:$4 sm:$0xff]  }
 0x509   : > { %v6751_v21 = vpop.f32.mrb[132].mxu1  ;;  %4262 = vmatprep.subr.bf16.mxu1 %v7489_v15  ;;  %v7538_v15 = vld [vmem:[%s10050_s11 + $0x1c0] ss:$16 sps:$4 sm:$0xff]  }
 0x50a   : > { %v3112_v53 = vadd.f32 %v6751_v21, %v9287_v30  ;;  %v3103_v33 = vpop.f32.mrb[133].mxu1  ;;  %4094 = vmatpush1.bf16.msra.mxu0 %v7538_v15 }
 0x50b   : > { %v3104_v37 = vadd.f32 %v9287_v30, %v3103_v33  ;;  %v6752_v13 = vpop.f32.mrb[134].mxu1  ;;  %3413 = vmatmul.mubr.bf16.gmra.mrb[164].mxu1 %v3247_v62 }
 0x50c   : > { %v3115_v18 = vadd.f32 %v6752_v13, %v9287_v30  ;;  %v3106_v54 = vpop.f32.mrb[135].mxu1  ;;  %3422 = vmatprep.mubr.bf16.mxu1 %v8166_v6  ;;  %4263 = vmatpush1.bf16.msra.mxu1 %v7487_v45  ;;  %v3220_v29 = vmax.f32 %v3112_v53, 0.0  ;;  %v7532_v45 = vld [vmem:[%s10050_s11 + $0x148] ss:$16 sps:$4 sm:$0xff]  }
 0x50d   : > { %v3107_v39 = vadd.f32 %v9287_v30, %v3106_v54  ;;  %4264 = vmatprep.subr.bf16.mxu1 %v7495_v25  ;;  %v3218_v23 = vmax.f32 %v3104_v37, 0.0  ;;  %v7537_v25 = vld [vmem:[%s10050_s11 + $0x16c] ss:$16 sps:$4 sm:$0xff]  }
 0x50e   : > { %v3221_v35 = vmax.f32 %v3115_v18, 0.0  ;;  %v7535_v18 = vld [vmem:[%s10050_s11 + $0x168] ss:$16 sps:$4 sm:$0xff]  }
 0x50f   : > { %v3219_v48 = vmax.f32 %v3107_v39, 0.0 }
 0x510   : > { %v3249_v17 = vpack.c.bf16 %v3221_v35, %v3220_v29  ;;  %4265 = vmatpush1.bf16.msra.mxu1 %v7493_v60  ;;  %v7543_v60 = vld [vmem:[%s10050_s11 + $0x18c] ss:$16 sps:$4 sm:$0xff]  }
 0x511   : > { %v3248_v24 = vpack.c.bf16 %v3219_v48, %v3218_v23  ;;  %4266 = vmatprep.subr.bf16.mxu1 %v7501_v44  ;;  %v7541_v23 = vld [vmem:[%s10050_s11 + $0x188] ss:$16 sps:$4 sm:$0xff]  }
 0x513   : > { %3423 = vmatmul.mubr.bf16.gmra.mrb[168].mxu1 %v3248_v24 }
 0x514   : > { %3432 = vmatprep.mubr.bf16.mxu1 %v8166_v6  ;;  %4267 = vmatpush1.bf16.msra.mxu1 %v7499_v22 }
 0x515   : > { %4268 = vmatprep.subr.bf16.mxu1 %v7507_v58 }
 0x518   : > { %4269 = vmatpush1.bf16.msra.mxu1 %v7505_v7 }
 0x519   : > { %v6755_v34 = vpop.f32.mrb[136].mxu1  ;;  %4270 = vmatprep.subr.bf16.mxu1 %v7513_v27 }
 0x51a   : > { %v3128_v38 = vadd.f32 %v6755_v34, %v9287_v30  ;;  %v3119_v41 = vpop.f32.mrb[137].mxu1 }
 0x51b   : > { %v3120_v43 = vadd.f32 %v9287_v30, %v3119_v41  ;;  %v6756_v46 = vpop.f32.mrb[138].mxu1  ;;  %3433 = vmatmul.mubr.bf16.gmra.mrb[172].mxu1 %v3249_v17  ;;  %v7544_v17 = vld [vmem:[%s10050_s11 + $0x1a8] ss:$16 sps:$4 sm:$0xff]  }
 0x51c   : > { %v3131_v49 = vadd.f32 %v6756_v46, %v9287_v30  ;;  %v3122_v51 = vpop.f32.mrb[139].mxu1  ;;  %3442 = vmatprep.mubr.bf16.mxu1 %v8166_v6  ;;  %4271 = vmatpush1.bf16.msra.mxu1 %v7511_v31  ;;  %v3224_v55 = vmax.f32 %v3128_v38, 0.0 }
 0x51d   : > { %v3123_v4 = vadd.f32 %v9287_v30, %v3122_v51  ;;  %4272 = vmatprep.subr.bf16.mxu1 %v7519_v36  ;;  %v3222_v62 = vmax.f32 %v3120_v43, 0.0 }
 0x51e   : > { %v3225_v59 = vmax.f32 %v3131_v49, 0.0 }
 0x51f   : > { %v3223_v0 = vmax.f32 %v3123_v4, 0.0 }
 0x520   : > { %v3251_v9 = vpack.c.bf16 %v3225_v59, %v3224_v55  ;;  %4273 = vmatpush1.bf16.msra.mxu1 %v7517_v56 }
 0x521   : > { %v3250_v12 = vpack.c.bf16 %v3223_v0, %v3222_v62  ;;  %4274 = vmatprep.subr.bf16.mxu1 %v7525_v57 }
 0x523   : > { %3443 = vmatmul.mubr.bf16.gmra.mrb[176].mxu1 %v3250_v12 }
 0x524   : > { %3452 = vmatprep.mubr.bf16.mxu1 %v8166_v6  ;;  %4275 = vmatpush1.bf16.msra.mxu1 %v7523_v11 }
 0x525   : > { %4276 = vmatprep.subr.bf16.mxu1 %v7528_v14 }
 0x528   : > { %4277 = vmatpush1.bf16.msra.mxu1 %v7526_v16 }
 0x529   : > { %v6759_v21 = vpop.f32.mrb[140].mxu1  ;;  %4278 = vmatprep.subr.bf16.mxu1 %v7534_v19  ;;  %v7549_v19 = vld [vmem:[%s10050_s11 + $0x1e4] ss:$16 sps:$4 sm:$0xff]  }
 0x52a   : > { %v3144_v53 = vadd.f32 %v6759_v21, %v9287_v30  ;;  %v3135_v33 = vpop.f32.mrb[141].mxu1  ;;  %4095 = vmatprep.subr.bf16.mxu0 %v7549_v19 }
 0x52b   : > { %v3136_v61 = vadd.f32 %v9287_v30, %v3135_v33  ;;  %v6760_v37 = vpop.f32.mrb[142].mxu1  ;;  %3453 = vmatmul.mubr.bf16.gmra.mrb[180].mxu1 %v3251_v9  ;;  %v7550_v9 = vld [vmem:[%s10050_s11 + $0x1c8] ss:$16 sps:$4 sm:$0xff]  }
 0x52c   : > { %v3147_v13 = vadd.f32 %v6760_v37, %v9287_v30  ;;  %v3138_v40 = vpop.f32.mrb[143].mxu1  ;;  %3462 = vmatprep.mubr.bf16.mxu1 %v8166_v6  ;;  %4279 = vmatpush1.bf16.msra.mxu1 %v7532_v45  ;;  %v3228_v39 = vmax.f32 %v3144_v53, 0.0  ;;  %v7555_v45 = vld [vmem:[%s10050_s11 + $0x1ec] ss:$16 sps:$4 sm:$0xff]   ;;  %v7547_v53 = vld [vmem:[%s10050_s11 + $0x1e0] ss:$16 sps:$4 sm:$0xff]  }
 0x52d   : > { %v3139_v54 = vadd.f32 %v9287_v30, %v3138_v40  ;;  %4280 = vmatprep.subr.bf16.mxu1 %v7537_v25  ;;  %v3226_v29 = vmax.f32 %v3136_v61, 0.0  ;;  %v7553_v33 = vld [vmem:[%s10050_s11 + $0x1e8] ss:$16 sps:$4 sm:$0xff]   ;;  %4096 = vmatpush1.bf16.msra.mxu0 %v7547_v53 }
 0x52e   : > { %v3229_v44 = vmax.f32 %v3147_v13, 0.0 }
 0x52f   : > { %v3227_v35 = vmax.f32 %v3139_v54, 0.0 }
 0x530   : > { %v3253_v20 = vpack.c.bf16 %v3229_v44, %v3228_v39  ;;  %4281 = vmatpush1.bf16.msra.mxu1 %v7535_v18 }
 0x531   : > { %v3252_v48 = vpack.c.bf16 %v3227_v35, %v3226_v29  ;;  %4282 = vmatprep.subr.bf16.mxu1 %v7543_v60 }
 0x533   : > { %3463 = vmatmul.mubr.bf16.gmra.mrb[184].mxu1 %v3252_v48 }
 0x534   : > { %3472 = vmatprep.mubr.bf16.mxu1 %v8166_v6  ;;  %4283 = vmatpush1.bf16.msra.mxu1 %v7541_v23 }
 0x535   : > { %4284 = vmatprep.subr.bf16.mxu1 %v7546_v52 }
 0x538   : > { %4285 = vmatpush1.bf16.msra.mxu1 %v7544_v17 }
 0x539   : > { %v6763_v22 = vpop.f32.mrb[144].mxu1  ;;  %4286 = vmatprep.subr.bf16.mxu1 %v7552_v1 }
 0x53a   : > { %v3160_v24 = vadd.f32 %v6763_v22, %v9287_v30  ;;  %v3151_v58 = vpop.f32.mrb[145].mxu1 }
 0x53b   : > { %v3152_v50 = vadd.f32 %v9287_v30, %v3151_v58  ;;  %v6764_v26 = vpop.f32.mrb[146].mxu1  ;;  %3473 = vmatmul.mubr.bf16.gmra.mrb[188].mxu1 %v3253_v20 }
 0x53c   : > { %v3163_v7 = vadd.f32 %v6764_v26, %v9287_v30  ;;  %v3154_v27 = vpop.f32.mrb[147].mxu1  ;;  %3482 = vmatprep.mubr.bf16.mxu1 %v8166_v6  ;;  %v3232_v32 = vmax.f32 %v3160_v24, 0.0  ;;  %4287 = vmatpush1.bf16.msra.mxu1 %v7550_v9 }
 0x53d   : > { %v3155_v28 = vadd.f32 %v9287_v30, %v3154_v27  ;;  %v3230_v34 = vmax.f32 %v3152_v50, 0.0  ;;  %4288 = vmatprep.subr.bf16.mxu1 %v7555_v45  ;;  %v3278_v27 = vld [vmem:[%s10049_s10] sm:$0x3] }
 0x53e   : > { %v3233_v31 = vmax.f32 %v3163_v7, 0.0  ;;  %v7558_v7 = vld [vmem:[#allocation11 + $0x4] ss:$8 sps:$4 sm:$0xff]  }
 0x53f   : > { %v3231_v36 = vmax.f32 %v3155_v28, 0.0  ;;  %5039 = vmatprep.subr.bf16.mxu0 %v7558_v7  ;;  %v9508_v28 = vrot.slane %v3278_v27, %v8823_v3 }
 0x540   : > { %v3255_v38 = vpack.c.bf16 %v3233_v31, %v3232_v32  ;;  %4289 = vmatpush1.bf16.msra.mxu1 %v7553_v33 }
 0x541   : > { %v3254_v41 = vpack.c.bf16 %v3231_v36, %v3230_v34 }
 0x543   : > { %3483 = vmatmul.mubr.bf16.gmra.mrb[192].mxu1 %v3254_v41 }
 0x544   : > { %3492 = vmatprep.mubr.bf16.mxu1 %v8166_v6 }
 0x549   : > { %v6767_v42 = vpop.f32.mrb[148].mxu1 }
 0x54a   : > { %v3176_v43 = vadd.f32 %v6767_v42, %v9287_v30  ;;  %v3167_v46 = vpop.f32.mrb[149].mxu1 }
 0x54b   : > { %v3168_v47 = vadd.f32 %v9287_v30, %v3167_v46  ;;  %v6768_v49 = vpop.f32.mrb[150].mxu1  ;;  %3493 = vmatmul.mubr.bf16.gmra.mrb[196].mxu1 %v3255_v38 }
 0x54c   : > { %v3179_v51 = vadd.f32 %v6768_v49, %v9287_v30  ;;  %v3170_v56 = vpop.f32.mrb[151].mxu1  ;;  %3502 = vmatprep.mubr.bf16.mxu1 %v8166_v6  ;;  %v3236_v57 = vmax.f32 %v3176_v43, 0.0 }
 0x54d   : > { %v3171_v4 = vadd.f32 %v9287_v30, %v3170_v56  ;;  %v3234_v59 = vmax.f32 %v3168_v47, 0.0 }
 0x54e   : > { %v3237_v55 = vmax.f32 %v3179_v51, 0.0 }
 0x54f   : > { %v3235_v10 = vmax.f32 %v3171_v4, 0.0 }
 0x550   : > { %v3257_v62 = vpack.c.bf16 %v3237_v55, %v3236_v57  ;;  %v7556_v57 = vld [vmem:[#allocation11] ss:$8 sps:$4 sm:$0xff]   ;;  %v9517_v55 = vld [vmem:[#allocation11 + $0x104] ss:$8 sps:$4 sm:$0xff]  }
 0x551   : > { %v3256_v0 = vpack.c.bf16 %v3235_v10, %v3234_v59  ;;  %6777 = vmatprep.subr.bf16.mxu1 %v9517_v55 }
 0x553   : > { %3503 = vmatmul.mubr.bf16.gmra.mrb[200].mxu1 %v3256_v0  ;;  %v9520_v0 = vld [vmem:[#allocation11 + $0x100] ss:$8 sps:$4 sm:$0xff]  }
 0x554   : > { %3512 = vmatprep.mubr.bf16.mxu1 %v8166_v6 }
 0x559   : > { %v6771_v11 = vpop.f32.mrb[152].mxu1 }
 0x55a   : > { %v3192_v12 = vadd.f32 %v6771_v11, %v9287_v30  ;;  %v3183_v14 = vpop.f32.mrb[153].mxu1  ;;  %v9523_v11 = vld [vmem:[#allocation11 + $0x114] ss:$8 sps:$4 sm:$0xff]  }
 0x55b   : > { %v3184_v15 = vadd.f32 %v9287_v30, %v3183_v14  ;;  %v6772_v16 = vpop.f32.mrb[154].mxu1  ;;  %3513 = vmatmul.mubr.bf16.gmra.mrb[204].mxu1 %v3257_v62  ;;  %v7561_v62 = vld [vmem:[#allocation11 + $0x14] ss:$8 sps:$4 sm:$0xff]  }
 0x55c   : > { %v3195_v21 = vadd.f32 %v6772_v16, %v9287_v30  ;;  %v3186_v25 = vpop.f32.mrb[155].mxu1  ;;  %3522 = vmatprep.mubr.bf16.mxu1 %v8166_v6  ;;  %v3240_v37 = vmax.f32 %v3192_v12, 0.0  ;;  %v7559_v16 = vld [vmem:[#allocation11 + $0x10] ss:$8 sps:$4 sm:$0xff]  }
 0x55d   : > { %v3187_v61 = vadd.f32 %v9287_v30, %v3186_v25  ;;  %v3238_v40 = vmax.f32 %v3184_v15, 0.0  ;;  %v9529_v25 = vld [vmem:[#allocation11 + $0x110] ss:$8 sps:$4 sm:$0xff]  }
 0x55e   : > { %v3241_v13 = vmax.f32 %v3195_v21, 0.0  ;;  %v7564_v21 = vld [vmem:[#allocation11 + $0x24] ss:$8 sps:$4 sm:$0xff]  }
 0x55f   : > { %v3239_v18 = vmax.f32 %v3187_v61, 0.0 }
 0x560   : > { %v3259_v54 = vpack.c.bf16 %v3241_v13, %v3240_v37 }
 0x561   : > { %v3258_v60 = vpack.c.bf16 %v3239_v18, %v3238_v40  ;;  %v7562_v40 = vld [vmem:[#allocation11 + $0x20] ss:$8 sps:$4 sm:$0xff]   ;;  %v9532_v18 = vld [vmem:[#allocation11 + $0x124] ss:$8 sps:$4 sm:$0xff]  }
 0x563   : > { %3523 = vmatmul.mubr.bf16.gmra.mrb[208].mxu1 %v3258_v60 }
 0x564   : > { %3532 = vmatprep.mubr.bf16.mxu1 %v8166_v6 }
 0x569   : > { %v6775_v39 = vpop.f32.mrb[156].mxu1 }
 0x56a   : > { %v3208_v44 = vadd.f32 %v6775_v39, %v9287_v30  ;;  %v3199_v29 = vpop.f32.mrb[157].mxu1  ;;  %v7567_v39 = vld [vmem:[#allocation11 + $0x34] ss:$8 sps:$4 sm:$0xff]  }
 0x56b   : > { %v3200_v35 = vadd.f32 %v9287_v30, %v3199_v29  ;;  %v6776_v20 = vpop.f32.mrb[158].mxu1  ;;  %3533 = vmatmul.mubr.bf16.gmra.mrb[212].mxu1 %v3259_v54 }
 0x56c   : > { %v3211_v23 = vadd.f32 %v6776_v20, %v9287_v30  ;;  %v3202_v48 = vpop.f32.mrb[159].mxu1  ;;  %3542 = vmatprep.mubr.bf16.mxu1 %v8166_v6  ;;  %v3244_v17 = vmax.f32 %v3208_v44, 0.0  ;;  %v9536_v44 = vld [vmem:[#allocation11 + $0x120] ss:$8 sps:$4 sm:$0xff]   ;;  %v9539_v20 = vld [vmem:[#allocation11 + $0x134] ss:$8 sps:$4 sm:$0xff]  }
 0x56d   : > { %v3203_v52 = vadd.f32 %v9287_v30, %v3202_v48  ;;  %v3242_v24 = vmax.f32 %v3200_v35, 0.0  ;;  %v9511_v30 = vrot.slane %v3278_v27, %v8828_v5 }
 0x56e   : > { %v3245_v22 = vmax.f32 %v3211_v23, 0.0 }
 0x56f   : > { %v3243_v58 = vmax.f32 %v3203_v52, 0.0 }
 0x570   : > { %v3261_v50 = vpack.c.bf16 %v3245_v22, %v3244_v17  ;;  %v7565_v17 = vld [vmem:[#allocation11 + $0x30] ss:$8 sps:$4 sm:$0xff]  }
 0x571   : > { %v3260_v26 = vpack.c.bf16 %v3243_v58, %v3242_v24  ;;  %v7570_v58 = vld [vmem:[#allocation11 + $0x44] ss:$8 sps:$4 sm:$0xff]  }
 0x573   : > { %3543 = vmatmul.mubr.bf16.gmra.mrb[216].mxu1 %v3260_v26 }
 0x574   : > { %3552 = vmatprep.mubr.bf16.mxu1 %v8166_v6 }
 0x57b   : > { %3553 = vmatmul.mubr.bf16.gmra.mrb[220].mxu1 %v3261_v50  ;;  %v9545_v50 = vld [vmem:[#allocation11 + $0x130] ss:$8 sps:$4 sm:$0xff]  }
 0x5d6   : > { %v3404_v32 = vpop.f32.mrb[160].mxu1 }
 0x5d7   : > { %v3405_v31 = vadd.f32 %v3404_v32, %v9508_v28  ;;  %v3406_v34 = vpop.f32.mrb[161].mxu1 }
 0x5d8   : > { %v3407_v36 = vadd.f32 %v3406_v34, %v9511_v30  ;;  %v3408_v6 = vpop.f32.mrb[162].mxu1  ;;  %v7568_v34 = vld [vmem:[#allocation11 + $0x40] ss:$8 sps:$4 sm:$0xff]  }
 0x5d9   : > { %v3409_v38 = vadd.f32 %v3408_v6, %v9508_v28  ;;  %v3410_v41 = vpop.f32.mrb[163].mxu1  ;;  %v3563_v43 = vmax.f32 %v3405_v31, 0.0 }
 0x5da   : > { %v3411_v42 = vadd.f32 %v3410_v41, %v9511_v30  ;;  %v3564_v47 = vmax.f32 %v3407_v36, 0.0  ;;  %v9548_v36 = vld [vmem:[#allocation11 + $0x144] ss:$8 sps:$4 sm:$0xff]   ;;  %v7573_v41 = vld [vmem:[#allocation11 + $0x54] ss:$8 sps:$4 sm:$0xff]  }
 0x5db   : > { %v3565_v46 = vmax.f32 %v3409_v38, 0.0 }
 0x5dc   : > { %v3566_v49 = vmax.f32 %v3411_v42, 0.0  ;;  %v9552_v42 = vld [vmem:[#allocation11 + $0x140] ss:$8 sps:$4 sm:$0xff]  }
 0x5dd   : > { %v3627_v51 = vpack.c.bf16 %v3565_v46, %v3563_v43 }
 0x5de   : > { %v3628_v56 = vpack.c.bf16 %v3566_v49, %v3564_v47  ;;  %v3414_v4 = vpop.f32.mrb[164].mxu1  ;;  %v9555_v47 = vld [vmem:[#allocation11 + $0x154] ss:$8 sps:$4 sm:$0xff]  }
 0x5df   : > { %v3415_v59 = vadd.f32 %v3414_v4, %v9508_v28  ;;  %v3416_v10 = vpop.f32.mrb[165].mxu1  ;;  %v7571_v4 = vld [vmem:[#allocation11 + $0x50] ss:$8 sps:$4 sm:$0xff]  }
 0x5e0   : > { %v3417_v1 = vadd.f32 %v3416_v10, %v9511_v30  ;;  %v3418_v9 = vpop.f32.mrb[166].mxu1  ;;  %4097 = vmatprep.mubr.bf16.mxu0 %v3628_v56  ;;  %4290 = vmatprep.mubr.bf16.mxu1 %v3628_v56  ;;  %v7576_v10 = vld [vmem:[#allocation11 + $0x64] ss:$8 sps:$4 sm:$0xff]  }
 0x5e1   : > { %v3419_v12 = vadd.f32 %v3418_v9, %v9508_v28  ;;  %v3420_v14 = vpop.f32.mrb[167].mxu1  ;;  %4098 = vmatmul.mubr.bf16.vlgmr.msra.gmra.mrb[128].mxu0 %v3627_v51  ;;  %4291 = vmatmul.mubr.bf16.vlgmr.msra.gmra.mrb[224].mxu1 %v3627_v51  ;;  %v3567_v19 = vmax.f32 %v3415_v59, 0.0 }
 0x5e2   : > { %v3421_v15 = vadd.f32 %v3420_v14, %v9511_v30  ;;  %5040 = vmatpush1.bf16.msra.mxu0 %v7556_v57  ;;  %6793 = vmatpush1.bf16.msra.mxu1 %v9520_v0  ;;  %v3568_v53 = vmax.f32 %v3417_v1, 0.0 }
 0x5e3   : > { %v3569_v45 = vmax.f32 %v3419_v12, 0.0  ;;  %5041 = vmatprep.subr.bf16.mxu0 %v7561_v62  ;;  %6778 = vmatprep.subr.bf16.mxu1 %v9523_v11  ;;  %v9561_v62 = vld [vmem:[#allocation11 + $0x150] ss:$8 sps:$4 sm:$0xff]  }
 0x5e4   : > { %v3570_v33 = vmax.f32 %v3421_v15, 0.0 }
 0x5e5   : > { %v3629_v61 = vpack.c.bf16 %v3569_v45, %v3567_v19  ;;  %v9564_v19 = vld [vmem:[#allocation11 + $0x164] ss:$8 sps:$4 sm:$0xff]  }
 0x5e6   : > { %v3630_v37 = vpack.c.bf16 %v3570_v33, %v3568_v53  ;;  %v3424_v13 = vpop.f32.mrb[168].mxu1  ;;  %5042 = vmatpush1.bf16.msra.mxu0 %v7559_v16  ;;  %6794 = vmatpush1.bf16.msra.mxu1 %v9529_v25  ;;  %v7574_v16 = vld [vmem:[#allocation11 + $0x60] ss:$8 sps:$4 sm:$0xff]   ;;  %v7579_v53 = vld [vmem:[#allocation11 + $0x74] ss:$8 sps:$4 sm:$0xff]  }
 0x5e7   : > { %v3425_v54 = vadd.f32 %v3424_v13, %v9508_v28  ;;  %v3426_v60 = vpop.f32.mrb[169].mxu1  ;;  %5043 = vmatprep.subr.bf16.mxu0 %v7564_v21  ;;  %6779 = vmatprep.subr.bf16.mxu1 %v9532_v18  ;;  %v9568_v33 = vld [vmem:[#allocation11 + $0x160] ss:$8 sps:$4 sm:$0xff]  }
 0x5e8   : > { %v3427_v29 = vadd.f32 %v3426_v60, %v9511_v30  ;;  %v3428_v35 = vpop.f32.mrb[170].mxu1  ;;  %4107 = vmatprep.mubr.bf16.mxu0 %v3630_v37  ;;  %4300 = vmatprep.mubr.bf16.mxu1 %v3630_v37  ;;  %v7577_v60 = vld [vmem:[#allocation11 + $0x70] ss:$8 sps:$4 sm:$0xff]  }
 0x5e9   : > { %v3429_v23 = vadd.f32 %v3428_v35, %v9508_v28  ;;  %v3430_v48 = vpop.f32.mrb[171].mxu1  ;;  %4108 = vmatmul.mubr.bf16.gmra.mrb[132].mxu0 %v3629_v61  ;;  %4301 = vmatmul.mubr.bf16.gmra.mrb[228].mxu1 %v3629_v61  ;;  %v3571_v22 = vmax.f32 %v3425_v54, 0.0  ;;  %v7582_v35 = vld [vmem:[#allocation11 + $0x84] ss:$8 sps:$4 sm:$0xff]  }
 0x5ea   : > { %v3431_v52 = vadd.f32 %v3430_v48, %v9511_v30  ;;  %5044 = vmatpush1.bf16.msra.mxu0 %v7562_v40  ;;  %6795 = vmatpush1.bf16.msra.mxu1 %v9536_v44  ;;  %v3572_v26 = vmax.f32 %v3427_v29, 0.0 }
 0x5eb   : > { %v3573_v24 = vmax.f32 %v3429_v23, 0.0  ;;  %5045 = vmatprep.subr.bf16.mxu0 %v7567_v39  ;;  %6780 = vmatprep.subr.bf16.mxu1 %v9539_v20 }
 0x5ec   : > { %v3574_v7 = vmax.f32 %v3431_v52, 0.0 }
 0x5ed   : > { %v3631_v27 = vpack.c.bf16 %v3573_v24, %v3571_v22  ;;  %v7580_v24 = vld [vmem:[#allocation11 + $0x80] ss:$8 sps:$4 sm:$0xff]  }
 0x5ee   : > { %v3632_v32 = vpack.c.bf16 %v3574_v7, %v3572_v26  ;;  %v3434_v31 = vpop.f32.mrb[172].mxu1  ;;  %5046 = vmatpush1.bf16.msra.mxu0 %v7565_v17  ;;  %6796 = vmatpush1.bf16.msra.mxu1 %v9545_v50  ;;  %v7588_v7 = vld [vmem:[#allocation11 + $0x94] ss:$8 sps:$4 sm:$0xff]  }
 0x5ef   : > { %v3435_v6 = vadd.f32 %v3434_v31, %v9508_v28  ;;  %v3436_v38 = vpop.f32.mrb[173].mxu1  ;;  %5047 = vmatprep.subr.bf16.mxu0 %v7570_v58  ;;  %6781 = vmatprep.subr.bf16.mxu1 %v9548_v36 }
 0x5f0   : > { %v3437_v43 = vadd.f32 %v3436_v38, %v9511_v30  ;;  %v3438_v46 = vpop.f32.mrb[174].mxu1  ;;  %4117 = vmatprep.mubr.bf16.mxu0 %v3632_v32  ;;  %4310 = vmatprep.mubr.bf16.mxu1 %v3632_v32  ;;  %v7586_v38 = vld [vmem:[#allocation11 + $0x90] ss:$8 sps:$4 sm:$0xff]  }
 0x5f1   : > { %v3439_v49 = vadd.f32 %v3438_v46, %v9508_v28  ;;  %v3440_v51 = vpop.f32.mrb[175].mxu1  ;;  %4118 = vmatmul.mubr.bf16.gmra.mrb[136].mxu0 %v3631_v27  ;;  %4311 = vmatmul.mubr.bf16.gmra.mrb[232].mxu1 %v3631_v27  ;;  %v3575_v57 = vmax.f32 %v3435_v6, 0.0  ;;  %v7594_v46 = vld [vmem:[#allocation11 + $0xa4] ss:$8 sps:$4 sm:$0xff]  }
 0x5f2   : > { %v3441_v56 = vadd.f32 %v3440_v51, %v9511_v30  ;;  %5048 = vmatpush1.bf16.msra.mxu0 %v7568_v34  ;;  %6797 = vmatpush1.bf16.msra.mxu1 %v9552_v42  ;;  %v3576_v1 = vmax.f32 %v3437_v43, 0.0 }
 0x5f3   : > { %v3577_v59 = vmax.f32 %v3439_v49, 0.0  ;;  %5049 = vmatprep.subr.bf16.mxu0 %v7573_v41  ;;  %6782 = vmatprep.subr.bf16.mxu1 %v9555_v47 }
 0x5f4   : > { %v3578_v9 = vmax.f32 %v3441_v56, 0.0 }
 0x5f5   : > { %v3633_v12 = vpack.c.bf16 %v3577_v59, %v3575_v57  ;;  %v7592_v59 = vld [vmem:[#allocation11 + $0xa0] ss:$8 sps:$4 sm:$0xff]  }
 0x5f6   : > { %v3634_v14 = vpack.c.bf16 %v3578_v9, %v3576_v1  ;;  %v3444_v15 = vpop.f32.mrb[176].mxu1  ;;  %5050 = vmatpush1.bf16.msra.mxu0 %v7571_v4  ;;  %6798 = vmatpush1.bf16.msra.mxu1 %v9561_v62  ;;  %v7600_v9 = vld [vmem:[#allocation11 + $0xb4] ss:$8 sps:$4 sm:$0xff]  }
 0x5f7   : > { %v3445_v45 = vadd.f32 %v3444_v15, %v9508_v28  ;;  %v3446_v21 = vpop.f32.mrb[177].mxu1  ;;  %5051 = vmatprep.subr.bf16.mxu0 %v7576_v10  ;;  %6783 = vmatprep.subr.bf16.mxu1 %v9564_v19 }
 0x5f8   : > { %v3447_v61 = vadd.f32 %v3446_v21, %v9511_v30  ;;  %v3448_v37 = vpop.f32.mrb[178].mxu1  ;;  %4127 = vmatprep.mubr.bf16.mxu0 %v3634_v14  ;;  %4320 = vmatprep.mubr.bf16.mxu1 %v3634_v14  ;;  %v7598_v21 = vld [vmem:[#allocation11 + $0xb0] ss:$8 sps:$4 sm:$0xff]  }
 0x5f9   : > { %v3449_v13 = vadd.f32 %v3448_v37, %v9508_v28  ;;  %v3450_v40 = vpop.f32.mrb[179].mxu1  ;;  %4128 = vmatmul.mubr.bf16.gmra.mrb[140].mxu0 %v3633_v12  ;;  %4321 = vmatmul.mubr.bf16.gmra.mrb[236].mxu1 %v3633_v12  ;;  %v3579_v39 = vmax.f32 %v3445_v45, 0.0  ;;  %v7606_v37 = vld [vmem:[#allocation11 + $0xc4] ss:$8 sps:$4 sm:$0xff]  }
 0x5fa   : > { %v3451_v54 = vadd.f32 %v3450_v40, %v9511_v30  ;;  %5052 = vmatpush1.bf16.msra.mxu0 %v7574_v16  ;;  %6799 = vmatpush1.bf16.msra.mxu1 %v9568_v33  ;;  %v3580_v23 = vmax.f32 %v3447_v61, 0.0 }
 0x5fb   : > { %v3581_v29 = vmax.f32 %v3449_v13, 0.0  ;;  %5053 = vmatprep.subr.bf16.mxu0 %v7579_v53 }
 0x5fc   : > { %v3582_v48 = vmax.f32 %v3451_v54, 0.0 }
 0x5fd   : > { %v3635_v52 = vpack.c.bf16 %v3581_v29, %v3579_v39  ;;  %v7604_v29 = vld [vmem:[#allocation11 + $0xc0] ss:$8 sps:$4 sm:$0xff]  }
 0x5fe   : > { %v3636_v17 = vpack.c.bf16 %v3582_v48, %v3580_v23  ;;  %v3454_v22 = vpop.f32.mrb[180].mxu1  ;;  %5054 = vmatpush1.bf16.msra.mxu0 %v7577_v60  ;;  %v7612_v48 = vld [vmem:[#allocation11 + $0xd4] ss:$8 sps:$4 sm:$0xff]  }
 0x5ff   : > { %v3455_v58 = vadd.f32 %v3454_v22, %v9508_v28  ;;  %v3456_v26 = vpop.f32.mrb[181].mxu1  ;;  %5055 = vmatprep.subr.bf16.mxu0 %v7582_v35 }
 0x600   : > { %v3457_v27 = vadd.f32 %v3456_v26, %v9511_v30  ;;  %v3458_v32 = vpop.f32.mrb[182].mxu1  ;;  %4137 = vmatprep.mubr.bf16.mxu0 %v3636_v17  ;;  %4330 = vmatprep.mubr.bf16.mxu1 %v3636_v17  ;;  %v7610_v26 = vld [vmem:[#allocation11 + $0xd0] ss:$8 sps:$4 sm:$0xff]  }
 0x601   : > { %v3459_v31 = vadd.f32 %v3458_v32, %v9508_v28  ;;  %v3460_v34 = vpop.f32.mrb[183].mxu1  ;;  %4138 = vmatmul.mubr.bf16.gmra.mrb[144].mxu0 %v3635_v52  ;;  %4331 = vmatmul.mubr.bf16.gmra.mrb[240].mxu1 %v3635_v52  ;;  %v3583_v41 = vmax.f32 %v3455_v58, 0.0  ;;  %v7618_v32 = vld [vmem:[#allocation11 + $0xe4] ss:$8 sps:$4 sm:$0xff]  }
 0x602   : > { %v3461_v6 = vadd.f32 %v3460_v34, %v9511_v30  ;;  %5056 = vmatpush1.bf16.msra.mxu0 %v7580_v24  ;;  %v3584_v49 = vmax.f32 %v3457_v27, 0.0 }
 0x603   : > { %v3585_v43 = vmax.f32 %v3459_v31, 0.0  ;;  %5057 = vmatprep.subr.bf16.mxu0 %v7588_v7 }
 0x604   : > { %v3586_v51 = vmax.f32 %v3461_v6, 0.0 }
 0x605   : > { %v3637_v56 = vpack.c.bf16 %v3585_v43, %v3583_v41  ;;  %v7616_v43 = vld [vmem:[#allocation11 + $0xe0] ss:$8 sps:$4 sm:$0xff]  }
 0x606   : > { %v3638_v4 = vpack.c.bf16 %v3586_v51, %v3584_v49  ;;  %v3464_v57 = vpop.f32.mrb[184].mxu1  ;;  %5058 = vmatpush1.bf16.msra.mxu0 %v7586_v38 }
 0x607   : > { %v3465_v10 = vadd.f32 %v3464_v57, %v9508_v28  ;;  %v3466_v1 = vpop.f32.mrb[185].mxu1  ;;  %5059 = vmatprep.subr.bf16.mxu0 %v7594_v46 }
 0x608   : > { %v3467_v12 = vadd.f32 %v3466_v1, %v9511_v30  ;;  %v3468_v14 = vpop.f32.mrb[186].mxu1  ;;  %4147 = vmatprep.mubr.bf16.mxu0 %v3638_v4  ;;  %4340 = vmatprep.mubr.bf16.mxu1 %v3638_v4 }
 0x609   : > { %v3469_v15 = vadd.f32 %v3468_v14, %v9508_v28  ;;  %v3470_v16 = vpop.f32.mrb[187].mxu1  ;;  %4148 = vmatmul.mubr.bf16.gmra.mrb[148].mxu0 %v3637_v56  ;;  %4341 = vmatmul.mubr.bf16.gmra.mrb[244].mxu1 %v3637_v56  ;;  %v3587_v53 = vmax.f32 %v3465_v10, 0.0 }
 0x60a   : > { %v3471_v45 = vadd.f32 %v3470_v16, %v9511_v30  ;;  %5060 = vmatpush1.bf16.msra.mxu0 %v7592_v59  ;;  %v3588_v13 = vmax.f32 %v3467_v12, 0.0 }
 0x60b   : > { %v3589_v61 = vmax.f32 %v3469_v15, 0.0  ;;  %5061 = vmatprep.subr.bf16.mxu0 %v7600_v9 }
 0x60c   : > { %v3590_v40 = vmax.f32 %v3471_v45, 0.0 }
 0x60d   : > { %v3639_v54 = vpack.c.bf16 %v3589_v61, %v3587_v53 }
 0x60e   : > { %v3640_v60 = vpack.c.bf16 %v3590_v40, %v3588_v13  ;;  %v3474_v39 = vpop.f32.mrb[188].mxu1  ;;  %5062 = vmatpush1.bf16.msra.mxu0 %v7598_v21 }
 0x60f   : > { %v3475_v35 = vadd.f32 %v3474_v39, %v9508_v28  ;;  %v3476_v23 = vpop.f32.mrb[189].mxu1  ;;  %5063 = vmatprep.subr.bf16.mxu0 %v7606_v37 }
 0x610   : > { %v3477_v52 = vadd.f32 %v3476_v23, %v9511_v30  ;;  %v3478_v17 = vpop.f32.mrb[190].mxu1  ;;  %4157 = vmatprep.mubr.bf16.mxu0 %v3640_v60  ;;  %4350 = vmatprep.mubr.bf16.mxu1 %v3640_v60 }
 0x611   : > { %v3479_v22 = vadd.f32 %v3478_v17, %v9508_v28  ;;  %v3480_v24 = vpop.f32.mrb[191].mxu1  ;;  %4158 = vmatmul.mubr.bf16.gmra.mrb[152].mxu0 %v3639_v54  ;;  %4351 = vmatmul.mubr.bf16.gmra.mrb[248].mxu1 %v3639_v54  ;;  %v3591_v7 = vmax.f32 %v3475_v35, 0.0 }
 0x612   : > { %v3481_v58 = vadd.f32 %v3480_v24, %v9511_v30  ;;  %5064 = vmatpush1.bf16.msra.mxu0 %v7604_v29  ;;  %v3592_v31 = vmax.f32 %v3477_v52, 0.0 }
 0x613   : > { %v3593_v27 = vmax.f32 %v3479_v22, 0.0  ;;  %5065 = vmatprep.subr.bf16.mxu0 %v7612_v48 }
 0x614   : > { %v3594_v34 = vmax.f32 %v3481_v58, 0.0 }
 0x615   : > { %v3641_v6 = vpack.c.bf16 %v3593_v27, %v3591_v7 }
 0x616   : > { %v3642_v38 = vpack.c.bf16 %v3594_v34, %v3592_v31  ;;  %v3484_v41 = vpop.f32.mrb[192].mxu1  ;;  %5066 = vmatpush1.bf16.msra.mxu0 %v7610_v26 }
 0x617   : > { %v3485_v46 = vadd.f32 %v3484_v41, %v9508_v28  ;;  %v3486_v49 = vpop.f32.mrb[193].mxu1  ;;  %5067 = vmatprep.subr.bf16.mxu0 %v7618_v32 }
 0x618   : > { %v3487_v51 = vadd.f32 %v3486_v49, %v9511_v30  ;;  %v3488_v56 = vpop.f32.mrb[194].mxu1  ;;  %4167 = vmatprep.mubr.bf16.mxu0 %v3642_v38  ;;  %4360 = vmatprep.mubr.bf16.mxu1 %v3642_v38 }
 0x619   : > { %v3489_v4 = vadd.f32 %v3488_v56, %v9508_v28  ;;  %v3490_v57 = vpop.f32.mrb[195].mxu1  ;;  %4168 = vmatmul.mubr.bf16.gmra.mrb[156].mxu0 %v3641_v6  ;;  %4361 = vmatmul.mubr.bf16.gmra.mrb[252].mxu1 %v3641_v6  ;;  %v3595_v10 = vmax.f32 %v3485_v46, 0.0 }
 0x61a   : > { %v3491_v59 = vadd.f32 %v3490_v57, %v9511_v30  ;;  %5068 = vmatpush1.bf16.msra.mxu0 %v7616_v43  ;;  %v3596_v9 = vmax.f32 %v3487_v51, 0.0 }
 0x61b   : > { %v3597_v1 = vmax.f32 %v3489_v4, 0.0 }
 0x61c   : > { %v3598_v12 = vmax.f32 %v3491_v59, 0.0 }
 0x61d   : > { %v3643_v14 = vpack.c.bf16 %v3597_v1, %v3595_v10 }
 0x61e   : > { %v3644_v15 = vpack.c.bf16 %v3598_v12, %v3596_v9  ;;  %v3494_v16 = vpop.f32.mrb[196].mxu1 }
 0x61f   : > { %v3495_v45 = vadd.f32 %v3494_v16, %v9508_v28  ;;  %v3496_v21 = vpop.f32.mrb[197].mxu1 }
 0x620   : > { %v3497_v53 = vadd.f32 %v3496_v21, %v9511_v30  ;;  %v3498_v61 = vpop.f32.mrb[198].mxu1  ;;  %4177 = vmatprep.mubr.bf16.mxu0 %v3644_v15  ;;  %4370 = vmatprep.mubr.bf16.mxu1 %v3644_v15 }
 0x621   : > { %v3499_v37 = vadd.f32 %v3498_v61, %v9508_v28  ;;  %v3500_v13 = vpop.f32.mrb[199].mxu1  ;;  %4178 = vmatmul.mubr.bf16.gmra.mrb[160].mxu0 %v3643_v14  ;;  %4371 = vmatmul.mubr.bf16.gmra.mrb[0].mxu1 %v3643_v14  ;;  %v3599_v54 = vmax.f32 %v3495_v45, 0.0 }
 0x622   : > { %v3501_v40 = vadd.f32 %v3500_v13, %v9511_v30  ;;  %v3600_v39 = vmax.f32 %v3497_v53, 0.0  ;;  %v7624_v13 = vld [vmem:[#allocation11 + $0xf4] ss:$8 sps:$4 sm:$0xff]  }
 0x623   : > { %v3601_v60 = vmax.f32 %v3499_v37, 0.0  ;;  %5069 = vmatprep.subr.bf16.mxu0 %v7624_v13 }
 0x624   : > { %v3602_v29 = vmax.f32 %v3501_v40, 0.0  ;;  %v9606_v40 = vld [vmem:[#allocation11 + $0x174] ss:$8 sps:$4 sm:$0xff]  }
 0x625   : > { %v3645_v35 = vpack.c.bf16 %v3601_v60, %v3599_v54  ;;  %v7622_v60 = vld [vmem:[#allocation11 + $0xf0] ss:$8 sps:$4 sm:$0xff]   ;;  %6784 = vmatprep.subr.bf16.mxu1 %v9606_v40 }
 0x626   : > { %v3646_v23 = vpack.c.bf16 %v3602_v29, %v3600_v39  ;;  %v3504_v48 = vpop.f32.mrb[200].mxu1  ;;  %v9609_v39 = vld [vmem:[#allocation11 + $0x170] ss:$8 sps:$4 sm:$0xff]   ;;  %5070 = vmatpush1.bf16.msra.mxu0 %v7622_v60  ;;  %v9645_v60 = vld [vmem:[#allocation11 + $0x1c4] ss:$8 sps:$4 sm:$0xff]  }
 0x627   : > { %v3505_v52 = vadd.f32 %v3504_v48, %v9508_v28  ;;  %v3506_v17 = vpop.f32.mrb[201].mxu1  ;;  %6800 = vmatpush1.bf16.msra.mxu1 %v9609_v39  ;;  %5232 = vmatprep.subr.bf16.mxu0 %v9517_v55  ;;  %v9622_v55 = vld [vmem:[#allocation11 + $0x194] ss:$8 sps:$4 sm:$0xff]  }
 0x628   : > { %v3507_v22 = vadd.f32 %v3506_v17, %v9511_v30  ;;  %v3508_v24 = vpop.f32.mrb[202].mxu1  ;;  %4187 = vmatprep.mubr.bf16.mxu0 %v3646_v23  ;;  %4380 = vmatprep.mubr.bf16.mxu1 %v3646_v23  ;;  %v9614_v17 = vld [vmem:[#allocation11 + $0x184] ss:$8 sps:$4 sm:$0xff]  }
 0x629   : > { %v3509_v58 = vadd.f32 %v3508_v24, %v9508_v28  ;;  %v3510_v26 = vpop.f32.mrb[203].mxu1  ;;  %4188 = vmatmul.mubr.bf16.gmra.mrb[164].mxu0 %v3645_v35  ;;  %4381 = vmatmul.mubr.bf16.gmra.mrb[4].mxu1 %v3645_v35  ;;  %v3603_v27 = vmax.f32 %v3505_v52, 0.0 }
 0x62a   : > { %v3511_v7 = vadd.f32 %v3510_v26, %v9511_v30  ;;  %v3604_v31 = vmax.f32 %v3507_v22, 0.0  ;;  %6785 = vmatprep.subr.bf16.mxu1 %v9614_v17 }
 0x62b   : > { %v3605_v32 = vmax.f32 %v3509_v58, 0.0  ;;  %v9616_v58 = vld [vmem:[#allocation11 + $0x180] ss:$8 sps:$4 sm:$0xff]  }
 0x62c   : > { %v3606_v34 = vmax.f32 %v3511_v7, 0.0  ;;  %6801 = vmatpush1.bf16.msra.mxu1 %v9616_v58 }
 0x62d   : > { %v3647_v6 = vpack.c.bf16 %v3605_v32, %v3603_v27  ;;  %6786 = vmatprep.subr.bf16.mxu1 %v9622_v55 }
 0x62e   : > { %v3648_v38 = vpack.c.bf16 %v3606_v34, %v3604_v31  ;;  %v3514_v41 = vpop.f32.mrb[204].mxu1 }
 0x62f   : > { %v3515_v43 = vadd.f32 %v3514_v41, %v9508_v28  ;;  %v3516_v46 = vpop.f32.mrb[205].mxu1 }
 0x630   : > { %v3517_v49 = vadd.f32 %v3516_v46, %v9511_v30  ;;  %v3518_v51 = vpop.f32.mrb[206].mxu1  ;;  %4197 = vmatprep.mubr.bf16.mxu0 %v3648_v38  ;;  %4390 = vmatprep.mubr.bf16.mxu1 %v3648_v38  ;;  %v9626_v38 = vld [vmem:[#allocation11 + $0x190] ss:$8 sps:$4 sm:$0xff]  }
 0x631   : > { %v3519_v56 = vadd.f32 %v3518_v51, %v9508_v28  ;;  %v3520_v4 = vpop.f32.mrb[207].mxu1  ;;  %4198 = vmatmul.mubr.bf16.gmra.mrb[168].mxu0 %v3647_v6  ;;  %4391 = vmatmul.mubr.bf16.gmra.mrb[8].mxu1 %v3647_v6  ;;  %v3607_v59 = vmax.f32 %v3515_v43, 0.0 }
 0x632   : > { %v3521_v57 = vadd.f32 %v3520_v4, %v9511_v30  ;;  %v3608_v1 = vmax.f32 %v3517_v49, 0.0  ;;  %6802 = vmatpush1.bf16.msra.mxu1 %v9626_v38 }
 0x633   : > { %v3609_v10 = vmax.f32 %v3519_v56, 0.0  ;;  %v9629_v56 = vld [vmem:[#allocation11 + $0x1a4] ss:$8 sps:$4 sm:$0xff]  }
 0x634   : > { %v3610_v9 = vmax.f32 %v3521_v57, 0.0  ;;  %6787 = vmatprep.subr.bf16.mxu1 %v9629_v56 }
 0x635   : > { %v3649_v12 = vpack.c.bf16 %v3609_v10, %v3607_v59  ;;  %v9632_v59 = vld [vmem:[#allocation11 + $0x1a0] ss:$8 sps:$4 sm:$0xff]  }
 0x636   : > { %v3650_v14 = vpack.c.bf16 %v3610_v9, %v3608_v1  ;;  %v3524_v15 = vpop.f32.mrb[208].mxu1  ;;  %6803 = vmatpush1.bf16.msra.mxu1 %v9632_v59 }
 0x637   : > { %v3525_v16 = vadd.f32 %v3524_v15, %v9508_v28  ;;  %v3526_v45 = vpop.f32.mrb[209].mxu1 }
 0x638   : > { %v3527_v21 = vadd.f32 %v3526_v45, %v9511_v30  ;;  %v3528_v53 = vpop.f32.mrb[210].mxu1  ;;  %4207 = vmatprep.mubr.bf16.mxu0 %v3650_v14  ;;  %4400 = vmatprep.mubr.bf16.mxu1 %v3650_v14 }
 0x639   : > { %v3529_v61 = vadd.f32 %v3528_v53, %v9508_v28  ;;  %v3530_v37 = vpop.f32.mrb[211].mxu1  ;;  %4208 = vmatmul.mubr.bf16.gmra.mrb[172].mxu0 %v3649_v12  ;;  %4401 = vmatmul.mubr.bf16.gmra.mrb[12].mxu1 %v3649_v12  ;;  %v3611_v29 = vmax.f32 %v3525_v16, 0.0  ;;  %v9638_v16 = vld [vmem:[#allocation11 + $0x1b4] ss:$8 sps:$4 sm:$0xff]  }
 0x63a   : > { %v3531_v54 = vadd.f32 %v3530_v37, %v9511_v30  ;;  %v3612_v23 = vmax.f32 %v3527_v21, 0.0  ;;  %v9642_v21 = vld [vmem:[#allocation11 + $0x1b0] ss:$8 sps:$4 sm:$0xff]   ;;  %6788 = vmatprep.subr.bf16.mxu1 %v9638_v16 }
 0x63b   : > { %v3613_v35 = vmax.f32 %v3529_v61, 0.0  ;;  %6804 = vmatpush1.bf16.msra.mxu1 %v9642_v21 }
 0x63c   : > { %v3614_v48 = vmax.f32 %v3531_v54, 0.0  ;;  %6789 = vmatprep.subr.bf16.mxu1 %v9645_v60 }
 0x63d   : > { %v3651_v52 = vpack.c.bf16 %v3613_v35, %v3611_v29 }
 0x63e   : > { %v3652_v22 = vpack.c.bf16 %v3614_v48, %v3612_v23  ;;  %v3534_v24 = vpop.f32.mrb[212].mxu1  ;;  %v9648_v23 = vld [vmem:[#allocation11 + $0x1c0] ss:$8 sps:$4 sm:$0xff]  }
 0x63f   : > { %v3535_v26 = vadd.f32 %v3534_v24, %v9508_v28  ;;  %v3536_v7 = vpop.f32.mrb[213].mxu1  ;;  %6805 = vmatpush1.bf16.msra.mxu1 %v9648_v23 }
 0x640   : > { %v3537_v27 = vadd.f32 %v3536_v7, %v9511_v30  ;;  %v3538_v32 = vpop.f32.mrb[214].mxu1  ;;  %4217 = vmatprep.mubr.bf16.mxu0 %v3652_v22  ;;  %4410 = vmatprep.mubr.bf16.mxu1 %v3652_v22 }
 0x641   : > { %v3539_v31 = vadd.f32 %v3538_v32, %v9508_v28  ;;  %v3540_v34 = vpop.f32.mrb[215].mxu1  ;;  %4218 = vmatmul.mubr.bf16.gmra.mrb[176].mxu0 %v3651_v52  ;;  %4411 = vmatmul.mubr.bf16.gmra.mrb[16].mxu1 %v3651_v52  ;;  %v3615_v41 = vmax.f32 %v3535_v26, 0.0 }
 0x642   : > { %v3541_v6 = vadd.f32 %v3540_v34, %v9511_v30  ;;  %v3616_v46 = vmax.f32 %v3537_v27, 0.0  ;;  %v9654_v27 = vld [vmem:[#allocation11 + $0x1d4] ss:$8 sps:$4 sm:$0xff]  }
 0x643   : > { %v3617_v43 = vmax.f32 %v3539_v31, 0.0  ;;  %v9658_v31 = vld [vmem:[#allocation11 + $0x1d0] ss:$8 sps:$4 sm:$0xff]   ;;  %6790 = vmatprep.subr.bf16.mxu1 %v9654_v27 }
 0x644   : > { %v3618_v49 = vmax.f32 %v3541_v6, 0.0  ;;  %6806 = vmatpush1.bf16.msra.mxu1 %v9658_v31 }
 0x645   : > { %v3653_v51 = vpack.c.bf16 %v3617_v43, %v3615_v41 }
 0x646   : > { %v3654_v4 = vpack.c.bf16 %v3618_v49, %v3616_v46  ;;  %v3544_v57 = vpop.f32.mrb[216].mxu1  ;;  %v9661_v49 = vld [vmem:[#allocation11 + $0x1e4] ss:$8 sps:$4 sm:$0xff]  }
 0x647   : > { %v3545_v10 = vadd.f32 %v3544_v57, %v9508_v28  ;;  %v3546_v1 = vpop.f32.mrb[217].mxu1  ;;  %6791 = vmatprep.subr.bf16.mxu1 %v9661_v49  ;;  %v3723_v57 = vld [vmem:[%s10051_s12] sm:$0xf] }
 0x648   : > { %v3547_v9 = vadd.f32 %v3546_v1, %v9511_v30  ;;  %v3548_v12 = vpop.f32.mrb[218].mxu1  ;;  %4227 = vmatprep.mubr.bf16.mxu0 %v3654_v4  ;;  %4420 = vmatprep.mubr.bf16.mxu1 %v3654_v4  ;;  %v9670_v4 = vld [vmem:[#allocation11 + $0x1f0] ss:$8 sps:$4 sm:$0xff]   ;;  %v9682_v1 = vrot.slane %v3723_v57, %v692_v63 }
 0x649   : > { %v3549_v14 = vadd.f32 %v3548_v12, %v9508_v28  ;;  %v3550_v15 = vpop.f32.mrb[219].mxu1  ;;  %4228 = vmatmul.mubr.bf16.gmra.mrb[180].mxu0 %v3653_v51  ;;  %4421 = vmatmul.mubr.bf16.gmra.mrb[20].mxu1 %v3653_v51  ;;  %v3619_v53 = vmax.f32 %v3545_v10, 0.0  ;;  %v9664_v51 = vld [vmem:[#allocation11 + $0x1e0] ss:$8 sps:$4 sm:$0xff]   ;;  %v9678_v10 = vrot.slane %v3723_v57, %v8823_v3  ;;  %v9689_v12 = vrot.slane %v3723_v57, %v696_v8 }
 0x64a   : > { %v3551_v45 = vadd.f32 %v3550_v15, %v9511_v30  ;;  %v3620_v37 = vmax.f32 %v3547_v9, 0.0  ;;  %6807 = vmatpush1.bf16.msra.mxu1 %v9664_v51  ;;  %v9685_v9 = vrot.slane %v3723_v57, %v8828_v5 }
 0x64b   : > { %v3621_v61 = vmax.f32 %v3549_v14, 0.0 }
 0x64c   : > { %v3622_v13 = vmax.f32 %v3551_v45, 0.0 }
 0x64d   : > { %v3655_v54 = vpack.c.bf16 %v3621_v61, %v3619_v53 }
 0x64e   : > { %v3656_v29 = vpack.c.bf16 %v3622_v13, %v3620_v37  ;;  %v3554_v35 = vpop.f32.mrb[220].mxu1 }
 0x64f   : > { %v3555_v48 = vadd.f32 %v3554_v35, %v9508_v28  ;;  %v3556_v52 = vpop.f32.mrb[221].mxu1 }
 0x650   : > { %v3557_v22 = vadd.f32 %v3556_v52, %v9511_v30  ;;  %v3558_v24 = vpop.f32.mrb[222].mxu1  ;;  %4237 = vmatprep.mubr.bf16.mxu0 %v3656_v29  ;;  %4430 = vmatprep.mubr.bf16.mxu1 %v3656_v29 }
 0x651   : > { %v3559_v26 = vadd.f32 %v3558_v24, %v9508_v28  ;;  %v3560_v7 = vpop.f32.mrb[223].mxu1  ;;  %4238 = vmatmul.mubr.bf16.gmra.mrb[184].mxu0 %v3655_v54  ;;  %4431 = vmatmul.mubr.bf16.gmra.mrb[24].mxu1 %v3655_v54  ;;  %v3623_v34 = vmax.f32 %v3555_v48, 0.0 }
 0x652   : > { %v3561_v32 = vadd.f32 %v3560_v7, %v9511_v30  ;;  %v3624_v41 = vmax.f32 %v3557_v22, 0.0  ;;  %v9667_v30 = vld [vmem:[#allocation11 + $0x1f4] ss:$8 sps:$4 sm:$0xff]  }
 0x653   : > { %v3625_v6 = vmax.f32 %v3559_v26, 0.0  ;;  %6792 = vmatprep.subr.bf16.mxu1 %v9667_v30 }
 0x654   : > { %v3626_v43 = vmax.f32 %v3561_v32, 0.0  ;;  %6808 = vmatpush1.bf16.msra.mxu1 %v9670_v4 }
 0x655   : > { %v3657_v46 = vpack.c.bf16 %v3625_v6, %v3623_v34 }
 0x656   : > { %v3658_v28 = vpack.c.bf16 %v3626_v43, %v3624_v41 }
 0x658   : > { %4247 = vmatprep.mubr.bf16.mxu0 %v3658_v28  ;;  %4440 = vmatprep.mubr.bf16.mxu1 %v3658_v28 }
 0x659   : > { %4248 = vmatmul.mubr.bf16.gmra.mrb[188].mxu0 %v3657_v46  ;;  %4441 = vmatmul.mubr.bf16.gmra.mrb[28].mxu1 %v3657_v46 }
 0x6b4   : > { %v4099_v14 = vpop.f32.mrb[128].mxu0  ;;  %v4292_v15 = vpop.f32.mrb[224].mxu1 }
 0x6b5   : > { %v4100_v45 = vadd.f32 %v4099_v14, %v9678_v10  ;;  %v4293_v53 = vadd.f32 %v4292_v15, %v9682_v1  ;;  %v4101_v61 = vpop.f32.mrb[129].mxu0  ;;  %v4294_v37 = vpop.f32.mrb[225].mxu1 }
 0x6b6   : > { %v4102_v13 = vadd.f32 %v4101_v61, %v9685_v9  ;;  %v4295_v63 = vadd.f32 %v4294_v37, %v9689_v12  ;;  %v4103_v54 = vpop.f32.mrb[130].mxu0  ;;  %v4296_v29 = vpop.f32.mrb[226].mxu1 }
 0x6b7   : > { %v4104_v35 = vadd.f32 %v4103_v54, %v9678_v10  ;;  %v4297_v2 = vadd.f32 %v4296_v29, %v9682_v1  ;;  %v4105_v8 = vpop.f32.mrb[131].mxu0  ;;  %v4298_v48 = vpop.f32.mrb[227].mxu1  ;;  %v4451_v24 = vmax.f32 %v4100_v45, 0.0  ;;  %v4453_v26 = vmax.f32 %v4293_v53, 0.0 }
 0x6b8   : > { %v4106_v52 = vadd.f32 %v4105_v8, %v9685_v9  ;;  %v4299_v22 = vadd.f32 %v4298_v48, %v9689_v12  ;;  %v4452_v34 = vmax.f32 %v4102_v13, 0.0  ;;  %v4454_v6 = vmax.f32 %v4295_v63, 0.0 }
 0x6b9   : > { %v4455_v7 = vmax.f32 %v4104_v35, 0.0  ;;  %v4457_v32 = vmax.f32 %v4297_v2, 0.0 }
 0x6ba   : > { %v4456_v41 = vmax.f32 %v4106_v52, 0.0  ;;  %v4458_v43 = vmax.f32 %v4299_v22, 0.0 }
 0x6bb   : > { %v4579_v46 = vpack.c.bf16 %v4455_v7, %v4451_v24  ;;  %v9699_v28 = vpack.c.bf16 %v4457_v32, %v4453_v26 }
 0x6bc   : > { %v4580_v57 = vpack.c.bf16 %v4456_v41, %v4452_v34  ;;  %v9701_v14 = vpack.c.bf16 %v4458_v43, %v4454_v6  ;;  %v4109_v15 = vpop.f32.mrb[132].mxu0  ;;  %v4302_v61 = vpop.f32.mrb[228].mxu1 }
 0x6bd   : > { %v4110_v37 = vadd.f32 %v4109_v15, %v9678_v10  ;;  %v4303_v54 = vadd.f32 %v4302_v61, %v9682_v1  ;;  %v4111_v45 = vpop.f32.mrb[133].mxu0  ;;  %v4304_v53 = vpop.f32.mrb[229].mxu1 }
 0x6be   : > { %v4112_v29 = vadd.f32 %v4111_v45, %v9685_v9  ;;  %v4305_v13 = vadd.f32 %v4304_v53, %v9689_v12  ;;  %v4113_v63 = vpop.f32.mrb[134].mxu0  ;;  %v4306_v35 = vpop.f32.mrb[230].mxu1  ;;  %5071 = vmatprep.mubr.bf16.mxu0 %v4580_v57 }
 0x6bf   : > { %v4114_v2 = vadd.f32 %v4113_v63, %v9678_v10  ;;  %v4307_v8 = vadd.f32 %v4306_v35, %v9682_v1  ;;  %v4115_v48 = vpop.f32.mrb[135].mxu0  ;;  %v4308_v52 = vpop.f32.mrb[231].mxu1  ;;  %5072 = vmatmul.mubr.bf16.vlgmr.msra.gmra.mrb[192].mxu0 %v4579_v46  ;;  %v4459_v26 = vmax.f32 %v4110_v37, 0.0  ;;  %v4461_v7 = vmax.f32 %v4303_v54, 0.0 }
 0x6c0   : > { %v4116_v22 = vadd.f32 %v4115_v48, %v9685_v9  ;;  %v4309_v24 = vadd.f32 %v4308_v52, %v9689_v12  ;;  %5233 = vmatpush1.bf16.msra.mxu0 %v9520_v0  ;;  %v4460_v6 = vmax.f32 %v4112_v29, 0.0  ;;  %v4462_v41 = vmax.f32 %v4305_v13, 0.0 }
 0x6c1   : > { %v4463_v32 = vmax.f32 %v4114_v2, 0.0  ;;  %v4465_v34 = vmax.f32 %v4307_v8, 0.0  ;;  %5234 = vmatprep.subr.bf16.mxu0 %v9523_v11 }
 0x6c2   : > { %v4464_v43 = vmax.f32 %v4116_v22, 0.0  ;;  %v4466_v57 = vmax.f32 %v4309_v24, 0.0 }
 0x6c3   : > { %v4583_v15 = vpack.c.bf16 %v4463_v32, %v4459_v26  ;;  %v9713_v61 = vpack.c.bf16 %v4465_v34, %v4461_v7 }
 0x6c4   : > { %v4584_v46 = vpack.c.bf16 %v4464_v43, %v4460_v6  ;;  %v9715_v45 = vpack.c.bf16 %v4466_v57, %v4462_v41  ;;  %v4119_v53 = vpop.f32.mrb[136].mxu0  ;;  %v4312_v63 = vpop.f32.mrb[232].mxu1  ;;  %5235 = vmatpush1.bf16.msra.mxu0 %v9529_v25 }
 0x6c5   : > { %v4120_v0 = vadd.f32 %v4119_v53, %v9678_v10  ;;  %v4313_v37 = vadd.f32 %v4312_v63, %v9682_v1  ;;  %v4121_v54 = vpop.f32.mrb[137].mxu0  ;;  %v4314_v11 = vpop.f32.mrb[233].mxu1  ;;  %5236 = vmatprep.subr.bf16.mxu0 %v9532_v18 }
 0x6c6   : > { %v4122_v29 = vadd.f32 %v4121_v54, %v9685_v9  ;;  %v4315_v13 = vadd.f32 %v4314_v11, %v9689_v12  ;;  %v4123_v35 = vpop.f32.mrb[138].mxu0  ;;  %v4316_v2 = vpop.f32.mrb[234].mxu1  ;;  %5081 = vmatprep.mubr.bf16.mxu0 %v4584_v46 }
 0x6c7   : > { %v4124_v8 = vadd.f32 %v4123_v35, %v9678_v10  ;;  %v4317_v48 = vadd.f32 %v4316_v2, %v9682_v1  ;;  %v4125_v25 = vpop.f32.mrb[139].mxu0  ;;  %v4318_v52 = vpop.f32.mrb[235].mxu1  ;;  %5082 = vmatmul.mubr.bf16.gmra.mrb[196].mxu0 %v4583_v15  ;;  %v4467_v18 = vmax.f32 %v4120_v0, 0.0  ;;  %v4469_v26 = vmax.f32 %v4313_v37, 0.0 }
 0x6c8   : > { %v4126_v22 = vadd.f32 %v4125_v25, %v9685_v9  ;;  %v4319_v24 = vadd.f32 %v4318_v52, %v9689_v12  ;;  %5237 = vmatpush1.bf16.msra.mxu0 %v9536_v44  ;;  %v4468_v34 = vmax.f32 %v4122_v29, 0.0  ;;  %v4470_v6 = vmax.f32 %v4315_v13, 0.0 }
 0x6c9   : > { %v4471_v7 = vmax.f32 %v4124_v8, 0.0  ;;  %v4473_v32 = vmax.f32 %v4317_v48, 0.0  ;;  %5238 = vmatprep.subr.bf16.mxu0 %v9539_v20 }
 0x6ca   : > { %v4472_v41 = vmax.f32 %v4126_v22, 0.0  ;;  %v4474_v43 = vmax.f32 %v4319_v24, 0.0 }
 0x6cb   : > { %v4587_v57 = vpack.c.bf16 %v4471_v7, %v4467_v18  ;;  %v9729_v46 = vpack.c.bf16 %v4473_v32, %v4469_v26 }
 0x6cc   : > { %v4588_v15 = vpack.c.bf16 %v4472_v41, %v4468_v34  ;;  %v9731_v53 = vpack.c.bf16 %v4474_v43, %v4470_v6  ;;  %v4129_v63 = vpop.f32.mrb[140].mxu0  ;;  %v4322_v54 = vpop.f32.mrb[236].mxu1  ;;  %5239 = vmatpush1.bf16.msra.mxu0 %v9545_v50 }
 0x6cd   : > { %v4130_v44 = vadd.f32 %v4129_v63, %v9678_v10  ;;  %v4323_v0 = vadd.f32 %v4322_v54, %v9682_v1  ;;  %v4131_v37 = vpop.f32.mrb[141].mxu0  ;;  %v4324_v20 = vpop.f32.mrb[237].mxu1  ;;  %5240 = vmatprep.subr.bf16.mxu0 %v9548_v36 }
 0x6ce   : > { %v4132_v11 = vadd.f32 %v4131_v37, %v9685_v9  ;;  %v4325_v29 = vadd.f32 %v4324_v20, %v9689_v12  ;;  %v4133_v13 = vpop.f32.mrb[142].mxu0  ;;  %v4326_v35 = vpop.f32.mrb[238].mxu1  ;;  %5091 = vmatprep.mubr.bf16.mxu0 %v4588_v15 }
 0x6cf   : > { %v4134_v2 = vadd.f32 %v4133_v13, %v9678_v10  ;;  %v4327_v8 = vadd.f32 %v4326_v35, %v9682_v1  ;;  %v4135_v50 = vpop.f32.mrb[143].mxu0  ;;  %v4328_v48 = vpop.f32.mrb[239].mxu1  ;;  %5092 = vmatmul.mubr.bf16.gmra.mrb[200].mxu0 %v4587_v57  ;;  %v4475_v36 = vmax.f32 %v4130_v44, 0.0  ;;  %v4477_v22 = vmax.f32 %v4323_v0, 0.0 }
 0x6d0   : > { %v4136_v25 = vadd.f32 %v4135_v50, %v9685_v9  ;;  %v4329_v52 = vadd.f32 %v4328_v48, %v9689_v12  ;;  %5241 = vmatpush1.bf16.msra.mxu0 %v9552_v42  ;;  %v4476_v26 = vmax.f32 %v4132_v11, 0.0  ;;  %v4478_v7 = vmax.f32 %v4325_v29, 0.0 }
 0x6d1   : > { %v4479_v24 = vmax.f32 %v4134_v2, 0.0  ;;  %v4481_v18 = vmax.f32 %v4327_v8, 0.0  ;;  %5242 = vmatprep.subr.bf16.mxu0 %v9555_v47 }
 0x6d2   : > { %v4480_v32 = vmax.f32 %v4136_v25, 0.0  ;;  %v4482_v34 = vmax.f32 %v4329_v52, 0.0 }
 0x6d3   : > { %v4591_v6 = vpack.c.bf16 %v4479_v24, %v4475_v36  ;;  %v9745_v41 = vpack.c.bf16 %v4481_v18, %v4477_v22 }
 0x6d4   : > { %v4592_v43 = vpack.c.bf16 %v4480_v32, %v4476_v26  ;;  %v9747_v57 = vpack.c.bf16 %v4482_v34, %v4478_v7  ;;  %v4139_v15 = vpop.f32.mrb[144].mxu0  ;;  %v4332_v63 = vpop.f32.mrb[240].mxu1  ;;  %5243 = vmatpush1.bf16.msra.mxu0 %v9561_v62 }
 0x6d5   : > { %v4140_v42 = vadd.f32 %v4139_v15, %v9678_v10  ;;  %v4333_v54 = vadd.f32 %v4332_v63, %v9682_v1  ;;  %v4141_v44 = vpop.f32.mrb[145].mxu0  ;;  %v4334_v47 = vpop.f32.mrb[241].mxu1  ;;  %5244 = vmatprep.subr.bf16.mxu0 %v9564_v19 }
 0x6d6   : > { %v4142_v0 = vadd.f32 %v4141_v44, %v9685_v9  ;;  %v4335_v37 = vadd.f32 %v4334_v47, %v9689_v12  ;;  %v4143_v20 = vpop.f32.mrb[146].mxu0  ;;  %v4336_v11 = vpop.f32.mrb[242].mxu1  ;;  %5101 = vmatprep.mubr.bf16.mxu0 %v4592_v43 }
 0x6d7   : > { %v4144_v29 = vadd.f32 %v4143_v20, %v9678_v10  ;;  %v4337_v13 = vadd.f32 %v4336_v11, %v9682_v1  ;;  %v4145_v62 = vpop.f32.mrb[147].mxu0  ;;  %v4338_v35 = vpop.f32.mrb[243].mxu1  ;;  %5102 = vmatmul.mubr.bf16.gmra.mrb[204].mxu0 %v4591_v6  ;;  %v4483_v19 = vmax.f32 %v4140_v42, 0.0  ;;  %v4485_v50 = vmax.f32 %v4333_v54, 0.0 }
 0x6d8   : > { %v4146_v2 = vadd.f32 %v4145_v62, %v9685_v9  ;;  %v4339_v8 = vadd.f32 %v4338_v35, %v9689_v12  ;;  %5245 = vmatpush1.bf16.msra.mxu0 %v9568_v33  ;;  %v4484_v52 = vmax.f32 %v4142_v0, 0.0  ;;  %v4486_v36 = vmax.f32 %v4335_v37, 0.0 }
 0x6d9   : > { %v4487_v48 = vmax.f32 %v4144_v29, 0.0  ;;  %v4489_v25 = vmax.f32 %v4337_v13, 0.0  ;;  %5246 = vmatprep.subr.bf16.mxu0 %v9606_v40 }
 0x6da   : > { %v4488_v22 = vmax.f32 %v4146_v2, 0.0  ;;  %v4490_v24 = vmax.f32 %v4339_v8, 0.0 }
 0x6db   : > { %v4595_v18 = vpack.c.bf16 %v4487_v48, %v4483_v19  ;;  %v4597_v26 = vpack.c.bf16 %v4489_v25, %v4485_v50 }
 0x6dc   : > { %v4596_v7 = vpack.c.bf16 %v4488_v22, %v4484_v52  ;;  %v4598_v32 = vpack.c.bf16 %v4490_v24, %v4486_v36  ;;  %v4149_v34 = vpop.f32.mrb[148].mxu0  ;;  %v4342_v6 = vpop.f32.mrb[244].mxu1  ;;  %5247 = vmatpush1.bf16.msra.mxu0 %v9609_v39 }
 0x6dd   : > { %v4150_v33 = vadd.f32 %v4149_v34, %v9678_v10  ;;  %v4343_v43 = vadd.f32 %v4342_v6, %v9682_v1  ;;  %v4151_v15 = vpop.f32.mrb[149].mxu0  ;;  %v4344_v63 = vpop.f32.mrb[245].mxu1  ;;  %5248 = vmatprep.subr.bf16.mxu0 %v9614_v17 }
 0x6de   : > { %v4152_v40 = vadd.f32 %v4151_v15, %v9685_v9  ;;  %v4345_v42 = vadd.f32 %v4344_v63, %v9689_v12  ;;  %v4153_v54 = vpop.f32.mrb[150].mxu0  ;;  %v4346_v44 = vpop.f32.mrb[246].mxu1  ;;  %5111 = vmatprep.mubr.bf16.mxu0 %v4596_v7  ;;  %5304 = vmatprep.mubr.bf16.mxu1 %v4598_v32 }
 0x6df   : > { %v4154_v47 = vadd.f32 %v4153_v54, %v9678_v10  ;;  %v4347_v39 = vadd.f32 %v4346_v44, %v9682_v1  ;;  %v4155_v0 = vpop.f32.mrb[151].mxu0  ;;  %v4348_v37 = vpop.f32.mrb[247].mxu1  ;;  %5112 = vmatmul.mubr.bf16.gmra.mrb[208].mxu0 %v4595_v18  ;;  %5305 = vmatmul.mubr.bf16.vlgmr.msra.gmra.mrb[32].mxu1 %v4597_v26  ;;  %v4491_v11 = vmax.f32 %v4150_v33, 0.0  ;;  %v4493_v29 = vmax.f32 %v4343_v43, 0.0 }
 0x6e0   : > { %v4156_v20 = vadd.f32 %v4155_v0, %v9685_v9  ;;  %v4349_v17 = vadd.f32 %v4348_v37, %v9689_v12  ;;  %5249 = vmatpush1.bf16.msra.mxu0 %v9616_v58  ;;  %v4492_v35 = vmax.f32 %v4152_v40, 0.0  ;;  %v4494_v2 = vmax.f32 %v4345_v42, 0.0 }
 0x6e1   : > { %v4495_v13 = vmax.f32 %v4154_v47, 0.0  ;;  %v4497_v62 = vmax.f32 %v4347_v39, 0.0  ;;  %5250 = vmatprep.subr.bf16.mxu0 %v9622_v55 }
 0x6e2   : > { %v4496_v8 = vmax.f32 %v4156_v20, 0.0  ;;  %v4498_v19 = vmax.f32 %v4349_v17, 0.0 }
 0x6e3   : > { %v4599_v50 = vpack.c.bf16 %v4495_v13, %v4491_v11  ;;  %v4601_v48 = vpack.c.bf16 %v4497_v62, %v4493_v29 }
 0x6e4   : > { %v4600_v25 = vpack.c.bf16 %v4496_v8, %v4492_v35  ;;  %v4602_v52 = vpack.c.bf16 %v4498_v19, %v4494_v2  ;;  %v4159_v36 = vpop.f32.mrb[152].mxu0  ;;  %v4352_v22 = vpop.f32.mrb[248].mxu1  ;;  %5251 = vmatpush1.bf16.msra.mxu0 %v9626_v38 }
 0x6e5   : > { %v4160_v58 = vadd.f32 %v4159_v36, %v9678_v10  ;;  %v4353_v24 = vadd.f32 %v4352_v22, %v9682_v1  ;;  %v4161_v18 = vpop.f32.mrb[153].mxu0  ;;  %v4354_v26 = vpop.f32.mrb[249].mxu1  ;;  %5252 = vmatprep.subr.bf16.mxu0 %v9629_v56 }
 0x6e6   : > { %v4162_v55 = vadd.f32 %v4161_v18, %v9685_v9  ;;  %v4355_v7 = vadd.f32 %v4354_v26, %v9689_v12  ;;  %v4163_v32 = vpop.f32.mrb[154].mxu0  ;;  %v4356_v34 = vpop.f32.mrb[250].mxu1  ;;  %5121 = vmatprep.mubr.bf16.mxu0 %v4600_v25  ;;  %5314 = vmatprep.mubr.bf16.mxu1 %v4602_v52 }
 0x6e7   : > { %v4164_v6 = vadd.f32 %v4163_v32, %v9678_v10  ;;  %v4357_v38 = vadd.f32 %v4356_v34, %v9682_v1  ;;  %v4165_v33 = vpop.f32.mrb[155].mxu0  ;;  %v4358_v43 = vpop.f32.mrb[251].mxu1  ;;  %5122 = vmatmul.mubr.bf16.gmra.mrb[212].mxu0 %v4599_v50  ;;  %5315 = vmatmul.mubr.bf16.gmra.mrb[36].mxu1 %v4601_v48  ;;  %v4499_v63 = vmax.f32 %v4160_v58, 0.0  ;;  %v4501_v40 = vmax.f32 %v4353_v24, 0.0 }
 0x6e8   : > { %v4166_v15 = vadd.f32 %v4165_v33, %v9685_v9  ;;  %v4359_v56 = vadd.f32 %v4358_v43, %v9689_v12  ;;  %5253 = vmatpush1.bf16.msra.mxu0 %v9632_v59  ;;  %v4500_v44 = vmax.f32 %v4162_v55, 0.0  ;;  %v4502_v47 = vmax.f32 %v4355_v7, 0.0 }
 0x6e9   : > { %v4503_v42 = vmax.f32 %v4164_v6, 0.0  ;;  %v4505_v54 = vmax.f32 %v4357_v38, 0.0  ;;  %5254 = vmatprep.subr.bf16.mxu0 %v9638_v16 }
 0x6ea   : > { %v4504_v39 = vmax.f32 %v4166_v15, 0.0  ;;  %v4506_v0 = vmax.f32 %v4359_v56, 0.0 }
 0x6eb   : > { %v4603_v37 = vpack.c.bf16 %v4503_v42, %v4499_v63  ;;  %v4605_v20 = vpack.c.bf16 %v4505_v54, %v4501_v40 }
 0x6ec   : > { %v4604_v17 = vpack.c.bf16 %v4504_v39, %v4500_v44  ;;  %v4606_v11 = vpack.c.bf16 %v4506_v0, %v4502_v47  ;;  %v4169_v29 = vpop.f32.mrb[156].mxu0  ;;  %v4362_v13 = vpop.f32.mrb[252].mxu1  ;;  %5255 = vmatpush1.bf16.msra.mxu0 %v9642_v21 }
 0x6ed   : > { %v4170_v59 = vadd.f32 %v4169_v29, %v9678_v10  ;;  %v4363_v62 = vadd.f32 %v4362_v13, %v9682_v1  ;;  %v4171_v35 = vpop.f32.mrb[157].mxu0  ;;  %v4364_v2 = vpop.f32.mrb[253].mxu1  ;;  %5256 = vmatprep.subr.bf16.mxu0 %v9645_v60 }
 0x6ee   : > { %v4172_v16 = vadd.f32 %v4171_v35, %v9685_v9  ;;  %v4365_v8 = vadd.f32 %v4364_v2, %v9689_v12  ;;  %v4173_v19 = vpop.f32.mrb[158].mxu0  ;;  %v4366_v50 = vpop.f32.mrb[254].mxu1  ;;  %5131 = vmatprep.mubr.bf16.mxu0 %v4604_v17  ;;  %5324 = vmatprep.mubr.bf16.mxu1 %v4606_v11 }
 0x6ef   : > { %v4174_v48 = vadd.f32 %v4173_v19, %v9678_v10  ;;  %v4367_v21 = vadd.f32 %v4366_v50, %v9682_v1  ;;  %v4175_v25 = vpop.f32.mrb[159].mxu0  ;;  %v4368_v52 = vpop.f32.mrb[255].mxu1  ;;  %5132 = vmatmul.mubr.bf16.gmra.mrb[216].mxu0 %v4603_v37  ;;  %5325 = vmatmul.mubr.bf16.gmra.mrb[40].mxu1 %v4605_v20  ;;  %v4507_v22 = vmax.f32 %v4170_v59, 0.0  ;;  %v4509_v58 = vmax.f32 %v4363_v62, 0.0 }
 0x6f0   : > { %v4176_v36 = vadd.f32 %v4175_v25, %v9685_v9  ;;  %v4369_v60 = vadd.f32 %v4368_v52, %v9689_v12  ;;  %5257 = vmatpush1.bf16.msra.mxu0 %v9648_v23  ;;  %v4508_v26 = vmax.f32 %v4172_v16, 0.0  ;;  %v4510_v55 = vmax.f32 %v4365_v8, 0.0 }
 0x6f1   : > { %v4511_v24 = vmax.f32 %v4174_v48, 0.0  ;;  %v4513_v18 = vmax.f32 %v4367_v21, 0.0  ;;  %5258 = vmatprep.subr.bf16.mxu0 %v9654_v27 }
 0x6f2   : > { %v4512_v7 = vmax.f32 %v4176_v36, 0.0  ;;  %v4514_v32 = vmax.f32 %v4369_v60, 0.0 }
 0x6f3   : > { %v4607_v34 = vpack.c.bf16 %v4511_v24, %v4507_v22  ;;  %v4609_v6 = vpack.c.bf16 %v4513_v18, %v4509_v58 }
 0x6f4   : > { %v4608_v38 = vpack.c.bf16 %v4512_v7, %v4508_v26  ;;  %v4610_v33 = vpack.c.bf16 %v4514_v32, %v4510_v55  ;;  %v4179_v43 = vpop.f32.mrb[160].mxu0  ;;  %v4372_v15 = vpop.f32.mrb[0].mxu1  ;;  %5259 = vmatpush1.bf16.msra.mxu0 %v9658_v31 }
 0x6f5   : > { %v4180_v23 = vadd.f32 %v4179_v43, %v9678_v10  ;;  %v4373_v56 = vadd.f32 %v4372_v15, %v9682_v1  ;;  %v4181_v63 = vpop.f32.mrb[161].mxu0  ;;  %v4374_v40 = vpop.f32.mrb[1].mxu1  ;;  %5260 = vmatprep.subr.bf16.mxu0 %v9661_v49 }
 0x6f6   : > { %v4182_v27 = vadd.f32 %v4181_v63, %v9685_v9  ;;  %v4375_v42 = vadd.f32 %v4374_v40, %v9689_v12  ;;  %v4183_v54 = vpop.f32.mrb[162].mxu0  ;;  %v4376_v44 = vpop.f32.mrb[2].mxu1  ;;  %5141 = vmatprep.mubr.bf16.mxu0 %v4608_v38  ;;  %5334 = vmatprep.mubr.bf16.mxu1 %v4610_v33 }
 0x6f7   : > { %v4184_v47 = vadd.f32 %v4183_v54, %v9678_v10  ;;  %v4377_v31 = vadd.f32 %v4376_v44, %v9682_v1  ;;  %v4185_v39 = vpop.f32.mrb[163].mxu0  ;;  %v4378_v0 = vpop.f32.mrb[3].mxu1  ;;  %5142 = vmatmul.mubr.bf16.gmra.mrb[220].mxu0 %v4607_v34  ;;  %5335 = vmatmul.mubr.bf16.gmra.mrb[44].mxu1 %v4609_v6  ;;  %v4515_v20 = vmax.f32 %v4180_v23, 0.0  ;;  %v4517_v17 = vmax.f32 %v4373_v56, 0.0 }
 0x6f8   : > { %v4186_v37 = vadd.f32 %v4185_v39, %v9685_v9  ;;  %v4379_v49 = vadd.f32 %v4378_v0, %v9689_v12  ;;  %5261 = vmatpush1.bf16.msra.mxu0 %v9664_v51  ;;  %v4516_v13 = vmax.f32 %v4182_v27, 0.0  ;;  %v4518_v59 = vmax.f32 %v4375_v42, 0.0 }
 0x6f9   : > { %v4519_v11 = vmax.f32 %v4184_v47, 0.0  ;;  %v4521_v29 = vmax.f32 %v4377_v31, 0.0  ;;  %5262 = vmatprep.subr.bf16.mxu0 %v9667_v30 }
 0x6fa   : > { %v4520_v62 = vmax.f32 %v4186_v37, 0.0  ;;  %v4522_v35 = vmax.f32 %v4379_v49, 0.0 }
 0x6fb   : > { %v4611_v2 = vpack.c.bf16 %v4519_v11, %v4515_v20  ;;  %v4613_v16 = vpack.c.bf16 %v4521_v29, %v4517_v17 }
 0x6fc   : > { %v4612_v8 = vpack.c.bf16 %v4520_v62, %v4516_v13  ;;  %v4614_v19 = vpack.c.bf16 %v4522_v35, %v4518_v59  ;;  %v4189_v50 = vpop.f32.mrb[164].mxu0  ;;  %v4382_v48 = vpop.f32.mrb[4].mxu1  ;;  %5263 = vmatpush1.bf16.msra.mxu0 %v9670_v4 }
 0x6fd   : > { %v4190_v51 = vadd.f32 %v4189_v50, %v9678_v10  ;;  %v4383_v21 = vadd.f32 %v4382_v48, %v9682_v1  ;;  %v4191_v25 = vpop.f32.mrb[165].mxu0  ;;  %v4384_v52 = vpop.f32.mrb[5].mxu1 }
 0x6fe   : > { %v4192_v30 = vadd.f32 %v4191_v25, %v9685_v9  ;;  %v4385_v36 = vadd.f32 %v4384_v52, %v9689_v12  ;;  %v4193_v60 = vpop.f32.mrb[166].mxu0  ;;  %v4386_v22 = vpop.f32.mrb[6].mxu1  ;;  %5151 = vmatprep.mubr.bf16.mxu0 %v4612_v8  ;;  %5344 = vmatprep.mubr.bf16.mxu1 %v4614_v19 }
 0x6ff   : > { %v4194_v58 = vadd.f32 %v4193_v60, %v9678_v10  ;;  %v4387_v24 = vadd.f32 %v4386_v22, %v9682_v1  ;;  %v4195_v18 = vpop.f32.mrb[167].mxu0  ;;  %v4388_v4 = vpop.f32.mrb[7].mxu1  ;;  %5152 = vmatmul.mubr.bf16.gmra.mrb[224].mxu0 %v4611_v2  ;;  %5345 = vmatmul.mubr.bf16.gmra.mrb[48].mxu1 %v4613_v16  ;;  %v4523_v7 = vmax.f32 %v4190_v51, 0.0  ;;  %v4525_v32 = vmax.f32 %v4383_v21, 0.0 }
 0x700   : > { %v4196_v26 = vadd.f32 %v4195_v18, %v9685_v9  ;;  %v4389_v55 = vadd.f32 %v4388_v4, %v9689_v12  ;;  %v4524_v38 = vmax.f32 %v4192_v30, 0.0  ;;  %v4526_v33 = vmax.f32 %v4385_v36, 0.0 }
 0x701   : > { %v4527_v34 = vmax.f32 %v4194_v58, 0.0  ;;  %v4529_v6 = vmax.f32 %v4387_v24, 0.0 }
 0x702   : > { %v4528_v43 = vmax.f32 %v4196_v26, 0.0  ;;  %v4530_v15 = vmax.f32 %v4389_v55, 0.0 }
 0x703   : > { %v4615_v23 = vpack.c.bf16 %v4527_v34, %v4523_v7  ;;  %v4617_v56 = vpack.c.bf16 %v4529_v6, %v4525_v32 }
 0x704   : > { %v4616_v63 = vpack.c.bf16 %v4528_v43, %v4524_v38  ;;  %v4618_v40 = vpack.c.bf16 %v4530_v15, %v4526_v33  ;;  %v4199_v27 = vpop.f32.mrb[168].mxu0  ;;  %v4392_v42 = vpop.f32.mrb[8].mxu1 }
 0x705   : > { %v4200_v54 = vadd.f32 %v4199_v27, %v9678_v10  ;;  %v4393_v44 = vadd.f32 %v4392_v42, %v9682_v1  ;;  %v4201_v47 = vpop.f32.mrb[169].mxu0  ;;  %v4394_v31 = vpop.f32.mrb[9].mxu1 }
 0x706   : > { %v4202_v39 = vadd.f32 %v4201_v47, %v9685_v9  ;;  %v4395_v0 = vadd.f32 %v4394_v31, %v9689_v12  ;;  %v4203_v37 = vpop.f32.mrb[170].mxu0  ;;  %v4396_v49 = vpop.f32.mrb[10].mxu1  ;;  %5161 = vmatprep.mubr.bf16.mxu0 %v4616_v63  ;;  %5354 = vmatprep.mubr.bf16.mxu1 %v4618_v40 }
 0x707   : > { %v4204_v20 = vadd.f32 %v4203_v37, %v9678_v10  ;;  %v4397_v17 = vadd.f32 %v4396_v49, %v9682_v1  ;;  %v4205_v11 = vpop.f32.mrb[171].mxu0  ;;  %v4398_v29 = vpop.f32.mrb[11].mxu1  ;;  %5162 = vmatmul.mubr.bf16.gmra.mrb[228].mxu0 %v4615_v23  ;;  %5355 = vmatmul.mubr.bf16.gmra.mrb[52].mxu1 %v4617_v56  ;;  %v4531_v62 = vmax.f32 %v4200_v54, 0.0  ;;  %v4533_v35 = vmax.f32 %v4393_v44, 0.0 }
 0x708   : > { %v4206_v13 = vadd.f32 %v4205_v11, %v9685_v9  ;;  %v4399_v59 = vadd.f32 %v4398_v29, %v9689_v12  ;;  %v4532_v8 = vmax.f32 %v4202_v39, 0.0  ;;  %v4534_v19 = vmax.f32 %v4395_v0, 0.0 }
 0x709   : > { %v4535_v2 = vmax.f32 %v4204_v20, 0.0  ;;  %v4537_v16 = vmax.f32 %v4397_v17, 0.0 }
 0x70a   : > { %v4536_v50 = vmax.f32 %v4206_v13, 0.0  ;;  %v4538_v48 = vmax.f32 %v4399_v59, 0.0 }
 0x70b   : > { %v4619_v51 = vpack.c.bf16 %v4535_v2, %v4531_v62  ;;  %v4621_v21 = vpack.c.bf16 %v4537_v16, %v4533_v35 }
 0x70c   : > { %v4620_v25 = vpack.c.bf16 %v4536_v50, %v4532_v8  ;;  %v4622_v52 = vpack.c.bf16 %v4538_v48, %v4534_v19  ;;  %v4209_v30 = vpop.f32.mrb[172].mxu0  ;;  %v4402_v36 = vpop.f32.mrb[12].mxu1 }
 0x70d   : > { %v4210_v60 = vadd.f32 %v4209_v30, %v9678_v10  ;;  %v4403_v22 = vadd.f32 %v4402_v36, %v9682_v1  ;;  %v4211_v58 = vpop.f32.mrb[173].mxu0  ;;  %v4404_v24 = vpop.f32.mrb[13].mxu1 }
 0x70e   : > { %v4212_v18 = vadd.f32 %v4211_v58, %v9685_v9  ;;  %v4405_v4 = vadd.f32 %v4404_v24, %v9689_v12  ;;  %v4213_v26 = vpop.f32.mrb[174].mxu0  ;;  %v4406_v55 = vpop.f32.mrb[14].mxu1  ;;  %5171 = vmatprep.mubr.bf16.mxu0 %v4620_v25  ;;  %5364 = vmatprep.mubr.bf16.mxu1 %v4622_v52 }
 0x70f   : > { %v4214_v7 = vadd.f32 %v4213_v26, %v9678_v10  ;;  %v4407_v32 = vadd.f32 %v4406_v55, %v9682_v1  ;;  %v4215_v34 = vpop.f32.mrb[175].mxu0  ;;  %v4408_v6 = vpop.f32.mrb[15].mxu1  ;;  %5172 = vmatmul.mubr.bf16.gmra.mrb[232].mxu0 %v4619_v51  ;;  %5365 = vmatmul.mubr.bf16.gmra.mrb[56].mxu1 %v4621_v21  ;;  %v4539_v43 = vmax.f32 %v4210_v60, 0.0  ;;  %v4541_v15 = vmax.f32 %v4403_v22, 0.0 }
 0x710   : > { %v4216_v38 = vadd.f32 %v4215_v34, %v9685_v9  ;;  %v4409_v33 = vadd.f32 %v4408_v6, %v9689_v12  ;;  %v4540_v63 = vmax.f32 %v4212_v18, 0.0  ;;  %v4542_v40 = vmax.f32 %v4405_v4, 0.0 }
 0x711   : > { %v4543_v23 = vmax.f32 %v4214_v7, 0.0  ;;  %v4545_v56 = vmax.f32 %v4407_v32, 0.0 }
 0x712   : > { %v4544_v27 = vmax.f32 %v4216_v38, 0.0  ;;  %v4546_v42 = vmax.f32 %v4409_v33, 0.0 }
 0x713   : > { %v4623_v54 = vpack.c.bf16 %v4543_v23, %v4539_v43  ;;  %v4625_v44 = vpack.c.bf16 %v4545_v56, %v4541_v15 }
 0x714   : > { %v4624_v47 = vpack.c.bf16 %v4544_v27, %v4540_v63  ;;  %v4626_v31 = vpack.c.bf16 %v4546_v42, %v4542_v40  ;;  %v4219_v39 = vpop.f32.mrb[176].mxu0  ;;  %v4412_v0 = vpop.f32.mrb[16].mxu1 }
 0x715   : > { %v4220_v37 = vadd.f32 %v4219_v39, %v9678_v10  ;;  %v4413_v49 = vadd.f32 %v4412_v0, %v9682_v1  ;;  %v4221_v20 = vpop.f32.mrb[177].mxu0  ;;  %v4414_v17 = vpop.f32.mrb[17].mxu1 }
 0x716   : > { %v4222_v11 = vadd.f32 %v4221_v20, %v9685_v9  ;;  %v4415_v29 = vadd.f32 %v4414_v17, %v9689_v12  ;;  %v4223_v13 = vpop.f32.mrb[178].mxu0  ;;  %v4416_v59 = vpop.f32.mrb[18].mxu1  ;;  %5181 = vmatprep.mubr.bf16.mxu0 %v4624_v47  ;;  %5374 = vmatprep.mubr.bf16.mxu1 %v4626_v31 }
 0x717   : > { %v4224_v62 = vadd.f32 %v4223_v13, %v9678_v10  ;;  %v4417_v35 = vadd.f32 %v4416_v59, %v9682_v1  ;;  %v4225_v2 = vpop.f32.mrb[179].mxu0  ;;  %v4418_v16 = vpop.f32.mrb[19].mxu1  ;;  %5182 = vmatmul.mubr.bf16.gmra.mrb[236].mxu0 %v4623_v54  ;;  %5375 = vmatmul.mubr.bf16.gmra.mrb[60].mxu1 %v4625_v44  ;;  %v4547_v50 = vmax.f32 %v4220_v37, 0.0  ;;  %v4549_v48 = vmax.f32 %v4413_v49, 0.0 }
 0x718   : > { %v4226_v8 = vadd.f32 %v4225_v2, %v9685_v9  ;;  %v4419_v19 = vadd.f32 %v4418_v16, %v9689_v12  ;;  %v4548_v25 = vmax.f32 %v4222_v11, 0.0  ;;  %v4550_v52 = vmax.f32 %v4415_v29, 0.0 }
 0x719   : > { %v4551_v51 = vmax.f32 %v4224_v62, 0.0  ;;  %v4553_v21 = vmax.f32 %v4417_v35, 0.0 }
 0x71a   : > { %v4552_v30 = vmax.f32 %v4226_v8, 0.0  ;;  %v4554_v36 = vmax.f32 %v4419_v19, 0.0 }
 0x71b   : > { %v4627_v60 = vpack.c.bf16 %v4551_v51, %v4547_v50  ;;  %v4629_v22 = vpack.c.bf16 %v4553_v21, %v4549_v48 }
 0x71c   : > { %v4628_v58 = vpack.c.bf16 %v4552_v30, %v4548_v25  ;;  %v4630_v24 = vpack.c.bf16 %v4554_v36, %v4550_v52  ;;  %v4229_v18 = vpop.f32.mrb[180].mxu0  ;;  %v4422_v4 = vpop.f32.mrb[20].mxu1 }
 0x71d   : > { %v4230_v26 = vadd.f32 %v4229_v18, %v9678_v10  ;;  %v4423_v55 = vadd.f32 %v4422_v4, %v9682_v1  ;;  %v4231_v7 = vpop.f32.mrb[181].mxu0  ;;  %v4424_v32 = vpop.f32.mrb[21].mxu1 }
 0x71e   : > { %v4232_v34 = vadd.f32 %v4231_v7, %v9685_v9  ;;  %v4425_v6 = vadd.f32 %v4424_v32, %v9689_v12  ;;  %v4233_v38 = vpop.f32.mrb[182].mxu0  ;;  %v4426_v33 = vpop.f32.mrb[22].mxu1  ;;  %5191 = vmatprep.mubr.bf16.mxu0 %v4628_v58  ;;  %5384 = vmatprep.mubr.bf16.mxu1 %v4630_v24 }
 0x71f   : > { %v4234_v43 = vadd.f32 %v4233_v38, %v9678_v10  ;;  %v4427_v15 = vadd.f32 %v4426_v33, %v9682_v1  ;;  %v4235_v23 = vpop.f32.mrb[183].mxu0  ;;  %v4428_v56 = vpop.f32.mrb[23].mxu1  ;;  %5192 = vmatmul.mubr.bf16.gmra.mrb[240].mxu0 %v4627_v60  ;;  %5385 = vmatmul.mubr.bf16.gmra.mrb[64].mxu1 %v4629_v22  ;;  %v4555_v27 = vmax.f32 %v4230_v26, 0.0  ;;  %v4557_v42 = vmax.f32 %v4423_v55, 0.0 }
 0x720   : > { %v4236_v63 = vadd.f32 %v4235_v23, %v9685_v9  ;;  %v4429_v40 = vadd.f32 %v4428_v56, %v9689_v12  ;;  %v4556_v47 = vmax.f32 %v4232_v34, 0.0  ;;  %v4558_v31 = vmax.f32 %v4425_v6, 0.0 }
 0x721   : > { %v4559_v54 = vmax.f32 %v4234_v43, 0.0  ;;  %v4561_v44 = vmax.f32 %v4427_v15, 0.0 }
 0x722   : > { %v4560_v39 = vmax.f32 %v4236_v63, 0.0  ;;  %v4562_v0 = vmax.f32 %v4429_v40, 0.0 }
 0x723   : > { %v4631_v37 = vpack.c.bf16 %v4559_v54, %v4555_v27  ;;  %v4633_v49 = vpack.c.bf16 %v4561_v44, %v4557_v42 }
 0x724   : > { %v4632_v20 = vpack.c.bf16 %v4560_v39, %v4556_v47  ;;  %v4634_v17 = vpack.c.bf16 %v4562_v0, %v4558_v31  ;;  %v4239_v11 = vpop.f32.mrb[184].mxu0  ;;  %v4432_v29 = vpop.f32.mrb[24].mxu1 }
 0x725   : > { %v4240_v13 = vadd.f32 %v4239_v11, %v9678_v10  ;;  %v4433_v59 = vadd.f32 %v4432_v29, %v9682_v1  ;;  %v4241_v62 = vpop.f32.mrb[185].mxu0  ;;  %v4434_v35 = vpop.f32.mrb[25].mxu1 }
 0x726   : > { %v4242_v2 = vadd.f32 %v4241_v62, %v9685_v9  ;;  %v4435_v16 = vadd.f32 %v4434_v35, %v9689_v12  ;;  %v4243_v8 = vpop.f32.mrb[186].mxu0  ;;  %v4436_v19 = vpop.f32.mrb[26].mxu1  ;;  %5201 = vmatprep.mubr.bf16.mxu0 %v4632_v20  ;;  %5394 = vmatprep.mubr.bf16.mxu1 %v4634_v17 }
 0x727   : > { %v4244_v50 = vadd.f32 %v4243_v8, %v9678_v10  ;;  %v4437_v48 = vadd.f32 %v4436_v19, %v9682_v1  ;;  %v4245_v51 = vpop.f32.mrb[187].mxu0  ;;  %v4438_v21 = vpop.f32.mrb[27].mxu1  ;;  %5202 = vmatmul.mubr.bf16.gmra.mrb[244].mxu0 %v4631_v37  ;;  %5395 = vmatmul.mubr.bf16.gmra.mrb[68].mxu1 %v4633_v49  ;;  %v4563_v30 = vmax.f32 %v4240_v13, 0.0  ;;  %v4565_v36 = vmax.f32 %v4433_v59, 0.0 }
 0x728   : > { %v4246_v25 = vadd.f32 %v4245_v51, %v9685_v9  ;;  %v4439_v52 = vadd.f32 %v4438_v21, %v9689_v12  ;;  %v4564_v58 = vmax.f32 %v4242_v2, 0.0  ;;  %v4566_v24 = vmax.f32 %v4435_v16, 0.0 }
 0x729   : > { %v4567_v60 = vmax.f32 %v4244_v50, 0.0  ;;  %v4569_v22 = vmax.f32 %v4437_v48, 0.0 }
 0x72a   : > { %v4568_v18 = vmax.f32 %v4246_v25, 0.0  ;;  %v4570_v4 = vmax.f32 %v4439_v52, 0.0 }
 0x72b   : > { %v4635_v26 = vpack.c.bf16 %v4567_v60, %v4563_v30  ;;  %v4637_v55 = vpack.c.bf16 %v4569_v22, %v4565_v36 }
 0x72c   : > { %v4636_v7 = vpack.c.bf16 %v4568_v18, %v4564_v58  ;;  %v4638_v32 = vpack.c.bf16 %v4570_v4, %v4566_v24  ;;  %v4249_v34 = vpop.f32.mrb[188].mxu0  ;;  %v4442_v6 = vpop.f32.mrb[28].mxu1 }
 0x72d   : > { %v4250_v38 = vadd.f32 %v4249_v34, %v9678_v10  ;;  %v4443_v33 = vadd.f32 %v4442_v6, %v9682_v1  ;;  %v4251_v43 = vpop.f32.mrb[189].mxu0  ;;  %v4444_v15 = vpop.f32.mrb[29].mxu1 }
 0x72e   : > { %v4252_v23 = vadd.f32 %v4251_v43, %v9685_v9  ;;  %v4445_v56 = vadd.f32 %v4444_v15, %v9689_v12  ;;  %v4253_v63 = vpop.f32.mrb[190].mxu0  ;;  %v4446_v40 = vpop.f32.mrb[30].mxu1  ;;  %5211 = vmatprep.mubr.bf16.mxu0 %v4636_v7  ;;  %5404 = vmatprep.mubr.bf16.mxu1 %v4638_v32 }
 0x72f   : > { %v4254_v27 = vadd.f32 %v4253_v63, %v9678_v10  ;;  %v4447_v42 = vadd.f32 %v4446_v40, %v9682_v1  ;;  %v4255_v54 = vpop.f32.mrb[191].mxu0  ;;  %v4448_v44 = vpop.f32.mrb[31].mxu1  ;;  %5212 = vmatmul.mubr.bf16.gmra.mrb[248].mxu0 %v4635_v26  ;;  %5405 = vmatmul.mubr.bf16.gmra.mrb[72].mxu1 %v4637_v55  ;;  %v4571_v39 = vmax.f32 %v4250_v38, 0.0  ;;  %v4573_v0 = vmax.f32 %v4443_v33, 0.0 }
 0x730   : > { %v4256_v47 = vadd.f32 %v4255_v54, %v9685_v9  ;;  %v4449_v31 = vadd.f32 %v4448_v44, %v9689_v12  ;;  %v4572_v20 = vmax.f32 %v4252_v23, 0.0  ;;  %v4574_v17 = vmax.f32 %v4445_v56, 0.0  ;;  %v4707_v9 = vld [vmem:[%s10053_s14] sm:$0x3] }
 0x731   : > { %v4575_v37 = vmax.f32 %v4254_v27, 0.0  ;;  %v4577_v49 = vmax.f32 %v4447_v42, 0.0  ;;  %v9878_v12 = vrot.slane %v4707_v9, %v8823_v3 }
 0x732   : > { %v4576_v11 = vmax.f32 %v4256_v47, 0.0  ;;  %v4578_v29 = vmax.f32 %v4449_v31, 0.0 }
 0x733   : > { %v4639_v13 = vpack.c.bf16 %v4575_v37, %v4571_v39  ;;  %v4641_v10 = vpack.c.bf16 %v4577_v49, %v4573_v0 }
 0x734   : > { %v4640_v59 = vpack.c.bf16 %v4576_v11, %v4572_v20  ;;  %v4642_v1 = vpack.c.bf16 %v4578_v29, %v4574_v17 }
 0x736   : > { %5221 = vmatprep.mubr.bf16.mxu0 %v4640_v59  ;;  %5414 = vmatprep.mubr.bf16.mxu1 %v4642_v1 }
 0x737   : > { %5222 = vmatmul.mubr.bf16.gmra.mrb[252].mxu0 %v4639_v13  ;;  %5415 = vmatmul.mubr.bf16.gmra.mrb[76].mxu1 %v4641_v10 }
 0x738   : > { %5264 = vmatprep.mubr.bf16.mxu0 %v9701_v14 }
 0x73f   : > { %5265 = vmatmul.mubr.bf16.vlgmr.msra.gmra.mrb[192].mxu0 %v9699_v28  ;;  %v9881_v28 = vrot.slane %v4707_v9, %v8828_v5 }
 0x740   : > { %5274 = vmatprep.mubr.bf16.mxu0 %v9715_v45 }
 0x747   : > { %5275 = vmatmul.mubr.bf16.gmra.mrb[196].mxu0 %v9713_v61 }
 0x748   : > { %5284 = vmatprep.mubr.bf16.mxu0 %v9731_v53 }
 0x74f   : > { %5285 = vmatmul.mubr.bf16.gmra.mrb[200].mxu0 %v9729_v46 }
 0x750   : > { %5294 = vmatprep.mubr.bf16.mxu0 %v9747_v57 }
 0x757   : > { %5295 = vmatmul.mubr.bf16.gmra.mrb[204].mxu0 %v9745_v41 }
 0x7b2   : > { %v5113_v14 = vpop.f32.mrb[208].mxu0  ;;  %v5306_v61 = vpop.f32.mrb[32].mxu1 }
 0x7b3   : > { %v5114_v45 = vadd.f32 %v5113_v14, %v9878_v12  ;;  %v5115_v53 = vpop.f32.mrb[209].mxu0  ;;  %v5308_v46 = vpop.f32.mrb[33].mxu1 }
 0x7b4   : > { %v5116_v57 = vadd.f32 %v5115_v53, %v9881_v28  ;;  %v5117_v62 = vpop.f32.mrb[210].mxu0  ;;  %v5310_v41 = vpop.f32.mrb[34].mxu1 }
 0x7b5   : > { %v5307_v35 = vadd.f32 %v5306_v61, %v5114_v45  ;;  %v5118_v2 = vadd.f32 %v5117_v62, %v9878_v12  ;;  %v5119_v16 = vpop.f32.mrb[211].mxu0  ;;  %v5312_v8 = vpop.f32.mrb[35].mxu1 }
 0x7b6   : > { %v5309_v3 = vadd.f32 %v5308_v46, %v5116_v57  ;;  %v5120_v19 = vadd.f32 %v5119_v16, %v9881_v28 }
 0x7b7   : > { %v5441_v5 = vsub.f32 0.0, %v5307_v35  ;;  %v5311_v50 = vadd.f32 %v5310_v41, %v5118_v2 }
 0x7b8   : > { %v5442_v48 = vsub.f32 0.0, %v5309_v3  ;;  %v5313_v51 = vadd.f32 %v5312_v8, %v5120_v19 }
 0x7b9   : > { %v5521_v21 = vmul.f32 1.442695, %v5441_v5  ;;  %v5443_v25 = vsub.f32 0.0, %v5311_v50 }
 0x7ba   : > { %v5523_v52 = vmul.f32 1.442695, %v5442_v48  ;;  %v5444_v30 = vsub.f32 0.0, %v5313_v51  ;;  %v5123_v36 = vpop.f32.mrb[212].mxu0  ;;  %v5316_v60 = vpop.f32.mrb[36].mxu1 }
 0x7bb   : > { %7652 = vpow2.f32 %v5521_v21  ;;  %v5525_v22 = vmul.f32 1.442695, %v5443_v25  ;;  %v5124_v58 = vadd.f32 %v5123_v36, %v9878_v12  ;;  %v5125_v24 = vpop.f32.mrb[213].mxu0  ;;  %v5318_v18 = vpop.f32.mrb[37].mxu1 }
 0x7bc   : > { %7654 = vpow2.f32 %v5523_v52  ;;  %v5527_v4 = vmul.f32 1.442695, %v5444_v30  ;;  %v5126_v26 = vadd.f32 %v5125_v24, %v9881_v28  ;;  %v5127_v55 = vpop.f32.mrb[214].mxu0  ;;  %v5320_v7 = vpop.f32.mrb[38].mxu1 }
 0x7bd   : > { %7656 = vpow2.f32 %v5525_v22  ;;  %v5317_v32 = vadd.f32 %v5316_v60, %v5124_v58  ;;  %v5128_v34 = vadd.f32 %v5127_v55, %v9878_v12  ;;  %v5129_v6 = vpop.f32.mrb[215].mxu0  ;;  %v5322_v38 = vpop.f32.mrb[39].mxu1 }
 0x7be   : > { %7658 = vpow2.f32 %v5527_v4  ;;  %v5319_v33 = vadd.f32 %v5318_v18, %v5126_v26  ;;  %v5130_v43 = vadd.f32 %v5129_v6, %v9881_v28 }
 0x7bf   : > { %v5445_v15 = vsub.f32 0.0, %v5317_v32  ;;  %v5321_v23 = vadd.f32 %v5320_v7, %v5128_v34 }
 0x7c0   : > { %v5446_v56 = vsub.f32 0.0, %v5319_v33  ;;  %v5323_v63 = vadd.f32 %v5322_v38, %v5130_v43 }
 0x7c1   : > { %v5529_v40 = vmul.f32 1.442695, %v5445_v15  ;;  %v5447_v27 = vsub.f32 0.0, %v5321_v23 }
 0x7c2   : > { %v5531_v42 = vmul.f32 1.442695, %v5446_v56  ;;  %v5448_v54 = vsub.f32 0.0, %v5323_v63  ;;  %v5133_v44 = vpop.f32.mrb[216].mxu0  ;;  %v5326_v47 = vpop.f32.mrb[40].mxu1 }
 0x7c3   : > { %7660 = vpow2.f32 %v5529_v40  ;;  %v5533_v31 = vmul.f32 1.442695, %v5447_v27  ;;  %v5134_v39 = vadd.f32 %v5133_v44, %v9878_v12  ;;  %v5135_v0 = vpop.f32.mrb[217].mxu0  ;;  %v5328_v37 = vpop.f32.mrb[41].mxu1 }
 0x7c4   : > { %7662 = vpow2.f32 %v5531_v42  ;;  %v5535_v49 = vmul.f32 1.442695, %v5448_v54  ;;  %v5136_v20 = vadd.f32 %v5135_v0, %v9881_v28  ;;  %v5137_v17 = vpop.f32.mrb[218].mxu0  ;;  %v5330_v11 = vpop.f32.mrb[42].mxu1 }
 0x7c5   : > { %v7653_v29 = vpop.eup %7652  ;;  %7664 = vpow2.f32 %v5533_v31  ;;  %v5327_v13 = vadd.f32 %v5326_v47, %v5134_v39  ;;  %v5138_v10 = vadd.f32 %v5137_v17, %v9878_v12  ;;  %v5139_v59 = vpop.f32.mrb[219].mxu0 }
 0x7c6   : > { %v5332_v1 = vpop.f32.mrb[43].mxu1  ;;  %v7655_v9 = vpop.eup %7654  ;;  %v5633_v14 = vadd.f32 1.0, %v7653_v29  ;;  %7666 = vpow2.f32 %v5535_v49  ;;  %v5329_v61 = vadd.f32 %v5328_v37, %v5136_v20  ;;  %v5140_v45 = vadd.f32 %v5139_v59, %v9881_v28 }
 0x7c7   : > { %v7657_v53 = vpop.eup %7656  ;;  %v5634_v46 = vadd.f32 1.0, %v7655_v9  ;;  %v5449_v57 = vsub.f32 0.0, %v5327_v13  ;;  %v5331_v62 = vadd.f32 %v5330_v11, %v5138_v10 }
 0x7c8   : > { %v7659_v41 = vpop.eup %7658  ;;  %7668 = vrcp.f32 %v5633_v14  ;;  %v5635_v35 = vadd.f32 1.0, %v7657_v53  ;;  %v5450_v2 = vsub.f32 0.0, %v5329_v61  ;;  %v5333_v16 = vadd.f32 %v5332_v1, %v5140_v45 }
 0x7c9   : > { %7670 = vrcp.f32 %v5634_v46  ;;  %v5636_v8 = vadd.f32 1.0, %v7659_v41  ;;  %v5537_v3 = vmul.f32 1.442695, %v5449_v57  ;;  %v5451_v19 = vsub.f32 0.0, %v5331_v62 }
 0x7ca   : > { %7672 = vrcp.f32 %v5635_v35  ;;  %v5539_v5 = vmul.f32 1.442695, %v5450_v2  ;;  %v5452_v50 = vsub.f32 0.0, %v5333_v16  ;;  %v5143_v48 = vpop.f32.mrb[220].mxu0  ;;  %v5336_v51 = vpop.f32.mrb[44].mxu1 }
 0x7cb   : > { %7674 = vrcp.f32 %v5636_v8  ;;  %v5541_v21 = vmul.f32 1.442695, %v5451_v19  ;;  %v5144_v25 = vadd.f32 %v5143_v48, %v9878_v12  ;;  %v5145_v52 = vpop.f32.mrb[221].mxu0  ;;  %v5338_v30 = vpop.f32.mrb[45].mxu1 }
 0x7cc   : > { %7676 = vpow2.f32 %v5537_v3  ;;  %v5543_v36 = vmul.f32 1.442695, %v5452_v50  ;;  %v5146_v60 = vadd.f32 %v5145_v52, %v9881_v28  ;;  %v5147_v22 = vpop.f32.mrb[222].mxu0  ;;  %v5340_v58 = vpop.f32.mrb[46].mxu1 }
 0x7cd   : > { %v7661_v24 = vpop.eup %7660  ;;  %7678 = vpow2.f32 %v5539_v5  ;;  %v5337_v18 = vadd.f32 %v5336_v51, %v5144_v25  ;;  %v5148_v4 = vadd.f32 %v5147_v22, %v9878_v12  ;;  %v5149_v26 = vpop.f32.mrb[223].mxu0 }
 0x7ce   : > { %v5342_v55 = vpop.f32.mrb[47].mxu1  ;;  %v7663_v7 = vpop.eup %7662  ;;  %v5637_v32 = vadd.f32 1.0, %v7661_v24  ;;  %7680 = vpow2.f32 %v5541_v21  ;;  %v5339_v34 = vadd.f32 %v5338_v30, %v5146_v60  ;;  %v5150_v6 = vadd.f32 %v5149_v26, %v9881_v28 }
 0x7cf   : > { %v7665_v38 = vpop.eup %7664  ;;  %v5638_v33 = vadd.f32 1.0, %v7663_v7  ;;  %7682 = vpow2.f32 %v5543_v36  ;;  %v5453_v43 = vsub.f32 0.0, %v5337_v18  ;;  %v5341_v15 = vadd.f32 %v5340_v58, %v5148_v4 }
 0x7d0   : > { %v7667_v23 = vpop.eup %7666  ;;  %7684 = vrcp.f32 %v5637_v32  ;;  %v5639_v56 = vadd.f32 1.0, %v7665_v38  ;;  %v5454_v63 = vsub.f32 0.0, %v5339_v34  ;;  %v5343_v40 = vadd.f32 %v5342_v55, %v5150_v6 }
 0x7d1   : > { %7686 = vrcp.f32 %v5638_v33  ;;  %v5640_v27 = vadd.f32 1.0, %v7667_v23  ;;  %v5545_v42 = vmul.f32 1.442695, %v5453_v43  ;;  %v5455_v54 = vsub.f32 0.0, %v5341_v15 }
 0x7d2   : > { %v7669_v44 = vpop.eup %7668  ;;  %7688 = vrcp.f32 %v5639_v56  ;;  %v5547_v47 = vmul.f32 1.442695, %v5454_v63  ;;  %v5456_v31 = vsub.f32 0.0, %v5343_v40  ;;  %v5153_v39 = vpop.f32.mrb[224].mxu0 }
 0x7d3   : > { %v5346_v0 = vpop.f32.mrb[48].mxu1  ;;  %v7671_v37 = vpop.eup %7670  ;;  %7690 = vrcp.f32 %v5640_v27  ;;  %v5549_v49 = vmul.f32 1.442695, %v5455_v54  ;;  %v5154_v20 = vadd.f32 %v5153_v39, %v9878_v12 }
 0x7d4   : > { %v5155_v17 = vpop.f32.mrb[225].mxu0  ;;  %v5348_v11 = vpop.f32.mrb[49].mxu1  ;;  %v6567_v13 = vpack.c.bf16 %v7671_v37, %v7669_v44  ;;  %7692 = vpow2.f32 %v5545_v42  ;;  %v5551_v10 = vmul.f32 1.442695, %v5456_v31 }
 0x7d5   : > { %v7673_v29 = vpop.eup %7672  ;;  %v5156_v59 = vadd.f32 %v5155_v17, %v9881_v28  ;;  %v5157_v1 = vpop.f32.mrb[226].mxu0  ;;  %7694 = vpow2.f32 %v5547_v47  ;;  %v5347_v61 = vadd.f32 %v5346_v0, %v5154_v20 }
 0x7d6   : > { %v5350_v9 = vpop.f32.mrb[50].mxu1  ;;  %v7675_v14 = vpop.eup %7674  ;;  %v5158_v45 = vadd.f32 %v5157_v1, %v9878_v12  ;;  %6009 = vst [vmem:[%s9908_s29 + $0x40] sm:$0xff] %v6567_v13  ;;  %7696 = vpow2.f32 %v5549_v49 }
 0x7d7   : > { %v5159_v53 = vpop.f32.mrb[227].mxu0  ;;  %v5352_v46 = vpop.f32.mrb[51].mxu1  ;;  %v6568_v62 = vpack.c.bf16 %v7675_v14, %v7673_v29  ;;  %v5349_v41 = vadd.f32 %v5348_v11, %v5156_v59  ;;  %7698 = vpow2.f32 %v5551_v10  ;;  %v5457_v8 = vsub.f32 0.0, %v5347_v61 }
 0x7d8   : > { %v7677_v57 = vpop.eup %7676  ;;  %v5160_v35 = vadd.f32 %v5159_v53, %v9881_v28  ;;  %v5351_v3 = vadd.f32 %v5350_v9, %v5158_v45 }
 0x7d9   : > { %v7679_v2 = vpop.eup %7678  ;;  %v5641_v16 = vadd.f32 1.0, %v7677_v57  ;;  %6010 = vst [vmem:[%s9908_s29 + $0x48] sm:$0xff] %v6568_v62  ;;  %v5458_v50 = vsub.f32 0.0, %v5349_v41  ;;  %v5553_v25 = vmul.f32 1.442695, %v5457_v8 }
 0x7da   : > { %v7681_v19 = vpop.eup %7680  ;;  %v5642_v5 = vadd.f32 1.0, %v7679_v2  ;;  %v5353_v48 = vadd.f32 %v5352_v46, %v5160_v35  ;;  %v5459_v52 = vsub.f32 0.0, %v5351_v3  ;;  %v5163_v58 = vpop.f32.mrb[228].mxu0 }
 0x7db   : > { %v7683_v51 = vpop.eup %7682  ;;  %7700 = vrcp.f32 %v5641_v16  ;;  %v5643_v21 = vadd.f32 1.0, %v7681_v19  ;;  %v5555_v60 = vmul.f32 1.442695, %v5458_v50  ;;  %v5356_v24 = vpop.f32.mrb[52].mxu1  ;;  %v5164_v26 = vadd.f32 %v5163_v58, %v9878_v12 }
 0x7dc   : > { %v7685_v30 = vpop.eup %7684  ;;  %7702 = vrcp.f32 %v5642_v5  ;;  %v5644_v36 = vadd.f32 1.0, %v7683_v51  ;;  %v5460_v22 = vsub.f32 0.0, %v5353_v48  ;;  %v5557_v4 = vmul.f32 1.442695, %v5459_v52  ;;  %v5165_v55 = vpop.f32.mrb[229].mxu0 }
 0x7dd   : > { %v7687_v18 = vpop.eup %7686  ;;  %7704 = vrcp.f32 %v5643_v21  ;;  %v5358_v7 = vpop.f32.mrb[53].mxu1  ;;  %v5166_v38 = vadd.f32 %v5165_v55, %v9881_v28  ;;  %v5357_v23 = vadd.f32 %v5356_v24, %v5164_v26 }
 0x7de   : > { %v7689_v32 = vpop.eup %7688  ;;  %v6569_v34 = vpack.c.bf16 %v7687_v18, %v7685_v30  ;;  %7706 = vrcp.f32 %v5644_v36  ;;  %v5559_v6 = vmul.f32 1.442695, %v5460_v22  ;;  %v5167_v33 = vpop.f32.mrb[230].mxu0 }
 0x7df   : > { %v5360_v43 = vpop.f32.mrb[54].mxu1  ;;  %v7691_v15 = vpop.eup %7690  ;;  %7708 = vpow2.f32 %v5553_v25  ;;  %v5168_v56 = vadd.f32 %v5167_v33, %v9878_v12  ;;  %v5359_v54 = vadd.f32 %v5358_v7, %v5166_v38  ;;  %v5461_v39 = vsub.f32 0.0, %v5357_v23 }
 0x7e0   : > { %v5169_v63 = vpop.f32.mrb[231].mxu0  ;;  %v5362_v40 = vpop.f32.mrb[55].mxu1  ;;  %6011 = vst [vmem:[%s9908_s29 + $0x50] sm:$0xff] %v6569_v34  ;;  %v6570_v42 = vpack.c.bf16 %v7691_v15, %v7689_v32  ;;  %7710 = vpow2.f32 %v5555_v60 }
 0x7e1   : > { %v7693_v27 = vpop.eup %7692  ;;  %v5170_v44 = vadd.f32 %v5169_v63, %v9881_v28  ;;  %7712 = vpow2.f32 %v5557_v4  ;;  %v5361_v0 = vadd.f32 %v5360_v43, %v5168_v56  ;;  %v5462_v20 = vsub.f32 0.0, %v5359_v54 }
 0x7e2   : > { %v7695_v47 = vpop.eup %7694  ;;  %v5645_v31 = vadd.f32 1.0, %v7693_v27  ;;  %6012 = vst [vmem:[%s9908_s29 + $0x58] sm:$0xff] %v6570_v42  ;;  %7714 = vpow2.f32 %v5559_v6  ;;  %v5561_v13 = vmul.f32 1.442695, %v5461_v39  ;;  %v5173_v14 = vpop.f32.mrb[232].mxu0 }
 0x7e3   : > { %v7697_v37 = vpop.eup %7696  ;;  %v5646_v49 = vadd.f32 1.0, %v7695_v47  ;;  %v5363_v17 = vadd.f32 %v5362_v40, %v5170_v44  ;;  %v5463_v10 = vsub.f32 0.0, %v5361_v0  ;;  %v5563_v1 = vmul.f32 1.442695, %v5462_v20  ;;  %v5366_v61 = vpop.f32.mrb[56].mxu1 }
 0x7e4   : > { %v7699_v11 = vpop.eup %7698  ;;  %7716 = vrcp.f32 %v5645_v31  ;;  %v5647_v29 = vadd.f32 1.0, %v7697_v37  ;;  %v5174_v46 = vadd.f32 %v5173_v14, %v9878_v12  ;;  %v5175_v57 = vpop.f32.mrb[233].mxu0 }
 0x7e5   : > { %7718 = vrcp.f32 %v5646_v49  ;;  %v5648_v59 = vadd.f32 1.0, %v7699_v11  ;;  %v5464_v9 = vsub.f32 0.0, %v5363_v17  ;;  %v7701_v45 = vpop.eup %7700  ;;  %v5565_v53 = vmul.f32 1.442695, %v5463_v10  ;;  %v5368_v62 = vpop.f32.mrb[57].mxu1 }
 0x7e6   : > { %7720 = vrcp.f32 %v5647_v29  ;;  %v7703_v41 = vpop.eup %7702  ;;  %v5176_v2 = vadd.f32 %v5175_v57, %v9881_v28  ;;  %v5177_v16 = vpop.f32.mrb[234].mxu0  ;;  %v5367_v5 = vadd.f32 %v5366_v61, %v5174_v46 }
 0x7e7   : > { %7722 = vrcp.f32 %v5648_v59  ;;  %v5567_v35 = vmul.f32 1.442695, %v5464_v9  ;;  %v5370_v8 = vpop.f32.mrb[58].mxu1  ;;  %v7705_v3 = vpop.eup %7704  ;;  %v6571_v19 = vpack.c.bf16 %v7703_v41, %v7701_v45  ;;  %v5178_v50 = vadd.f32 %v5177_v16, %v9878_v12 }
 0x7e8   : > { %7724 = vpow2.f32 %v5561_v13  ;;  %v5179_v48 = vpop.f32.mrb[235].mxu0  ;;  %v5372_v51 = vpop.f32.mrb[59].mxu1  ;;  %v5369_v25 = vadd.f32 %v5368_v62, %v5176_v2  ;;  %v5465_v60 = vsub.f32 0.0, %v5367_v5 }
 0x7e9   : > { %v7707_v21 = vpop.eup %7706  ;;  %7726 = vpow2.f32 %v5563_v1  ;;  %v5180_v52 = vadd.f32 %v5179_v48, %v9881_v28  ;;  %6013 = vst [vmem:[%s9908_s29 + $0x60] sm:$0xff] %v6571_v19  ;;  %v5371_v22 = vadd.f32 %v5370_v8, %v5178_v50 }
 0x7ea   : > { %v7709_v30 = vpop.eup %7708  ;;  %v6572_v36 = vpack.c.bf16 %v7707_v21, %v7705_v3  ;;  %7728 = vpow2.f32 %v5565_v53  ;;  %v5466_v18 = vsub.f32 0.0, %v5369_v25  ;;  %v5569_v6 = vmul.f32 1.442695, %v5465_v60  ;;  %v5183_v33 = vpop.f32.mrb[236].mxu0 }
 0x7eb   : > { %v7711_v58 = vpop.eup %7710  ;;  %v5649_v24 = vadd.f32 1.0, %v7709_v30  ;;  %7730 = vpow2.f32 %v5567_v35  ;;  %v5373_v4 = vadd.f32 %v5372_v51, %v5180_v52  ;;  %v5467_v7 = vsub.f32 0.0, %v5371_v22  ;;  %v5376_v43 = vpop.f32.mrb[60].mxu1 }
 0x7ec   : > { %v7713_v26 = vpop.eup %7712  ;;  %6014 = vst [vmem:[%s9908_s29 + $0x68] sm:$0xff] %v6572_v36  ;;  %v5650_v55 = vadd.f32 1.0, %v7711_v58  ;;  %v5571_v56 = vmul.f32 1.442695, %v5466_v18  ;;  %v5184_v63 = vadd.f32 %v5183_v33, %v9878_v12  ;;  %v5185_v40 = vpop.f32.mrb[237].mxu0 }
 0x7ed   : > { %v7715_v32 = vpop.eup %7714  ;;  %7732 = vrcp.f32 %v5649_v24  ;;  %v5651_v34 = vadd.f32 1.0, %v7713_v26  ;;  %v5468_v38 = vsub.f32 0.0, %v5373_v4  ;;  %v5378_v27 = vpop.f32.mrb[61].mxu1  ;;  %v5573_v54 = vmul.f32 1.442695, %v5467_v7 }
 0x7ee   : > { %v7717_v15 = vpop.eup %7716  ;;  %7734 = vrcp.f32 %v5650_v55  ;;  %v5652_v23 = vadd.f32 1.0, %v7715_v32  ;;  %v5186_v47 = vadd.f32 %v5185_v40, %v9881_v28  ;;  %v5187_v31 = vpop.f32.mrb[238].mxu0  ;;  %v5377_v49 = vadd.f32 %v5376_v43, %v5184_v63 }
 0x7ef   : > { %v7719_v42 = vpop.eup %7718  ;;  %7736 = vrcp.f32 %v5651_v34  ;;  %v5575_v44 = vmul.f32 1.442695, %v5468_v38  ;;  %v5380_v39 = vpop.f32.mrb[62].mxu1  ;;  %v5188_v20 = vadd.f32 %v5187_v31, %v9878_v12 }
 0x7f0   : > { %v7721_v0 = vpop.eup %7720  ;;  %v6573_v37 = vpack.c.bf16 %v7719_v42, %v7717_v15  ;;  %7738 = vrcp.f32 %v5652_v23  ;;  %v5189_v17 = vpop.f32.mrb[239].mxu0  ;;  %v5379_v13 = vadd.f32 %v5378_v27, %v5186_v47  ;;  %v5469_v9 = vsub.f32 0.0, %v5377_v49 }
 0x7f1   : > { %v5382_v11 = vpop.f32.mrb[63].mxu1  ;;  %v7723_v29 = vpop.eup %7722  ;;  %7740 = vpow2.f32 %v5569_v6  ;;  %v5190_v10 = vadd.f32 %v5189_v17, %v9881_v28  ;;  %v5381_v14 = vadd.f32 %v5380_v39, %v5188_v20 }
 0x7f2   : > { %v7725_v59 = vpop.eup %7724  ;;  %6015 = vst [vmem:[%s9908_s29 + $0x70] sm:$0xff] %v6573_v37  ;;  %v6574_v1 = vpack.c.bf16 %v7723_v29, %v7721_v0  ;;  %7742 = vpow2.f32 %v5571_v56  ;;  %v5470_v53 = vsub.f32 0.0, %v5379_v13  ;;  %v5577_v16 = vmul.f32 1.442695, %v5469_v9  ;;  %v5193_v3 = vpop.f32.mrb[240].mxu0 }
 0x7f3   : > { %v7727_v61 = vpop.eup %7726  ;;  %v5653_v45 = vadd.f32 1.0, %v7725_v59  ;;  %7744 = vpow2.f32 %v5573_v54  ;;  %v5383_v46 = vadd.f32 %v5382_v11, %v5190_v10  ;;  %v5471_v41 = vsub.f32 0.0, %v5381_v14  ;;  %v5386_v19 = vpop.f32.mrb[64].mxu1 }
 0x7f4   : > { %v7729_v57 = vpop.eup %7728  ;;  %6016 = vst [vmem:[%s9908_s29 + $0x78] sm:$0xff] %v6574_v1  ;;  %v5654_v62 = vadd.f32 1.0, %v7727_v61  ;;  %7746 = vpow2.f32 %v5575_v44  ;;  %v5579_v50 = vmul.f32 1.442695, %v5470_v53  ;;  %v5194_v48 = vadd.f32 %v5193_v3, %v9878_v12  ;;  %v5195_v51 = vpop.f32.mrb[241].mxu0 }
 0x7f5   : > { %v7731_v35 = vpop.eup %7730  ;;  %7748 = vrcp.f32 %v5653_v45  ;;  %v5655_v2 = vadd.f32 1.0, %v7729_v57  ;;  %v5472_v8 = vsub.f32 0.0, %v5383_v46  ;;  %v5388_v21 = vpop.f32.mrb[65].mxu1  ;;  %v5581_v52 = vmul.f32 1.442695, %v5471_v41 }
 0x7f6   : > { %7750 = vrcp.f32 %v5654_v62  ;;  %v5656_v5 = vadd.f32 1.0, %v7731_v35  ;;  %v5196_v30 = vadd.f32 %v5195_v51, %v9881_v28  ;;  %v5197_v36 = vpop.f32.mrb[242].mxu0  ;;  %v5390_v60 = vpop.f32.mrb[66].mxu1  ;;  %v5387_v24 = vadd.f32 %v5386_v19, %v5194_v48 }
 0x7f7   : > { %v7733_v25 = vpop.eup %7732  ;;  %7752 = vrcp.f32 %v5655_v2  ;;  %v5583_v58 = vmul.f32 1.442695, %v5472_v8  ;;  %v5198_v18 = vadd.f32 %v5197_v36, %v9878_v12  ;;  %v5199_v4 = vpop.f32.mrb[243].mxu0 }
 0x7f8   : > { %v7735_v22 = vpop.eup %7734  ;;  %7754 = vrcp.f32 %v5656_v5  ;;  %v5392_v26 = vpop.f32.mrb[67].mxu1  ;;  %v5389_v32 = vadd.f32 %v5388_v21, %v5196_v30  ;;  %v5200_v34 = vadd.f32 %v5199_v4, %v9881_v28  ;;  %v5473_v38 = vsub.f32 0.0, %v5387_v24 }
 0x7f9   : > { %v7737_v55 = vpop.eup %7736  ;;  %v6575_v7 = vpack.c.bf16 %v7735_v22, %v7733_v25  ;;  %7756 = vpow2.f32 %v5577_v16  ;;  %v5391_v33 = vadd.f32 %v5390_v60, %v5198_v18 }
 0x7fa   : > { %v7739_v6 = vpop.eup %7738  ;;  %7758 = vpow2.f32 %v5579_v50  ;;  %v5474_v23 = vsub.f32 0.0, %v5389_v32  ;;  %v5393_v56 = vadd.f32 %v5392_v26, %v5200_v34  ;;  %v5585_v44 = vmul.f32 1.442695, %v5473_v38  ;;  %v5203_v31 = vpop.f32.mrb[244].mxu0 }
 0x7fb   : > { %v7741_v43 = vpop.eup %7740  ;;  %6017 = vst [vmem:[%s9908_s29 + $0x80] sm:$0xff] %v6575_v7  ;;  %v6576_v15 = vpack.c.bf16 %v7739_v6, %v7737_v55  ;;  %7760 = vpow2.f32 %v5581_v52  ;;  %v5475_v27 = vsub.f32 0.0, %v5391_v33  ;;  %v5396_v39 = vpop.f32.mrb[68].mxu1  ;;  %v5204_v20 = vadd.f32 %v5203_v31, %v9878_v12 }
 0x7fc   : > { %v7743_v63 = vpop.eup %7742  ;;  %v5657_v40 = vadd.f32 1.0, %v7741_v43  ;;  %7762 = vpow2.f32 %v5583_v58  ;;  %v5476_v47 = vsub.f32 0.0, %v5393_v56  ;;  %v5587_v49 = vmul.f32 1.442695, %v5474_v23  ;;  %v5205_v17 = vpop.f32.mrb[245].mxu0 }
 0x7fd   : > { %v7745_v42 = vpop.eup %7744  ;;  %6018 = vst [vmem:[%s9908_s29 + $0x88] sm:$0xff] %v6576_v15  ;;  %v5658_v54 = vadd.f32 1.0, %v7743_v63  ;;  %v5398_v11 = vpop.f32.mrb[69].mxu1  ;;  %v5589_v10 = vmul.f32 1.442695, %v5475_v27  ;;  %v5206_v59 = vadd.f32 %v5205_v17, %v9881_v28  ;;  %v5397_v45 = vadd.f32 %v5396_v39, %v5204_v20 }
 0x7fe   : > { %v7747_v0 = vpop.eup %7746  ;;  %7764 = vrcp.f32 %v5657_v40  ;;  %v5659_v37 = vadd.f32 1.0, %v7745_v42  ;;  %v5207_v1 = vpop.f32.mrb[246].mxu0  ;;  %v5591_v61 = vmul.f32 1.442695, %v5476_v47 }
 0x7ff   : > { %v7749_v29 = vpop.eup %7748  ;;  %7766 = vrcp.f32 %v5658_v54  ;;  %v5660_v13 = vadd.f32 1.0, %v7747_v0  ;;  %v5400_v9 = vpop.f32.mrb[70].mxu1  ;;  %v5208_v53 = vadd.f32 %v5207_v1, %v9878_v12  ;;  %v5399_v35 = vadd.f32 %v5398_v11, %v5206_v59 }
 0x800   : > { %v7751_v14 = vpop.eup %7750  ;;  %7768 = vrcp.f32 %v5659_v37  ;;  %v5209_v46 = vpop.f32.mrb[247].mxu0  ;;  %v5477_v8 = vsub.f32 0.0, %v5397_v45 }
 0x801   : > { %v5402_v57 = vpop.f32.mrb[71].mxu1  ;;  %v7753_v62 = vpop.eup %7752  ;;  %v6577_v41 = vpack.c.bf16 %v7751_v14, %v7749_v29  ;;  %7770 = vrcp.f32 %v5660_v13  ;;  %v5210_v2 = vadd.f32 %v5209_v46, %v9881_v28  ;;  %v5401_v3 = vadd.f32 %v5400_v9, %v5208_v53 }
 0x802   : > { %v7755_v16 = vpop.eup %7754  ;;  %7772 = vpow2.f32 %v5585_v44  ;;  %v5478_v50 = vsub.f32 0.0, %v5399_v35  ;;  %v5213_v60 = vpop.f32.mrb[248].mxu0  ;;  %v5593_v18 = vmul.f32 1.442695, %v5477_v8 }
 0x803   : > { %v7757_v19 = vpop.eup %7756  ;;  %6019 = vst [vmem:[%s9908_s29 + $0x90] sm:$0xff] %v6577_v41  ;;  %v6578_v5 = vpack.c.bf16 %v7755_v16, %v7753_v62  ;;  %7774 = vpow2.f32 %v5587_v49  ;;  %v5403_v48 = vadd.f32 %v5402_v57, %v5210_v2  ;;  %v5479_v25 = vsub.f32 0.0, %v5401_v3  ;;  %v5406_v22 = vpop.f32.mrb[72].mxu1 }
 0x804   : > { %v7759_v51 = vpop.eup %7758  ;;  %v5661_v21 = vadd.f32 1.0, %v7757_v19  ;;  %7776 = vpow2.f32 %v5589_v10  ;;  %v5214_v4 = vadd.f32 %v5213_v60, %v9878_v12  ;;  %v5215_v26 = vpop.f32.mrb[249].mxu0  ;;  %v5595_v32 = vmul.f32 1.442695, %v5478_v50 }
 0x805   : > { %v7761_v52 = vpop.eup %7760  ;;  %6020 = vst [vmem:[%s9908_s29 + $0x98] sm:$0xff] %v6578_v5  ;;  %v5662_v30 = vadd.f32 1.0, %v7759_v51  ;;  %7778 = vpow2.f32 %v5591_v61  ;;  %v5480_v36 = vsub.f32 0.0, %v5403_v48  ;;  %v5408_v55 = vpop.f32.mrb[73].mxu1  ;;  %v5216_v34 = vadd.f32 %v5215_v26, %v9881_v28 }
 0x806   : > { %v7763_v58 = vpop.eup %7762  ;;  %7780 = vrcp.f32 %v5661_v21  ;;  %v5663_v24 = vadd.f32 1.0, %v7761_v52  ;;  %v5217_v6 = vpop.f32.mrb[250].mxu0  ;;  %v5597_v43 = vmul.f32 1.442695, %v5479_v25  ;;  %v5407_v15 = vadd.f32 %v5406_v22, %v5214_v4 }
 0x807   : > { %7782 = vrcp.f32 %v5662_v30  ;;  %v5664_v7 = vadd.f32 1.0, %v7763_v58  ;;  %v5410_v38 = vpop.f32.mrb[74].mxu1  ;;  %v5218_v23 = vadd.f32 %v5217_v6, %v9878_v12  ;;  %v5219_v56 = vpop.f32.mrb[251].mxu0  ;;  %v5599_v27 = vmul.f32 1.442695, %v5480_v36 }
 0x808   : > { %v7765_v33 = vpop.eup %7764  ;;  %7784 = vrcp.f32 %v5663_v24  ;;  %v5412_v63 = vpop.f32.mrb[75].mxu1  ;;  %v5409_v42 = vadd.f32 %v5408_v55, %v5216_v34  ;;  %v5220_v54 = vadd.f32 %v5219_v56, %v9881_v28  ;;  %v5481_v31 = vsub.f32 0.0, %v5407_v15 }
 0x809   : > { %v7767_v40 = vpop.eup %7766  ;;  %7786 = vrcp.f32 %v5664_v7  ;;  %v5411_v39 = vadd.f32 %v5410_v38, %v5218_v23 }
 0x80a   : > { %v7769_v44 = vpop.eup %7768  ;;  %v6579_v47 = vpack.c.bf16 %v7767_v40, %v7765_v33  ;;  %7788 = vpow2.f32 %v5593_v18  ;;  %v5482_v37 = vsub.f32 0.0, %v5409_v42  ;;  %v5413_v49 = vadd.f32 %v5412_v63, %v5220_v54  ;;  %v5223_v1 = vpop.f32.mrb[252].mxu0 }
 0x80b   : > { %v7771_v0 = vpop.eup %7770  ;;  %7790 = vpow2.f32 %v5595_v32  ;;  %v5601_v11 = vmul.f32 1.442695, %v5481_v31  ;;  %v5483_v29 = vsub.f32 0.0, %v5411_v39  ;;  %v5416_v9 = vpop.f32.mrb[76].mxu1  ;;  %v5224_v53 = vadd.f32 %v5223_v1, %v9878_v12 }
 0x80c   : > { %v7773_v20 = vpop.eup %7772  ;;  %6021 = vst [vmem:[%s9908_s29 + $0xa0] sm:$0xff] %v6579_v47  ;;  %v6580_v17 = vpack.c.bf16 %v7771_v0, %v7769_v44  ;;  %7792 = vpow2.f32 %v5597_v43  ;;  %v5484_v59 = vsub.f32 0.0, %v5413_v49  ;;  %v5603_v45 = vmul.f32 1.442695, %v5482_v37  ;;  %v5225_v46 = vpop.f32.mrb[253].mxu0 }
 0x80d   : > { %v7775_v13 = vpop.eup %7774  ;;  %v5665_v10 = vadd.f32 1.0, %v7773_v20  ;;  %7794 = vpow2.f32 %v5599_v27  ;;  %v5418_v57 = vpop.f32.mrb[77].mxu1  ;;  %v5605_v35 = vmul.f32 1.442695, %v5483_v29  ;;  %v5226_v2 = vadd.f32 %v5225_v46, %v9881_v28 }
 0x80e   : > { %v7777_v14 = vpop.eup %7776  ;;  %6022 = vst [vmem:[%s9908_s29 + $0xa8] sm:$0xff] %v6580_v17  ;;  %v5666_v61 = vadd.f32 1.0, %v7775_v13  ;;  %7796 = vpow2.f32 %v5601_v11  ;;  %v5227_v16 = vpop.f32.mrb[254].mxu0  ;;  %v5417_v5 = vadd.f32 %v5416_v9, %v5224_v53  ;;  %v5607_v25 = vmul.f32 1.442695, %v5484_v59 }
 0x80f   : > { %v7779_v62 = vpop.eup %7778  ;;  %7798 = vrcp.f32 %v5665_v10  ;;  %v5667_v41 = vadd.f32 1.0, %v7777_v14  ;;  %v5420_v8 = vpop.f32.mrb[78].mxu1  ;;  %v5228_v50 = vadd.f32 %v5227_v16, %v9878_v12  ;;  %v5419_v52 = vadd.f32 %v5418_v57, %v5226_v2 }
 0x810   : > { %v7781_v3 = vpop.eup %7780  ;;  %7800 = vrcp.f32 %v5666_v61  ;;  %v5668_v19 = vadd.f32 1.0, %v7779_v62  ;;  %v5229_v48 = vpop.f32.mrb[255].mxu0  ;;  %v5485_v22 = vsub.f32 0.0, %v5417_v5 }
 0x811   : > { %v5422_v51 = vpop.f32.mrb[79].mxu1  ;;  %v7783_v21 = vpop.eup %7782  ;;  %7802 = vrcp.f32 %v5667_v41  ;;  %v5230_v30 = vadd.f32 %v5229_v48, %v9881_v28  ;;  %v5421_v58 = vadd.f32 %v5420_v8, %v5228_v50  ;;  %v5486_v18 = vsub.f32 0.0, %v5419_v52 }
 0x812   : > { %v7785_v36 = vpop.eup %7784  ;;  %v6581_v60 = vpack.c.bf16 %v7783_v21, %v7781_v3  ;;  %7804 = vrcp.f32 %v5668_v19  ;;  %v5609_v7 = vmul.f32 1.442695, %v5485_v22  ;;  %v5266_v38 = vpop.f32.mrb[192].mxu0 }
 0x813   : > { %v7787_v24 = vpop.eup %7786  ;;  %7806 = vpow2.f32 %v5603_v45  ;;  %v5423_v4 = vadd.f32 %v5422_v51, %v5230_v30  ;;  %v5487_v6 = vsub.f32 0.0, %v5421_v58  ;;  %v6873_v23 = vadd.f32 %v5266_v38, %v9878_v12  ;;  %v5268_v56 = vpop.f32.mrb[193].mxu0 }
 0x814   : > { %v7789_v26 = vpop.eup %7788  ;;  %6023 = vst [vmem:[%s9908_s29 + $0xb0] sm:$0xff] %v6581_v60  ;;  %v6582_v55 = vpack.c.bf16 %v7787_v24, %v7785_v36  ;;  %7808 = vpow2.f32 %v5605_v35  ;;  %v5611_v27 = vmul.f32 1.442695, %v5486_v18  ;;  %v6874_v42 = vadd.f32 %v5268_v56, %v9881_v28  ;;  %v5270_v54 = vpop.f32.mrb[194].mxu0 }
 0x815   : > { %v7791_v32 = vpop.eup %7790  ;;  %v5669_v34 = vadd.f32 1.0, %v7789_v26  ;;  %7810 = vpow2.f32 %v5607_v25  ;;  %v5488_v15 = vsub.f32 0.0, %v5423_v4  ;;  %v5425_v31 = vsub.f32 0.0, %v6873_v23  ;;  %v5272_v0 = vpop.f32.mrb[195].mxu0 }
 0x816   : > { %v7793_v33 = vpop.eup %7792  ;;  %6024 = vst [vmem:[%s9908_s29 + $0xb8] sm:$0xff] %v6582_v55  ;;  %v5670_v43 = vadd.f32 1.0, %v7791_v32  ;;  %7812 = vpow2.f32 %v5609_v7  ;;  %v6875_v39 = vadd.f32 %v5270_v54, %v9878_v12  ;;  %v5613_v20 = vmul.f32 1.442695, %v5487_v6 }
 0x817   : > { %v7795_v63 = vpop.eup %7794  ;;  %7814 = vrcp.f32 %v5669_v34  ;;  %v5671_v40 = vadd.f32 1.0, %v7793_v33  ;;  %v5615_v11 = vmul.f32 1.442695, %v5488_v15  ;;  %v6876_v29 = vadd.f32 %v5272_v0, %v9881_v28 }
 0x818   : > { %v7797_v44 = vpop.eup %7796  ;;  %7816 = vrcp.f32 %v5670_v43  ;;  %v5672_v47 = vadd.f32 1.0, %v7795_v63  ;;  %v5489_v59 = vmul.f32 1.442695, %v5425_v31  ;;  %v5426_v1 = vsub.f32 0.0, %v6874_v42 }
 0x819   : > { %v7799_v37 = vpop.eup %7798  ;;  %7818 = vrcp.f32 %v5671_v40  ;;  %v5673_v49 = vadd.f32 1.0, %v7797_v44  ;;  %v5427_v14 = vsub.f32 0.0, %v6875_v39  ;;  %v5428_v62 = vsub.f32 0.0, %v6876_v29 }
 0x81a   : > { %v7801_v17 = vpop.eup %7800  ;;  %7820 = vrcp.f32 %v5672_v47  ;;  %v5276_v53 = vpop.f32.mrb[196].mxu0  ;;  %v5491_v8 = vmul.f32 1.442695, %v5426_v1 }
 0x81b   : > { %v7803_v13 = vpop.eup %7802  ;;  %v6583_v10 = vpack.c.bf16 %v7801_v17, %v7799_v37  ;;  %7822 = vrcp.f32 %v5673_v49  ;;  %v6877_v41 = vadd.f32 %v5276_v53, %v9878_v12  ;;  %v5278_v35 = vpop.f32.mrb[197].mxu0  ;;  %v5493_v48 = vmul.f32 1.442695, %v5427_v14 }
 0x81c   : > { %v7805_v9 = vpop.eup %7804  ;;  %7824 = vpow2.f32 %v5611_v27  ;;  %v6878_v3 = vadd.f32 %v5278_v35, %v9881_v28  ;;  %v5280_v19 = vpop.f32.mrb[198].mxu0  ;;  %v5495_v22 = vmul.f32 1.442695, %v5428_v62 }
 0x81d   : > { %v7807_v61 = vpop.eup %7806  ;;  %6025 = vst [vmem:[%s9908_s29 + $0xc0] sm:$0xff] %v6583_v10  ;;  %v6584_v45 = vpack.c.bf16 %v7805_v9, %v7803_v13  ;;  %7826 = vpow2.f32 %v5613_v20  ;;  %v5429_v51 = vsub.f32 0.0, %v6877_v41  ;;  %v5282_v21 = vpop.f32.mrb[199].mxu0  ;;  %v6879_v36 = vadd.f32 %v5280_v19, %v9878_v12 }
 0x81e   : > { %v7809_v46 = vpop.eup %7808  ;;  %v5674_v57 = vadd.f32 1.0, %v7807_v61  ;;  %7828 = vpow2.f32 %v5615_v11  ;;  %v5430_v30 = vsub.f32 0.0, %v6878_v3  ;;  %v6880_v58 = vadd.f32 %v5282_v21, %v9881_v28 }
 0x81f   : > { %v7811_v2 = vpop.eup %7810  ;;  %6026 = vst [vmem:[%s9908_s29 + $0xc8] sm:$0xff] %v6584_v45  ;;  %v5675_v16 = vadd.f32 1.0, %v7809_v46  ;;  %7830 = vpow2.f32 %v5489_v59  ;;  %v5497_v4 = vmul.f32 1.442695, %v5429_v51  ;;  %v5431_v34 = vsub.f32 0.0, %v6879_v36 }
 0x820   : > { %v7813_v5 = vpop.eup %7812  ;;  %7832 = vrcp.f32 %v5674_v57  ;;  %v5676_v50 = vadd.f32 1.0, %v7811_v2  ;;  %v5499_v55 = vmul.f32 1.442695, %v5430_v30  ;;  %v5432_v33 = vsub.f32 0.0, %v6880_v58 }
 0x821   : > { %v7815_v25 = vpop.eup %7814  ;;  %7834 = vrcp.f32 %v5675_v16  ;;  %v5677_v52 = vadd.f32 1.0, %v7813_v5  ;;  %v5501_v39 = vmul.f32 1.442695, %v5431_v34 }
 0x822   : > { %v7817_v60 = vpop.eup %7816  ;;  %7836 = vrcp.f32 %v5676_v50  ;;  %v5286_v6 = vpop.f32.mrb[200].mxu0  ;;  %v5503_v20 = vmul.f32 1.442695, %v5432_v33 }
 0x823   : > { %v7819_v24 = vpop.eup %7818  ;;  %v6585_v18 = vpack.c.bf16 %v7817_v60, %v7815_v25  ;;  %7838 = vrcp.f32 %v5677_v52  ;;  %v6881_v43 = vadd.f32 %v5286_v6, %v9878_v12  ;;  %v5288_v15 = vpop.f32.mrb[201].mxu0 }
 0x824   : > { %v7821_v26 = vpop.eup %7820  ;;  %7840 = vpow2.f32 %v5491_v8  ;;  %v6882_v63 = vadd.f32 %v5288_v15, %v9881_v28  ;;  %v5290_v40 = vpop.f32.mrb[202].mxu0 }
 0x825   : > { %v7823_v7 = vpop.eup %7822  ;;  %6027 = vst [vmem:[%s9908_s29 + $0xd0] sm:$0xff] %v6585_v18  ;;  %v6586_v32 = vpack.c.bf16 %v7821_v26, %v7819_v24  ;;  %7842 = vpow2.f32 %v5493_v48  ;;  %v5433_v54 = vsub.f32 0.0, %v6881_v43  ;;  %v5292_v44 = vpop.f32.mrb[203].mxu0  ;;  %v6883_v17 = vadd.f32 %v5290_v40, %v9878_v12 }
 0x826   : > { %v7825_v38 = vpop.eup %7824  ;;  %7844 = vpow2.f32 %v5495_v22  ;;  %v5434_v0 = vsub.f32 0.0, %v6882_v63  ;;  %v6884_v10 = vadd.f32 %v5292_v44, %v9881_v28 }
 0x827   : > { %v7827_v23 = vpop.eup %7826  ;;  %6028 = vst [vmem:[%s9908_s29 + $0xd8] sm:$0xff] %v6586_v32  ;;  %v5678_v56 = vadd.f32 1.0, %v7825_v38  ;;  %7846 = vpow2.f32 %v5497_v4  ;;  %v5505_v13 = vmul.f32 1.442695, %v5433_v54  ;;  %v5435_v53 = vsub.f32 0.0, %v6883_v17 }
 0x828   : > { %v7829_v27 = vpop.eup %7828  ;;  %v5679_v42 = vadd.f32 1.0, %v7827_v23  ;;  %7848 = vpow2.f32 %v5499_v55  ;;  %v5507_v1 = vmul.f32 1.442695, %v5434_v0  ;;  %v5436_v35 = vsub.f32 0.0, %v6884_v10 }
 0x829   : > { %v7831_v47 = vpop.eup %7830  ;;  %7850 = vrcp.f32 %v5678_v56  ;;  %v5680_v31 = vadd.f32 1.0, %v7829_v27  ;;  %v5509_v52 = vmul.f32 1.442695, %v5435_v53 }
 0x82a   : > { %v7833_v37 = vpop.eup %7832  ;;  %7852 = vrcp.f32 %v5679_v42  ;;  %v5617_v49 = vadd.f32 1.0, %v7831_v47  ;;  %v5296_v61 = vpop.f32.mrb[204].mxu0  ;;  %v5511_v22 = vmul.f32 1.442695, %v5436_v35 }
 0x82b   : > { %v7835_v11 = vpop.eup %7834  ;;  %v6587_v29 = vpack.c.bf16 %v7833_v37, %v7823_v7  ;;  %7854 = vrcp.f32 %v5680_v31  ;;  %v6885_v46 = vadd.f32 %v5296_v61, %v9878_v12  ;;  %v5298_v57 = vpop.f32.mrb[205].mxu0 }
 0x82c   : > { %v7837_v59 = vpop.eup %7836  ;;  %7856 = vrcp.f32 %v5617_v49  ;;  %v6886_v2 = vadd.f32 %v5298_v57, %v9881_v28  ;;  %v5300_v16 = vpop.f32.mrb[206].mxu0 }
 0x82d   : > { %v7839_v9 = vpop.eup %7838  ;;  %6029 = vst [vmem:[%s9908_s29 + $0xe0] sm:$0xff] %v6587_v29  ;;  %v6588_v14 = vpack.c.bf16 %v7837_v59, %v7835_v11  ;;  %7858 = vpow2.f32 %v5501_v39  ;;  %v5437_v19 = vsub.f32 0.0, %v6885_v46  ;;  %v5302_v5 = vpop.f32.mrb[207].mxu0  ;;  %v6887_v30 = vadd.f32 %v5300_v16, %v9878_v12 }
 0x82e   : > { %v7841_v45 = vpop.eup %7840  ;;  %7860 = vpow2.f32 %v5503_v20  ;;  %v5438_v51 = vsub.f32 0.0, %v6886_v2  ;;  %v6888_v58 = vadd.f32 %v5302_v5, %v9881_v28 }
 0x82f   : > { %v7843_v62 = vpop.eup %7842  ;;  %6030 = vst [vmem:[%s9908_s29 + $0xe8] sm:$0xff] %v6588_v14  ;;  %v5618_v41 = vadd.f32 1.0, %v7841_v45  ;;  %7862 = vpow2.f32 %v5505_v13  ;;  %v5513_v4 = vmul.f32 1.442695, %v5437_v19  ;;  %v5439_v34 = vsub.f32 0.0, %v6887_v30 }
 0x830   : > { %v7845_v8 = vpop.eup %7844  ;;  %v5619_v3 = vadd.f32 1.0, %v7843_v62  ;;  %7864 = vpow2.f32 %v5507_v1  ;;  %v5515_v55 = vmul.f32 1.442695, %v5438_v51  ;;  %v5440_v6 = vsub.f32 0.0, %v6888_v58 }
 0x831   : > { %v7847_v50 = vpop.eup %7846  ;;  %7866 = vrcp.f32 %v5618_v41  ;;  %v5620_v48 = vadd.f32 1.0, %v7845_v8  ;;  %v5517_v56 = vmul.f32 1.442695, %v5439_v34 }
 0x832   : > { %v7849_v21 = vpop.eup %7848  ;;  %7868 = vrcp.f32 %v5619_v3  ;;  %v5621_v25 = vadd.f32 1.0, %v7847_v50  ;;  %v5519_v27 = vmul.f32 1.442695, %v5440_v6 }
 0x833   : > { %v7851_v36 = vpop.eup %7850  ;;  %7870 = vrcp.f32 %v5620_v48  ;;  %v5622_v60 = vadd.f32 1.0, %v7849_v21 }
 0x834   : > { %v7853_v24 = vpop.eup %7852  ;;  %v6589_v18 = vpack.c.bf16 %v7851_v36, %v7839_v9  ;;  %7872 = vrcp.f32 %v5621_v25 }
 0x835   : > { %v7855_v26 = vpop.eup %7854  ;;  %7874 = vrcp.f32 %v5622_v60 }
 0x836   : > { %v7857_v7 = vpop.eup %7856  ;;  %6031 = vst [vmem:[%s9908_s29 + $0xf0] sm:$0xff] %v6589_v18  ;;  %v6590_v32 = vpack.c.bf16 %v7855_v26, %v7853_v24  ;;  %7876 = vpow2.f32 %v5509_v52 }
 0x837   : > { %v7859_v12 = vpop.eup %7858  ;;  %7878 = vpow2.f32 %v5511_v22 }
 0x838   : > { %v7861_v38 = vpop.eup %7860  ;;  %6032 = vst [vmem:[%s9908_s29 + $0xf8] sm:$0xff] %v6590_v32  ;;  %v5623_v33 = vadd.f32 1.0, %v7859_v12  ;;  %7880 = vpow2.f32 %v5513_v4 }
 0x839   : > { %v7863_v28 = vpop.eup %7862  ;;  %v5624_v43 = vadd.f32 1.0, %v7861_v38  ;;  %7882 = vpow2.f32 %v5515_v55 }
 0x83a   : > { %v7865_v15 = vpop.eup %7864  ;;  %7884 = vrcp.f32 %v5623_v33  ;;  %v5625_v23 = vadd.f32 1.0, %v7863_v28 }
 0x83b   : > { %v7867_v63 = vpop.eup %7866  ;;  %7886 = vrcp.f32 %v5624_v43  ;;  %v5626_v40 = vadd.f32 1.0, %v7865_v15 }
 0x83c   : > { %v7869_v42 = vpop.eup %7868  ;;  %v6559_v54 = vpack.c.bf16 %v7867_v63, %v7857_v7  ;;  %7888 = vrcp.f32 %v5625_v23 }
 0x83d   : > { %v7871_v44 = vpop.eup %7870  ;;  %7890 = vrcp.f32 %v5626_v40 }
 0x83e   : > { %v7873_v47 = vpop.eup %7872  ;;  %6001 = vst [vmem:[%s9908_s29] sm:$0xff] %v6559_v54  ;;  %v6560_v31 = vpack.c.bf16 %v7871_v44, %v7869_v42  ;;  %7892 = vpow2.f32 %v5517_v56 }
 0x83f   : > { %v7875_v39 = vpop.eup %7874  ;;  %7894 = vpow2.f32 %v5519_v27 }
 0x840   : > { %v7877_v0 = vpop.eup %7876  ;;  %6002 = vst [vmem:[%s9908_s29 + $0x8] sm:$0xff] %v6560_v31  ;;  %v6561_v37 = vpack.c.bf16 %v7875_v39, %v7873_v47 }
 0x841   : > { %v7879_v49 = vpop.eup %7878  ;;  %v5627_v20 = vadd.f32 1.0, %v7877_v0 }
 0x842   : > { %v7881_v17 = vpop.eup %7880  ;;  %6003 = vst [vmem:[%s9908_s29 + $0x10] sm:$0xff] %v6561_v37  ;;  %v5628_v11 = vadd.f32 1.0, %v7879_v49 }
 0x843   : > { %v7883_v29 = vpop.eup %7882  ;;  %7896 = vrcp.f32 %v5627_v20  ;;  %v5629_v13 = vadd.f32 1.0, %v7881_v17 }
 0x844   : > { %v7885_v10 = vpop.eup %7884  ;;  %7898 = vrcp.f32 %v5628_v11  ;;  %v5630_v59 = vadd.f32 1.0, %v7883_v29 }
 0x845   : > { %v7887_v1 = vpop.eup %7886  ;;  %7900 = vrcp.f32 %v5629_v13 }
 0x846   : > { %v7889_v9 = vpop.eup %7888  ;;  %v6562_v14 = vpack.c.bf16 %v7887_v1, %v7885_v10  ;;  %7902 = vrcp.f32 %v5630_v59 }
 0x847   : > { %v7891_v61 = vpop.eup %7890 }
 0x848   : > { %v7893_v45 = vpop.eup %7892  ;;  %6004 = vst [vmem:[%s9908_s29 + $0x18] sm:$0xff] %v6562_v14  ;;  %v6563_v53 = vpack.c.bf16 %v7891_v61, %v7889_v9 }
 0x849   : > { %v7895_v46 = vpop.eup %7894  ;;  %v5631_v57 = vadd.f32 1.0, %v7893_v45 }
 0x84a   : > { %6005 = vst [vmem:[%s9908_s29 + $0x20] sm:$0xff] %v6563_v53  ;;  %v5632_v62 = vadd.f32 1.0, %v7895_v46 }
 0x84b   : > { %7904 = vrcp.f32 %v5631_v57 }
 0x84c   : > { %7906 = vrcp.f32 %v5632_v62 }
 0x84d   : > { %v7897_v41 = vpop.eup %7896 }
 0x84e   : > { %v7899_v35 = vpop.eup %7898 }
 0x84f   : > { %v7901_v2 = vpop.eup %7900  ;;  %v6564_v16 = vpack.c.bf16 %v7899_v35, %v7897_v41 }
 0x850   : > { %v7903_v8 = vpop.eup %7902 }
 0x851   : > { %6006 = vst [vmem:[%s9908_s29 + $0x28] sm:$0xff] %v6564_v16  ;;  %v6565_v3 = vpack.c.bf16 %v7903_v8, %v7901_v2 }
 0x853   : > { %6007 = vst [vmem:[%s9908_s29 + $0x30] sm:$0xff] %v6565_v3 }
 0x855   : > { %v7905_v19 = vpop.eup %7904 }
 0x856   : > { %v7907_v5 = vpop.eup %7906 }
 0x857   : > { %v6566_v50 = vpack.c.bf16 %v7907_v5, %v7905_v19 }
 0x859   : > { %6008 = vst [vmem:[%s9908_s29 + $0x38] sm:$0xff] %v6566_v50 }
 0x85a   : > { %8089 = shalt.err (!%p8086_p6)
}
 0x85b   : > { %s8090_s4 = scalar_lea.hbm %s9991_s26, 4096  ;;  %s8094_s30 = scalar_lea.hbm %s10102_s17, 8192 }
 0x85c   : > { %p8091_p5 = scmp.ne.s32.totalorder %s9991_s26, %s8090_s4  ;;  %p8095_p10 = scmp.lt.u32.totalorder %s9991_s26, %s10102_s17 }
 0x85d   : > { %p8096_p2 = scmp.lt.u32.totalorder %s8094_s30, %s8090_s4  ;;  %p8098_p4 = scmp.lt.u32.totalorder %s8090_s4, %s9991_s26 }
 0x85e   : > { %p8092_p9 = pnand %p8091_p5, %p10103_p7 }
 0x85f   : > { %p8097_p3 = por %p8096_p2, %p8095_p10 }
 0x860   : > { %p8093_p12 = pneg %p8092_p9 }
 0x861   : > { %p8099_p8 = por %p8098_p4, %p8097_p3 }
 0x863   : > { %p8100_p11 = pnand %p8099_p8, %p8093_p12 }
 0x865   : > { %8103 = shalt.err (!%p8100_p11)
}
 0x866   : > { %s8168_s28 = smov 128   ;;  %s8169_s27 = smov 8  }
 0x867   : > { %7089 = dma.vmem_to_hbm [thread:$0]  (%p10103_p7), %s9993_s16, 4096, %s9991_s26, %s9998_s19, %s8168_s28, %s8168_s28, %s8169_s27  }
 0x868 PF: > { %s10104_s24 = sld [smem:[#allocation22_spill]]  ;;  %s10105_s25 = sld [smem:[#allocation19_spill]] }
 0x869   : > { %s10106_s22 = sld [smem:[#allocation26_spill]] }
 0x86e   : > { %p7126_p13 = scmp.ge.s32.totalorder %s10104_s24, 2  ;;  %s6063_s21 = sand.u32 1, %s10105_s25  }
 0x86f   : > { %p10107_p1 = scmp.ne.s32.totalorder %s10106_s22, 0  ;;  %s6064_s18 = scalar_lea.sflag [#allocation4], %s6063_s21 }
 0x871   : > { %p7111_p0 = pnand %p7126_p13, %p10107_p1 }
 0x873   : > { %8137 = dma.done.wait (!%p7111_p0), %s6064_s18, 4096  }
 0x874   : > { %8139 = vsyncadd (!%p7111_p0), %s6064_s18, 4294963200  ;;  %s10108_s21 = sld [smem:[#allocation23_spill]]  ;;  %s10109_s18 = sld [smem:[#allocation20_spill]] }
 0x875   : > { %s10110_s19 = sld [smem:[#allocation21_spill]]  ;;  %s10111_s20 = sld [smem:[#allocation24_spill]] }
 0x87a   : > { %p29_p6 = scmp.ge.s32.totalorder %s10108_s21, 4  }
 0x87c   :  { %31 = sbr.rel (!%p29_p6) target bundleno = 11 (0xb), region = 140 }
 0x883   :  { %6069 = vsyncpa [#allocation3], 1 }
 0x884   :  { %6071 = vsyncpa [#allocation3 + $0x1], 1 }
 0x885   :  { %6072 = vsyncpa [#allocation6], 1 }
 0x886   :  { %6073 = vsyncpa [#allocation9], 1 }
 0x887   :  { %6074 = vsyncpa [#allocation12], 1 }
 0x888   :  { %6075 = vsyncpa [#allocation4], 1 }
 0x889   :  { %6077 = vsyncpa [#allocation4 + $0x1], 1 }

</bundles_post_ra>
